<compile_context>
chip_gen: v7x
topology: tpu7x:2x2x1
jax: 0.10.0
libtpu: 0.0.40
codegen_flags: <defaults>
</compile_context>

<pallas_src>
import functools

import jax
import jax.numpy as jnp
import numpy as np
from jax.experimental import pallas as pl
from jax.experimental.pallas import tpu as pltpu

ALPHA = 0.2            # LeakyReLU slope
NEG_BIG = -9e15        # mask fill value (matches -9000000000000000.0)
BN_EPS = 1e-5


# --------------------------------- kernel ------------------------------------
def op_attn_kernel(
    h_ref, mask_ref, wcat_ref, c1w_ref, b1_ref, fc1_ref, fc2_ref, c2w_ref, b2_ref,
    out_ref, *, N, Bt, D, H,
):
    Dp2 = D + 2
    M = Bt * N

    # per-row "position within batch element" masks (batch boundaries of the fused slab)
    row = jax.lax.broadcasted_iota(jnp.int32, (M, 1), 0) % N
    first = row == 0
    last = row == (N - 1)

    # ----- fused projection for ALL heads: (M, Din) @ (Din, H*(D+2)) -----
    whcat_all = jnp.dot(h_ref[...], wcat_ref[...],
                        preferred_element_type=jnp.float32)             # (M, H*(D+2)) f32

    # per-batch circular rolls of the whole multi-head slab (XLU rolls, once for all heads)
    whcat_all_m = jnp.where(first, pltpu.roll(whcat_all, (1 - N) % M, axis=0),
                            pltpu.roll(whcat_all, 1, axis=0))           # roll(+1) per batch
    whcat_all_p = jnp.where(last, pltpu.roll(whcat_all, N - 1, axis=0),
                            pltpu.roll(whcat_all, M - 1, axis=0))       # roll(-1) per batch

    m = mask_ref[...]                                                   # (M, 3) f32
    neg = jnp.float32(NEG_BIG)
    m0 = m[:, 0:1] > 0
    m1 = m[:, 1:2] > 0
    m2 = m[:, 2:3] > 0

    def leaky(v):
        return jnp.where(v > 0, v, ALPHA * v)

    def conv_bn(x, w, b):
        # Conv1d k=3 pad=1 as one matmul with pre-stacked taps; BN folded into w/b.
        x_prev = jnp.where(first, 0.0, pltpu.roll(x, 1, axis=0))
        x_next = jnp.where(last, 0.0, pltpu.roll(x, M - 1, axis=0))
        xcat = jnp.concatenate([x_prev, x, x_next], axis=1).astype(jnp.bfloat16)  # (M, 3D)
        return jnp.dot(xcat, w, preferred_element_type=jnp.float32) + b

    head_outs = []
    for hh in range(H):                      # H is small & static -> unrolled per-head
        base = hh * Dp2
        wh    = whcat_all[:, base:base + D]
        wh_m  = whcat_all_m[:, base:base + D]
        wh_p  = whcat_all_p[:, base:base + D]
        wh1   = whcat_all[:, base + D:base + D + 1]
        wh2   = whcat_all[:, base + D + 1:base + D + 2]
        wh2_m = whcat_all_m[:, base + D + 1:base + D + 2]
        wh2_p = whcat_all_p[:, base + D + 1:base + D + 2]

        e0 = leaky(wh1 + wh2_m)
        e1 = leaky(wh1 + wh2)
        e2 = leaky(wh1 + wh2_p)
        t0 = jnp.where(m0, neg, e0)
        t1 = jnp.where(m1, neg, e1)
        t2 = jnp.where(m2, neg, e2)

        # lane-wise 3-way softmax (no cross-lane reduce)
        mx = jnp.maximum(t0, jnp.maximum(t1, t2))
        p0 = jnp.exp(t0 - mx)
        p1 = jnp.exp(t1 - mx)
        p2 = jnp.exp(t2 - mx)
        inv = pl.reciprocal(p0 + p1 + p2, approx=True)
        # TODO(synk): nn.Dropout on the attention weights / input h is eval-mode identity.
        h_new = (p0 * wh_m + p1 * wh + p2 * wh_p) * inv                 # (M, D)

        # ----- LightweightResidualBlock (stride=1, in==out => identity shortcut) -----
        out1 = jnp.maximum(conv_bn(h_new, c1w_ref[hh], b1_ref[hh]), 0.0)  # conv1+bn1+relu

        # SE block: per-batch global average pool over length, FC -> relu -> FC -> sigmoid
        o3 = out1.reshape(Bt, N, D)
        pooled = jnp.mean(o3, axis=1)                                   # (Bt, D)
        s = jnp.dot(pooled.astype(jnp.bfloat16), fc1_ref[hh],
                    preferred_element_type=jnp.float32)
        s = jnp.maximum(s, 0.0)
        s = jnp.dot(s.astype(jnp.bfloat16), fc2_ref[hh],
                    preferred_element_type=jnp.float32)
        gate = jax.nn.sigmoid(s)                                        # (Bt, D)
        out1 = (o3 * gate[:, None, :]).reshape(M, D)

        out2 = conv_bn(out1, c2w_ref[hh], b2_ref[hh]) + h_new           # conv2+bn2 + shortcut
        head_outs.append(jnp.maximum(out2, 0.0))

    # single lane-dense store: (M, H*D)
    out_ref[...] = jnp.concatenate(head_outs, axis=1)


# -------------------------------- wrapper ------------------------------------
def op_multihead_attn_block(h, op_mask, params, *, activation=None, concat=True,
                            batch_block=None):
    B, N, Din = h.shape
    H, _, Dp2 = params["wcat"].shape
    D = Dp2 - 2
    Dr = params["fc1"].shape[2]

    if batch_block is None:
        Bt = 1
        for cand in range(1, B + 1):          # biggest divisor of B, Bt*N <= 1024, 8-aligned
            if B % cand == 0 and cand * N <= 1024 and (cand * N) % 8 == 0:
                Bt = cand
        if (Bt * N) % 8 != 0:
            Bt = B                            # fall back to one block (== full array)
    else:
        Bt = batch_block
        assert B % Bt == 0
    nb = B // Bt
    M = Bt * N

    h2 = h.reshape(B * N, Din).astype(jnp.bfloat16)        # bf16 matmul operand, half DMA
    m2 = op_mask.reshape(B * N, 3)
    # all heads' projection weights fused into one (Din, H*(D+2)) matrix
    wcat = jnp.swapaxes(params["wcat"], 0, 1).reshape(Din, H * Dp2)

    kernel = functools.partial(op_attn_kernel, N=N, Bt=Bt, D=D, H=H)

    out = pl.pallas_call(
        kernel,
        out_shape=jax.ShapeDtypeStruct((B * N, H * D), jnp.float32),
        grid=(nb,),
        in_specs=[
            pl.BlockSpec((M, Din), lambda bb: (bb, 0)),              # h slab (bf16)
            pl.BlockSpec((M, 3), lambda bb: (bb, 0)),                # op_mask slab
            pl.BlockSpec((Din, H * Dp2), lambda bb: (0, 0)),         # fused [W|Wa1|Wa2] all heads
            pl.BlockSpec((H, 3 * D, D), lambda bb: (0, 0, 0)),       # conv1 (BN folded)
            pl.BlockSpec((H, 1, D), lambda bb: (0, 0, 0)),           # conv1 bias (BN)
            pl.BlockSpec((H, D, Dr), lambda bb: (0, 0, 0)),          # SE fc1
            pl.BlockSpec((H, Dr, D), lambda bb: (0, 0, 0)),          # SE fc2
            pl.BlockSpec((H, 3 * D, D), lambda bb: (0, 0, 0)),       # conv2 (BN folded)
            pl.BlockSpec((H, 1, D), lambda bb: (0, 0, 0)),           # conv2 bias (BN)
        ],
        out_specs=pl.BlockSpec((M, H * D), lambda bb: (bb, 0)),      # lane-dense output
        compiler_params=pltpu.CompilerParams(
            dimension_semantics=("parallel",)),
    )(h2, m2, wcat, params["c1w"], params["b1"],
      params["fc1"], params["fc2"], params["c2w"], params["b2"])

    if concat:
        out = out.reshape(B, N, H * D)                       # contiguous -> free reshape
    else:
        out = out.reshape(B * N, H, D).mean(axis=1).reshape(B, N, D)
    return out if activation is None else activation(out)


# ---------------------------- pure-JAX reference ------------------------------
def reference(h, op_mask, params, *, activation=None, concat=True):
    """PyTorch-faithful math on the same (fused, bf16) parameters, in plain JAX."""
    H, _, Dp2 = params["wcat"].shape
    D = Dp2 - 2
    bf = lambda x: x.astype(jnp.bfloat16)
    heads = []
    for hh in range(H):
        whcat = jnp.dot(bf(h), params["wcat"][hh],
                        preferred_element_type=jnp.float32)             # (B, N, D+2)
        wh, wh1, wh2 = whcat[..., :D], whcat[..., D:D + 1], whcat[..., D + 1:D + 2]
        wh_m, wh_p = jnp.roll(wh, 1, axis=1), jnp.roll(wh, -1, axis=1)
        wh2c = jnp.concatenate(
            [jnp.roll(wh2, 1, axis=1), wh2, jnp.roll(wh2, -1, axis=1)], axis=-1)
        e = wh1 + wh2c
        e = jnp.where(e > 0, e, ALPHA * e)
        att = jnp.where(op_mask > 0, NEG_BIG, e)
        att = jax.nn.softmax(att, axis=-1)
        h_new = att[..., 0:1] * wh_m + att[..., 1:2] * wh + att[..., 2:3] * wh_p

        def conv_bn(x, w, b):
            xm = jnp.concatenate([jnp.zeros_like(x[:, :1]), x[:, :-1]], axis=1)
            xp = jnp.concatenate([x[:, 1:], jnp.zeros_like(x[:, :1])], axis=1)
            xcat = jnp.concatenate([xm, x, xp], axis=-1)
            return jnp.dot(bf(xcat), w, preferred_element_type=jnp.float32) + b

        o1 = jnp.maximum(conv_bn(h_new, params["c1w"][hh], params["b1"][hh]), 0.0)
        pooled = o1.mean(axis=1)
        s = jnp.maximum(jnp.dot(bf(pooled), params["fc1"][hh],
                                preferred_element_type=jnp.float32), 0.0)
        s = jax.nn.sigmoid(jnp.dot(bf(s), params["fc2"][hh],
                                   preferred_element_type=jnp.float32))
        o1 = o1 * s[:, None, :]
        o2 = conv_bn(o1, params["c2w"][hh], params["b2"][hh]) + h_new
        heads.append(jnp.maximum(o2, 0.0))
    out = jnp.concatenate(heads, axis=-1) if concat else jnp.mean(jnp.stack(heads, -1), -1)
    return out if activation is None else activation(out)


# --------------------------------- params ------------------------------------
def make_params(key, input_dim, output_dim, num_heads, reduction=16):
    Din, D, H = input_dim, output_dim, num_heads
    Dr = max(D // reduction, 1)

    def xavier(k, shape, gain=1.414):
        fan_in, fan_out = shape[0], shape[1]
        lim = gain * np.sqrt(6.0 / (fan_in + fan_out))
        return jax.random.uniform(k, shape, jnp.float32, -lim, lim)

    # BN eval mode, default init: scale = gamma/sqrt(var+eps), bias = beta - mean*scale
    bn_scale = jnp.full((D,), 1.0 / np.sqrt(1.0 + BN_EPS), jnp.float32)
    bn_bias = jnp.zeros((1, D), jnp.float32)

    wcat_l, c1_l, c2_l, b1_l, b2_l, f1_l, f2_l = [], [], [], [], [], [], []
    for kh in jax.random.split(key, H):
        ks = jax.random.split(kh, 6)
        W = xavier(ks[0], (Din, D))
        a = xavier(ks[1], (2 * D, 1))
        a1, a2 = a[:D], a[D:]
        wcat = jnp.concatenate([W, W @ a1, W @ a2], axis=1)             # (Din, D+2)

        def conv_fused(k):
            # torch Conv1d weight (Cout, Cin, 3); taps stacked as [prev; center; next]
            wt = jax.random.normal(k, (D, D, 3), jnp.float32) * (1.0 / np.sqrt(3 * D))
            w = jnp.concatenate([wt[:, :, 0].T, wt[:, :, 1].T, wt[:, :, 2].T], axis=0)
            return w * bn_scale[None, :]                                # fold BN scale

        c1_l.append(conv_fused(ks[2]))
        c2_l.append(conv_fused(ks[3]))
        b1_l.append(bn_bias)
        b2_l.append(bn_bias)
        fc1 = jax.random.normal(ks[4], (Dr, D), jnp.float32) * (1.0 / np.sqrt(D))
        fc2 = jax.random.normal(ks[5], (D, Dr), jnp.float32) * (1.0 / np.sqrt(Dr))
        f1_l.append(fc1.T)                                              # (D, Dr)
        f2_l.append(fc2.T)                                              # (Dr, D)
        wcat_l.append(wcat)

    stack = lambda lst, dt: jnp.stack(lst).astype(dt)
    return {
        "wcat": stack(wcat_l, jnp.bfloat16),   # (H, Din, D+2)
        "c1w": stack(c1_l, jnp.bfloat16),      # (H, 3D, D)
        "b1": stack(b1_l, jnp.float32),        # (H, 1, D)
        "fc1": stack(f1_l, jnp.bfloat16),      # (H, D, Dr)
        "fc2": stack(f2_l, jnp.bfloat16),      # (H, Dr, D)
        "c2w": stack(c2_l, jnp.bfloat16),      # (H, 3D, D)
        "b2": stack(b2_l, jnp.float32),        # (H, 1, D)
    }


# ----------------------------------- main -------------------------------------
if __name__ == "__main__":
    B, N, Din, D, H = 2, 8, 16, 32, 4        # concat width H*D = 128 (lane-dense output)

    key = jax.random.PRNGKey(0)
    k_h, k_m, k_p = jax.random.split(key, 3)

    h = jax.random.normal(k_h, (B, N, Din), jnp.float32)
    op_mask = jax.random.bernoulli(k_m, 0.4, (B, N, 3)).astype(jnp.float32)
    params = make_params(k_p, Din, D, H)

    out = jax.block_until_ready(op_multihead_attn_block(h, op_mask, params))
    ref = jax.block_until_ready(reference(h, op_mask, params))

    assert out.shape == (B, N, H * D)
    np.testing.assert_allclose(np.asarray(out), np.asarray(ref), rtol=5e-3, atol=5e-3)

    print("KERNEL_OK")
</pallas_src>

<mosaic_0001>
module attributes {stable_mosaic.version = 11 : i64} {
  func.func @op_attn_kernel(%arg0: i32, %arg1: memref<16x16xbf16, #tpu.memory_space<vmem>>, %arg2: memref<16x3xf32, #tpu.memory_space<vmem>>, %arg3: memref<16x136xbf16, #tpu.memory_space<vmem>>, %arg4: memref<4x96x32xbf16, #tpu.memory_space<vmem>>, %arg5: memref<4x1x32xf32, #tpu.memory_space<vmem>>, %arg6: memref<4x32x2xbf16, #tpu.memory_space<vmem>>, %arg7: memref<4x2x32xbf16, #tpu.memory_space<vmem>>, %arg8: memref<4x96x32xbf16, #tpu.memory_space<vmem>>, %arg9: memref<4x1x32xf32, #tpu.memory_space<vmem>>, %arg10: memref<16x128xf32, #tpu.memory_space<vmem>>) attributes {dimension_semantics = [#tpu.dimension_semantics<parallel>], iteration_bounds = array<i64: 1>, scalar_prefetch = 0 : i64, scratch_operands = 0 : i64, tpu.core_type = #tpu.core_type<tc>, window_params = [{transform_indices = @transform_0, window_bounds = array<i64: 16, 16>}, {transform_indices = @transform_1, window_bounds = array<i64: 16, 3>}, {pipeline_mode = #tpu.pipeline_mode<synchronous>, transform_indices = @transform_2, window_bounds = array<i64: 16, 136>}, {pipeline_mode = #tpu.pipeline_mode<synchronous>, transform_indices = @transform_3, window_bounds = array<i64: 4, 96, 32>}, {pipeline_mode = #tpu.pipeline_mode<synchronous>, transform_indices = @transform_4, window_bounds = array<i64: 4, 1, 32>}, {pipeline_mode = #tpu.pipeline_mode<synchronous>, transform_indices = @transform_5, window_bounds = array<i64: 4, 32, 2>}, {pipeline_mode = #tpu.pipeline_mode<synchronous>, transform_indices = @transform_6, window_bounds = array<i64: 4, 2, 32>}, {pipeline_mode = #tpu.pipeline_mode<synchronous>, transform_indices = @transform_7, window_bounds = array<i64: 4, 96, 32>}, {pipeline_mode = #tpu.pipeline_mode<synchronous>, transform_indices = @transform_8, window_bounds = array<i64: 4, 1, 32>}, {transform_indices = @transform_9, window_bounds = array<i64: 16, 128>}]} {
    %0 = tpu.iota {dimensions = array<i32: 0>} : vector<16x1xi32>
    %c8_i32 = arith.constant 8 : i32
    %c0_i32 = arith.constant 0 : i32
    %1 = arith.cmpi eq, %c8_i32, %c0_i32 : i32
    %c1_i32 = arith.constant 1 : i32
    %2 = arith.select %1, %c1_i32, %c8_i32 : i32
    %3 = vector.broadcast %2 : i32 to vector<16x1xi32>
    %4 = arith.remsi %0, %3 : vector<16x1xi32>
    %c0_i32_0 = arith.constant 0 : i32
    %5 = vector.broadcast %c0_i32_0 : i32 to vector<16x1xi32>
    %6 = arith.cmpi ne, %4, %5 : vector<16x1xi32>
    %c0_i32_1 = arith.constant 0 : i32
    %7 = vector.broadcast %c0_i32_1 : i32 to vector<16x1xi32>
    %8 = arith.cmpi slt, %4, %7 : vector<16x1xi32>
    %c0_i32_2 = arith.constant 0 : i32
    %9 = arith.cmpi slt, %2, %c0_i32_2 : i32
    %10 = vector.broadcast %9 : i1 to vector<16x1xi1>
    %11 = vector.broadcast %10 : vector<16x1xi1> to vector<16x1xi1>
    %12 = arith.xori %8, %11 : vector<16x1xi1>
    %13 = arith.andi %12, %6 : vector<16x1xi1>
    %14 = vector.broadcast %2 : i32 to vector<16x1xi32>
    %15 = arith.addi %4, %14 : vector<16x1xi32>
    %16 = arith.select %13, %15, %4 : vector<16x1xi1>, vector<16x1xi32>
    %c0_i32_3 = arith.constant 0 : i32
    %17 = vector.broadcast %c0_i32_3 : i32 to vector<16x1xi32>
    %18 = arith.cmpi eq, %16, %17 : vector<16x1xi32>
    %c7_i32 = arith.constant 7 : i32
    %19 = vector.broadcast %c7_i32 : i32 to vector<16x1xi32>
    %20 = arith.cmpi eq, %16, %19 : vector<16x1xi32>
    %c0 = arith.constant 0 : index
    %c0_4 = arith.constant 0 : index
    %21 = vector.load %arg1[%c0, %c0_4] : memref<16x16xbf16, #tpu.memory_space<vmem>>, vector<16x16xbf16>
    %c0_5 = arith.constant 0 : index
    %c0_6 = arith.constant 0 : index
    %22 = vector.load %arg3[%c0_5, %c0_6] : memref<16x136xbf16, #tpu.memory_space<vmem>>, vector<16x136xbf16>
    %cst = arith.constant dense<0.000000e+00> : vector<16x136xf32>
    %23 = tpu.matmul %21, %22, %cst {dimension_numbers = #tpu.dot_dimension_numbers<[1], [0], [0], [1], [0, 0, 1, 1], [], []>} : vector<16x16xbf16>, vector<16x136xbf16>, vector<16x136xf32> -> vector<16x136xf32>
    %c9_i32 = arith.constant 9 : i32
    %24 = tpu.dynamic_rotate %23 by %c9_i32 dim 0 : vector<16x136xf32>, i32 -> vector<16x136xf32>
    %c1_i32_7 = arith.constant 1 : i32
    %25 = tpu.dynamic_rotate %23 by %c1_i32_7 dim 0 : vector<16x136xf32>, i32 -> vector<16x136xf32>
    %26 = vector.shape_cast %18 : vector<16x1xi1> to vector<16x1xi1>
    %27 = vector.broadcast %26 : vector<16x1xi1> to vector<16x136xi1>
    %28 = arith.select %27, %24, %25 : vector<16x136xi1>, vector<16x136xf32>
    %c7_i32_8 = arith.constant 7 : i32
    %29 = tpu.dynamic_rotate %23 by %c7_i32_8 dim 0 : vector<16x136xf32>, i32 -> vector<16x136xf32>
    %c15_i32 = arith.constant 15 : i32
    %30 = tpu.dynamic_rotate %23 by %c15_i32 dim 0 : vector<16x136xf32>, i32 -> vector<16x136xf32>
    %31 = vector.shape_cast %20 : vector<16x1xi1> to vector<16x1xi1>
    %32 = vector.broadcast %31 : vector<16x1xi1> to vector<16x136xi1>
    %33 = arith.select %32, %29, %30 : vector<16x136xi1>, vector<16x136xf32>
    %c0_9 = arith.constant 0 : index
    %c0_10 = arith.constant 0 : index
    %34 = vector.load %arg2[%c0_9, %c0_10] : memref<16x3xf32, #tpu.memory_space<vmem>>, vector<16x3xf32>
    %35 = vector.extract_strided_slice %34 {offsets = [0, 0], sizes = [16, 1], strides = [1, 1]} : vector<16x3xf32> to vector<16x1xf32>
    %cst_11 = arith.constant 0.000000e+00 : f32
    %36 = vector.broadcast %cst_11 : f32 to vector<16x1xf32>
    %37 = arith.cmpf ogt, %35, %36 : vector<16x1xf32>
    %38 = vector.extract_strided_slice %34 {offsets = [0, 1], sizes = [16, 1], strides = [1, 1]} : vector<16x3xf32> to vector<16x1xf32>
    %cst_12 = arith.constant 0.000000e+00 : f32
    %39 = vector.broadcast %cst_12 : f32 to vector<16x1xf32>
    %40 = arith.cmpf ogt, %38, %39 : vector<16x1xf32>
    %41 = vector.extract_strided_slice %34 {offsets = [0, 2], sizes = [16, 1], strides = [1, 1]} : vector<16x3xf32> to vector<16x1xf32>
    %cst_13 = arith.constant 0.000000e+00 : f32
    %42 = vector.broadcast %cst_13 : f32 to vector<16x1xf32>
    %43 = arith.cmpf ogt, %41, %42 : vector<16x1xf32>
    %44 = vector.extract_strided_slice %23 {offsets = [0, 0], sizes = [16, 32], strides = [1, 1]} : vector<16x136xf32> to vector<16x32xf32>
    %45 = vector.extract_strided_slice %28 {offsets = [0, 0], sizes = [16, 32], strides = [1, 1]} : vector<16x136xf32> to vector<16x32xf32>
    %46 = vector.extract_strided_slice %33 {offsets = [0, 0], sizes = [16, 32], strides = [1, 1]} : vector<16x136xf32> to vector<16x32xf32>
    %47 = vector.extract_strided_slice %23 {offsets = [0, 32], sizes = [16, 1], strides = [1, 1]} : vector<16x136xf32> to vector<16x1xf32>
    %48 = vector.extract_strided_slice %23 {offsets = [0, 33], sizes = [16, 1], strides = [1, 1]} : vector<16x136xf32> to vector<16x1xf32>
    %49 = vector.extract_strided_slice %28 {offsets = [0, 33], sizes = [16, 1], strides = [1, 1]} : vector<16x136xf32> to vector<16x1xf32>
    %50 = vector.extract_strided_slice %33 {offsets = [0, 33], sizes = [16, 1], strides = [1, 1]} : vector<16x136xf32> to vector<16x1xf32>
    %51 = arith.addf %47, %49 : vector<16x1xf32>
    %cst_14 = arith.constant 0.000000e+00 : f32
    %52 = vector.broadcast %cst_14 : f32 to vector<16x1xf32>
    %53 = arith.cmpf ogt, %51, %52 : vector<16x1xf32>
    %cst_15 = arith.constant 2.000000e-01 : f32
    %54 = vector.broadcast %cst_15 : f32 to vector<16x1xf32>
    %55 = arith.mulf %54, %51 : vector<16x1xf32>
    %56 = arith.select %53, %51, %55 : vector<16x1xi1>, vector<16x1xf32>
    %57 = arith.addf %47, %48 : vector<16x1xf32>
    %cst_16 = arith.constant 0.000000e+00 : f32
    %58 = vector.broadcast %cst_16 : f32 to vector<16x1xf32>
    %59 = arith.cmpf ogt, %57, %58 : vector<16x1xf32>
    %cst_17 = arith.constant 2.000000e-01 : f32
    %60 = vector.broadcast %cst_17 : f32 to vector<16x1xf32>
    %61 = arith.mulf %60, %57 : vector<16x1xf32>
    %62 = arith.select %59, %57, %61 : vector<16x1xi1>, vector<16x1xf32>
    %63 = arith.addf %47, %50 : vector<16x1xf32>
    %cst_18 = arith.constant 0.000000e+00 : f32
    %64 = vector.broadcast %cst_18 : f32 to vector<16x1xf32>
    %65 = arith.cmpf ogt, %63, %64 : vector<16x1xf32>
    %cst_19 = arith.constant 2.000000e-01 : f32
    %66 = vector.broadcast %cst_19 : f32 to vector<16x1xf32>
    %67 = arith.mulf %66, %63 : vector<16x1xf32>
    %68 = arith.select %65, %63, %67 : vector<16x1xi1>, vector<16x1xf32>
    %cst_20 = arith.constant -9.000000e+15 : f32
    %69 = vector.broadcast %cst_20 : f32 to vector<16x1xf32>
    %70 = arith.select %37, %69, %56 : vector<16x1xi1>, vector<16x1xf32>
    %cst_21 = arith.constant -9.000000e+15 : f32
    %71 = vector.broadcast %cst_21 : f32 to vector<16x1xf32>
    %72 = arith.select %40, %71, %62 : vector<16x1xi1>, vector<16x1xf32>
    %cst_22 = arith.constant -9.000000e+15 : f32
    %73 = vector.broadcast %cst_22 : f32 to vector<16x1xf32>
    %74 = arith.select %43, %73, %68 : vector<16x1xi1>, vector<16x1xf32>
    %75 = arith.maximumf %72, %74 : vector<16x1xf32>
    %76 = arith.maximumf %70, %75 : vector<16x1xf32>
    %77 = arith.subf %70, %76 : vector<16x1xf32>
    %78 = math.exp %77 : vector<16x1xf32>
    %79 = arith.subf %72, %76 : vector<16x1xf32>
    %80 = math.exp %79 : vector<16x1xf32>
    %81 = arith.subf %74, %76 : vector<16x1xf32>
    %82 = math.exp %81 : vector<16x1xf32>
    %83 = arith.addf %78, %80 : vector<16x1xf32>
    %84 = arith.addf %83, %82 : vector<16x1xf32>
    %85 = tpu.reciprocal %84 {approx = true} : vector<16x1xf32> -> vector<16x1xf32>
    %86 = vector.broadcast %78 : vector<16x1xf32> to vector<16x32xf32>
    %87 = arith.mulf %86, %45 : vector<16x32xf32>
    %88 = vector.broadcast %80 : vector<16x1xf32> to vector<16x32xf32>
    %89 = arith.mulf %88, %44 : vector<16x32xf32>
    %90 = arith.addf %87, %89 : vector<16x32xf32>
    %91 = vector.broadcast %82 : vector<16x1xf32> to vector<16x32xf32>
    %92 = arith.mulf %91, %46 : vector<16x32xf32>
    %93 = arith.addf %90, %92 : vector<16x32xf32>
    %94 = vector.broadcast %85 : vector<16x1xf32> to vector<16x32xf32>
    %95 = arith.mulf %93, %94 : vector<16x32xf32>
    %c0_23 = arith.constant 0 : index
    %c0_24 = arith.constant 0 : index
    %c0_25 = arith.constant 0 : index
    %96 = vector.load %arg4[%c0_23, %c0_24, %c0_25] : memref<4x96x32xbf16, #tpu.memory_space<vmem>>, vector<1x96x32xbf16>
    %97 = vector.shape_cast %96 : vector<1x96x32xbf16> to vector<96x32xbf16>
    %c0_26 = arith.constant 0 : index
    %c0_27 = arith.constant 0 : index
    %c0_28 = arith.constant 0 : index
    %98 = vector.load %arg5[%c0_26, %c0_27, %c0_28] : memref<4x1x32xf32, #tpu.memory_space<vmem>>, vector<1x1x32xf32>
    %99 = vector.shape_cast %98 : vector<1x1x32xf32> to vector<1x32xf32>
    %c1_i32_29 = arith.constant 1 : i32
    %100 = tpu.dynamic_rotate %95 by %c1_i32_29 dim 0 : vector<16x32xf32>, i32 -> vector<16x32xf32>
    %cst_30 = arith.constant 0.000000e+00 : f32
    %101 = vector.shape_cast %18 : vector<16x1xi1> to vector<16x1xi1>
    %102 = vector.broadcast %101 : vector<16x1xi1> to vector<16x32xi1>
    %103 = vector.broadcast %cst_30 : f32 to vector<16x32xf32>
    %104 = arith.select %102, %103, %100 : vector<16x32xi1>, vector<16x32xf32>
    %c15_i32_31 = arith.constant 15 : i32
    %105 = tpu.dynamic_rotate %95 by %c15_i32_31 dim 0 : vector<16x32xf32>, i32 -> vector<16x32xf32>
    %cst_32 = arith.constant 0.000000e+00 : f32
    %106 = vector.shape_cast %20 : vector<16x1xi1> to vector<16x1xi1>
    %107 = vector.broadcast %106 : vector<16x1xi1> to vector<16x32xi1>
    %108 = vector.broadcast %cst_32 : f32 to vector<16x32xf32>
    %109 = arith.select %107, %108, %105 : vector<16x32xi1>, vector<16x32xf32>
    %110 = tpu.concatenate %104, %95, %109 in 1 : vector<16x32xf32>, vector<16x32xf32>, vector<16x32xf32> -> vector<16x96xf32>
    %111 = arith.truncf %110 : vector<16x96xf32> to vector<16x96xbf16>
    %cst_33 = arith.constant dense<0.000000e+00> : vector<16x32xf32>
    %112 = tpu.matmul %111, %97, %cst_33 {dimension_numbers = #tpu.dot_dimension_numbers<[1], [0], [0], [1], [0, 0, 1, 1], [], []>} : vector<16x96xbf16>, vector<96x32xbf16>, vector<16x32xf32> -> vector<16x32xf32>
    %113 = vector.broadcast %99 : vector<1x32xf32> to vector<16x32xf32>
    %114 = arith.addf %112, %113 : vector<16x32xf32>
    %cst_34 = arith.constant 0.000000e+00 : f32
    %115 = vector.broadcast %cst_34 : f32 to vector<16x32xf32>
    %116 = arith.maximumf %114, %115 : vector<16x32xf32>
    %117 = vector.shape_cast %116 : vector<16x32xf32> to vector<2x8x32xf32>
    %cst_35 = arith.constant dense<0.000000e+00> : vector<2x32xf32>
    %118 = vector.multi_reduction <add>, %117, %cst_35 [1] : vector<2x8x32xf32> to vector<2x32xf32>
    %cst_36 = arith.constant 8.000000e+00 : f32
    %119 = vector.broadcast %cst_36 : f32 to vector<2x32xf32>
    %120 = arith.divf %118, %119 : vector<2x32xf32>
    %121 = arith.truncf %120 : vector<2x32xf32> to vector<2x32xbf16>
    %c0_37 = arith.constant 0 : index
    %c0_38 = arith.constant 0 : index
    %c0_39 = arith.constant 0 : index
    %122 = vector.load %arg6[%c0_37, %c0_38, %c0_39] : memref<4x32x2xbf16, #tpu.memory_space<vmem>>, vector<1x32x2xbf16>
    %123 = vector.shape_cast %122 : vector<1x32x2xbf16> to vector<32x2xbf16>
    %cst_40 = arith.constant dense<0.000000e+00> : vector<2x2xf32>
    %124 = tpu.matmul %121, %123, %cst_40 {dimension_numbers = #tpu.dot_dimension_numbers<[1], [0], [0], [1], [0, 0, 1, 1], [], []>} : vector<2x32xbf16>, vector<32x2xbf16>, vector<2x2xf32> -> vector<2x2xf32>
    %cst_41 = arith.constant 0.000000e+00 : f32
    %125 = vector.broadcast %cst_41 : f32 to vector<2x2xf32>
    %126 = arith.maximumf %124, %125 : vector<2x2xf32>
    %127 = arith.truncf %126 : vector<2x2xf32> to vector<2x2xbf16>
    %c0_42 = arith.constant 0 : index
    %c0_43 = arith.constant 0 : index
    %c0_44 = arith.constant 0 : index
    %128 = vector.load %arg7[%c0_42, %c0_43, %c0_44] : memref<4x2x32xbf16, #tpu.memory_space<vmem>>, vector<1x2x32xbf16>
    %129 = vector.shape_cast %128 : vector<1x2x32xbf16> to vector<2x32xbf16>
    %cst_45 = arith.constant dense<0.000000e+00> : vector<2x32xf32>
    %130 = tpu.matmul %127, %129, %cst_45 {dimension_numbers = #tpu.dot_dimension_numbers<[1], [0], [0], [1], [0, 0, 1, 1], [], []>} : vector<2x2xbf16>, vector<2x32xbf16>, vector<2x32xf32> -> vector<2x32xf32>
    %131 = arith.negf %130 : vector<2x32xf32>
    %132 = math.exp %131 : vector<2x32xf32>
    %cst_46 = arith.constant 1.000000e+00 : f32
    %133 = vector.broadcast %cst_46 : f32 to vector<2x32xf32>
    %134 = arith.addf %133, %132 : vector<2x32xf32>
    %135 = arith.divf %133, %134 : vector<2x32xf32>
    %136 = vector.shape_cast %135 : vector<2x32xf32> to vector<2x1x32xf32>
    %137 = vector.broadcast %136 : vector<2x1x32xf32> to vector<2x8x32xf32>
    %138 = arith.mulf %117, %137 : vector<2x8x32xf32>
    %139 = vector.shape_cast %138 : vector<2x8x32xf32> to vector<16x32xf32>
    %c0_47 = arith.constant 0 : index
    %c0_48 = arith.constant 0 : index
    %c0_49 = arith.constant 0 : index
    %140 = vector.load %arg8[%c0_47, %c0_48, %c0_49] : memref<4x96x32xbf16, #tpu.memory_space<vmem>>, vector<1x96x32xbf16>
    %141 = vector.shape_cast %140 : vector<1x96x32xbf16> to vector<96x32xbf16>
    %c0_50 = arith.constant 0 : index
    %c0_51 = arith.constant 0 : index
    %c0_52 = arith.constant 0 : index
    %142 = vector.load %arg9[%c0_50, %c0_51, %c0_52] : memref<4x1x32xf32, #tpu.memory_space<vmem>>, vector<1x1x32xf32>
    %143 = vector.shape_cast %142 : vector<1x1x32xf32> to vector<1x32xf32>
    %c1_i32_53 = arith.constant 1 : i32
    %144 = tpu.dynamic_rotate %139 by %c1_i32_53 dim 0 : vector<16x32xf32>, i32 -> vector<16x32xf32>
    %cst_54 = arith.constant 0.000000e+00 : f32
    %145 = vector.shape_cast %18 : vector<16x1xi1> to vector<16x1xi1>
    %146 = vector.broadcast %145 : vector<16x1xi1> to vector<16x32xi1>
    %147 = vector.broadcast %cst_54 : f32 to vector<16x32xf32>
    %148 = arith.select %146, %147, %144 : vector<16x32xi1>, vector<16x32xf32>
    %c15_i32_55 = arith.constant 15 : i32
    %149 = tpu.dynamic_rotate %139 by %c15_i32_55 dim 0 : vector<16x32xf32>, i32 -> vector<16x32xf32>
    %cst_56 = arith.constant 0.000000e+00 : f32
    %150 = vector.shape_cast %20 : vector<16x1xi1> to vector<16x1xi1>
    %151 = vector.broadcast %150 : vector<16x1xi1> to vector<16x32xi1>
    %152 = vector.broadcast %cst_56 : f32 to vector<16x32xf32>
    %153 = arith.select %151, %152, %149 : vector<16x32xi1>, vector<16x32xf32>
    %154 = tpu.concatenate %148, %139, %153 in 1 : vector<16x32xf32>, vector<16x32xf32>, vector<16x32xf32> -> vector<16x96xf32>
    %155 = arith.truncf %154 : vector<16x96xf32> to vector<16x96xbf16>
    %cst_57 = arith.constant dense<0.000000e+00> : vector<16x32xf32>
    %156 = tpu.matmul %155, %141, %cst_57 {dimension_numbers = #tpu.dot_dimension_numbers<[1], [0], [0], [1], [0, 0, 1, 1], [], []>} : vector<16x96xbf16>, vector<96x32xbf16>, vector<16x32xf32> -> vector<16x32xf32>
    %157 = vector.broadcast %143 : vector<1x32xf32> to vector<16x32xf32>
    %158 = arith.addf %156, %157 : vector<16x32xf32>
    %159 = arith.addf %158, %95 : vector<16x32xf32>
    %cst_58 = arith.constant 0.000000e+00 : f32
    %160 = vector.broadcast %cst_58 : f32 to vector<16x32xf32>
    %161 = arith.maximumf %159, %160 : vector<16x32xf32>
    %162 = vector.extract_strided_slice %23 {offsets = [0, 34], sizes = [16, 32], strides = [1, 1]} : vector<16x136xf32> to vector<16x32xf32>
    %163 = vector.extract_strided_slice %28 {offsets = [0, 34], sizes = [16, 32], strides = [1, 1]} : vector<16x136xf32> to vector<16x32xf32>
    %164 = vector.extract_strided_slice %33 {offsets = [0, 34], sizes = [16, 32], strides = [1, 1]} : vector<16x136xf32> to vector<16x32xf32>
    %165 = vector.extract_strided_slice %23 {offsets = [0, 66], sizes = [16, 1], strides = [1, 1]} : vector<16x136xf32> to vector<16x1xf32>
    %166 = vector.extract_strided_slice %23 {offsets = [0, 67], sizes = [16, 1], strides = [1, 1]} : vector<16x136xf32> to vector<16x1xf32>
    %167 = vector.extract_strided_slice %28 {offsets = [0, 67], sizes = [16, 1], strides = [1, 1]} : vector<16x136xf32> to vector<16x1xf32>
    %168 = vector.extract_strided_slice %33 {offsets = [0, 67], sizes = [16, 1], strides = [1, 1]} : vector<16x136xf32> to vector<16x1xf32>
    %169 = arith.addf %165, %167 : vector<16x1xf32>
    %cst_59 = arith.constant 0.000000e+00 : f32
    %170 = vector.broadcast %cst_59 : f32 to vector<16x1xf32>
    %171 = arith.cmpf ogt, %169, %170 : vector<16x1xf32>
    %cst_60 = arith.constant 2.000000e-01 : f32
    %172 = vector.broadcast %cst_60 : f32 to vector<16x1xf32>
    %173 = arith.mulf %172, %169 : vector<16x1xf32>
    %174 = arith.select %171, %169, %173 : vector<16x1xi1>, vector<16x1xf32>
    %175 = arith.addf %165, %166 : vector<16x1xf32>
    %cst_61 = arith.constant 0.000000e+00 : f32
    %176 = vector.broadcast %cst_61 : f32 to vector<16x1xf32>
    %177 = arith.cmpf ogt, %175, %176 : vector<16x1xf32>
    %cst_62 = arith.constant 2.000000e-01 : f32
    %178 = vector.broadcast %cst_62 : f32 to vector<16x1xf32>
    %179 = arith.mulf %178, %175 : vector<16x1xf32>
    %180 = arith.select %177, %175, %179 : vector<16x1xi1>, vector<16x1xf32>
    %181 = arith.addf %165, %168 : vector<16x1xf32>
    %cst_63 = arith.constant 0.000000e+00 : f32
    %182 = vector.broadcast %cst_63 : f32 to vector<16x1xf32>
    %183 = arith.cmpf ogt, %181, %182 : vector<16x1xf32>
    %cst_64 = arith.constant 2.000000e-01 : f32
    %184 = vector.broadcast %cst_64 : f32 to vector<16x1xf32>
    %185 = arith.mulf %184, %181 : vector<16x1xf32>
    %186 = arith.select %183, %181, %185 : vector<16x1xi1>, vector<16x1xf32>
    %cst_65 = arith.constant -9.000000e+15 : f32
    %187 = vector.broadcast %cst_65 : f32 to vector<16x1xf32>
    %188 = arith.select %37, %187, %174 : vector<16x1xi1>, vector<16x1xf32>
    %cst_66 = arith.constant -9.000000e+15 : f32
    %189 = vector.broadcast %cst_66 : f32 to vector<16x1xf32>
    %190 = arith.select %40, %189, %180 : vector<16x1xi1>, vector<16x1xf32>
    %cst_67 = arith.constant -9.000000e+15 : f32
    %191 = vector.broadcast %cst_67 : f32 to vector<16x1xf32>
    %192 = arith.select %43, %191, %186 : vector<16x1xi1>, vector<16x1xf32>
    %193 = arith.maximumf %190, %192 : vector<16x1xf32>
    %194 = arith.maximumf %188, %193 : vector<16x1xf32>
    %195 = arith.subf %188, %194 : vector<16x1xf32>
    %196 = math.exp %195 : vector<16x1xf32>
    %197 = arith.subf %190, %194 : vector<16x1xf32>
    %198 = math.exp %197 : vector<16x1xf32>
    %199 = arith.subf %192, %194 : vector<16x1xf32>
    %200 = math.exp %199 : vector<16x1xf32>
    %201 = arith.addf %196, %198 : vector<16x1xf32>
    %202 = arith.addf %201, %200 : vector<16x1xf32>
    %203 = tpu.reciprocal %202 {approx = true} : vector<16x1xf32> -> vector<16x1xf32>
    %204 = vector.broadcast %196 : vector<16x1xf32> to vector<16x32xf32>
    %205 = arith.mulf %204, %163 : vector<16x32xf32>
    %206 = vector.broadcast %198 : vector<16x1xf32> to vector<16x32xf32>
    %207 = arith.mulf %206, %162 : vector<16x32xf32>
    %208 = arith.addf %205, %207 : vector<16x32xf32>
    %209 = vector.broadcast %200 : vector<16x1xf32> to vector<16x32xf32>
    %210 = arith.mulf %209, %164 : vector<16x32xf32>
    %211 = arith.addf %208, %210 : vector<16x32xf32>
    %212 = vector.broadcast %203 : vector<16x1xf32> to vector<16x32xf32>
    %213 = arith.mulf %211, %212 : vector<16x32xf32>
    %c1 = arith.constant 1 : index
    %c0_68 = arith.constant 0 : index
    %c0_69 = arith.constant 0 : index
    %214 = vector.load %arg4[%c1, %c0_68, %c0_69] : memref<4x96x32xbf16, #tpu.memory_space<vmem>>, vector<1x96x32xbf16>
    %215 = vector.shape_cast %214 : vector<1x96x32xbf16> to vector<96x32xbf16>
    %c1_70 = arith.constant 1 : index
    %c0_71 = arith.constant 0 : index
    %c0_72 = arith.constant 0 : index
    %216 = vector.load %arg5[%c1_70, %c0_71, %c0_72] : memref<4x1x32xf32, #tpu.memory_space<vmem>>, vector<1x1x32xf32>
    %217 = vector.shape_cast %216 : vector<1x1x32xf32> to vector<1x32xf32>
    %c1_i32_73 = arith.constant 1 : i32
    %218 = tpu.dynamic_rotate %213 by %c1_i32_73 dim 0 : vector<16x32xf32>, i32 -> vector<16x32xf32>
    %cst_74 = arith.constant 0.000000e+00 : f32
    %219 = vector.shape_cast %18 : vector<16x1xi1> to vector<16x1xi1>
    %220 = vector.broadcast %219 : vector<16x1xi1> to vector<16x32xi1>
    %221 = vector.broadcast %cst_74 : f32 to vector<16x32xf32>
    %222 = arith.select %220, %221, %218 : vector<16x32xi1>, vector<16x32xf32>
    %c15_i32_75 = arith.constant 15 : i32
    %223 = tpu.dynamic_rotate %213 by %c15_i32_75 dim 0 : vector<16x32xf32>, i32 -> vector<16x32xf32>
    %cst_76 = arith.constant 0.000000e+00 : f32
    %224 = vector.shape_cast %20 : vector<16x1xi1> to vector<16x1xi1>
    %225 = vector.broadcast %224 : vector<16x1xi1> to vector<16x32xi1>
    %226 = vector.broadcast %cst_76 : f32 to vector<16x32xf32>
    %227 = arith.select %225, %226, %223 : vector<16x32xi1>, vector<16x32xf32>
    %228 = tpu.concatenate %222, %213, %227 in 1 : vector<16x32xf32>, vector<16x32xf32>, vector<16x32xf32> -> vector<16x96xf32>
    %229 = arith.truncf %228 : vector<16x96xf32> to vector<16x96xbf16>
    %cst_77 = arith.constant dense<0.000000e+00> : vector<16x32xf32>
    %230 = tpu.matmul %229, %215, %cst_77 {dimension_numbers = #tpu.dot_dimension_numbers<[1], [0], [0], [1], [0, 0, 1, 1], [], []>} : vector<16x96xbf16>, vector<96x32xbf16>, vector<16x32xf32> -> vector<16x32xf32>
    %231 = vector.broadcast %217 : vector<1x32xf32> to vector<16x32xf32>
    %232 = arith.addf %230, %231 : vector<16x32xf32>
    %cst_78 = arith.constant 0.000000e+00 : f32
    %233 = vector.broadcast %cst_78 : f32 to vector<16x32xf32>
    %234 = arith.maximumf %232, %233 : vector<16x32xf32>
    %235 = vector.shape_cast %234 : vector<16x32xf32> to vector<2x8x32xf32>
    %cst_79 = arith.constant dense<0.000000e+00> : vector<2x32xf32>
    %236 = vector.multi_reduction <add>, %235, %cst_79 [1] : vector<2x8x32xf32> to vector<2x32xf32>
    %cst_80 = arith.constant 8.000000e+00 : f32
    %237 = vector.broadcast %cst_80 : f32 to vector<2x32xf32>
    %238 = arith.divf %236, %237 : vector<2x32xf32>
    %239 = arith.truncf %238 : vector<2x32xf32> to vector<2x32xbf16>
    %c1_81 = arith.constant 1 : index
    %c0_82 = arith.constant 0 : index
    %c0_83 = arith.constant 0 : index
    %240 = vector.load %arg6[%c1_81, %c0_82, %c0_83] : memref<4x32x2xbf16, #tpu.memory_space<vmem>>, vector<1x32x2xbf16>
    %241 = vector.shape_cast %240 : vector<1x32x2xbf16> to vector<32x2xbf16>
    %cst_84 = arith.constant dense<0.000000e+00> : vector<2x2xf32>
    %242 = tpu.matmul %239, %241, %cst_84 {dimension_numbers = #tpu.dot_dimension_numbers<[1], [0], [0], [1], [0, 0, 1, 1], [], []>} : vector<2x32xbf16>, vector<32x2xbf16>, vector<2x2xf32> -> vector<2x2xf32>
    %cst_85 = arith.constant 0.000000e+00 : f32
    %243 = vector.broadcast %cst_85 : f32 to vector<2x2xf32>
    %244 = arith.maximumf %242, %243 : vector<2x2xf32>
    %245 = arith.truncf %244 : vector<2x2xf32> to vector<2x2xbf16>
    %c1_86 = arith.constant 1 : index
    %c0_87 = arith.constant 0 : index
    %c0_88 = arith.constant 0 : index
    %246 = vector.load %arg7[%c1_86, %c0_87, %c0_88] : memref<4x2x32xbf16, #tpu.memory_space<vmem>>, vector<1x2x32xbf16>
    %247 = vector.shape_cast %246 : vector<1x2x32xbf16> to vector<2x32xbf16>
    %cst_89 = arith.constant dense<0.000000e+00> : vector<2x32xf32>
    %248 = tpu.matmul %245, %247, %cst_89 {dimension_numbers = #tpu.dot_dimension_numbers<[1], [0], [0], [1], [0, 0, 1, 1], [], []>} : vector<2x2xbf16>, vector<2x32xbf16>, vector<2x32xf32> -> vector<2x32xf32>
    %249 = arith.negf %248 : vector<2x32xf32>
    %250 = math.exp %249 : vector<2x32xf32>
    %cst_90 = arith.constant 1.000000e+00 : f32
    %251 = vector.broadcast %cst_90 : f32 to vector<2x32xf32>
    %252 = arith.addf %251, %250 : vector<2x32xf32>
    %253 = arith.divf %251, %252 : vector<2x32xf32>
    %254 = vector.shape_cast %253 : vector<2x32xf32> to vector<2x1x32xf32>
    %255 = vector.broadcast %254 : vector<2x1x32xf32> to vector<2x8x32xf32>
    %256 = arith.mulf %235, %255 : vector<2x8x32xf32>
    %257 = vector.shape_cast %256 : vector<2x8x32xf32> to vector<16x32xf32>
    %c1_91 = arith.constant 1 : index
    %c0_92 = arith.constant 0 : index
    %c0_93 = arith.constant 0 : index
    %258 = vector.load %arg8[%c1_91, %c0_92, %c0_93] : memref<4x96x32xbf16, #tpu.memory_space<vmem>>, vector<1x96x32xbf16>
    %259 = vector.shape_cast %258 : vector<1x96x32xbf16> to vector<96x32xbf16>
    %c1_94 = arith.constant 1 : index
    %c0_95 = arith.constant 0 : index
    %c0_96 = arith.constant 0 : index
    %260 = vector.load %arg9[%c1_94, %c0_95, %c0_96] : memref<4x1x32xf32, #tpu.memory_space<vmem>>, vector<1x1x32xf32>
    %261 = vector.shape_cast %260 : vector<1x1x32xf32> to vector<1x32xf32>
    %c1_i32_97 = arith.constant 1 : i32
    %262 = tpu.dynamic_rotate %257 by %c1_i32_97 dim 0 : vector<16x32xf32>, i32 -> vector<16x32xf32>
    %cst_98 = arith.constant 0.000000e+00 : f32
    %263 = vector.shape_cast %18 : vector<16x1xi1> to vector<16x1xi1>
    %264 = vector.broadcast %263 : vector<16x1xi1> to vector<16x32xi1>
    %265 = vector.broadcast %cst_98 : f32 to vector<16x32xf32>
    %266 = arith.select %264, %265, %262 : vector<16x32xi1>, vector<16x32xf32>
    %c15_i32_99 = arith.constant 15 : i32
    %267 = tpu.dynamic_rotate %257 by %c15_i32_99 dim 0 : vector<16x32xf32>, i32 -> vector<16x32xf32>
    %cst_100 = arith.constant 0.000000e+00 : f32
    %268 = vector.shape_cast %20 : vector<16x1xi1> to vector<16x1xi1>
    %269 = vector.broadcast %268 : vector<16x1xi1> to vector<16x32xi1>
    %270 = vector.broadcast %cst_100 : f32 to vector<16x32xf32>
    %271 = arith.select %269, %270, %267 : vector<16x32xi1>, vector<16x32xf32>
    %272 = tpu.concatenate %266, %257, %271 in 1 : vector<16x32xf32>, vector<16x32xf32>, vector<16x32xf32> -> vector<16x96xf32>
    %273 = arith.truncf %272 : vector<16x96xf32> to vector<16x96xbf16>
    %cst_101 = arith.constant dense<0.000000e+00> : vector<16x32xf32>
    %274 = tpu.matmul %273, %259, %cst_101 {dimension_numbers = #tpu.dot_dimension_numbers<[1], [0], [0], [1], [0, 0, 1, 1], [], []>} : vector<16x96xbf16>, vector<96x32xbf16>, vector<16x32xf32> -> vector<16x32xf32>
    %275 = vector.broadcast %261 : vector<1x32xf32> to vector<16x32xf32>
    %276 = arith.addf %274, %275 : vector<16x32xf32>
    %277 = arith.addf %276, %213 : vector<16x32xf32>
    %cst_102 = arith.constant 0.000000e+00 : f32
    %278 = vector.broadcast %cst_102 : f32 to vector<16x32xf32>
    %279 = arith.maximumf %277, %278 : vector<16x32xf32>
    %280 = vector.extract_strided_slice %23 {offsets = [0, 68], sizes = [16, 32], strides = [1, 1]} : vector<16x136xf32> to vector<16x32xf32>
    %281 = vector.extract_strided_slice %28 {offsets = [0, 68], sizes = [16, 32], strides = [1, 1]} : vector<16x136xf32> to vector<16x32xf32>
    %282 = vector.extract_strided_slice %33 {offsets = [0, 68], sizes = [16, 32], strides = [1, 1]} : vector<16x136xf32> to vector<16x32xf32>
    %283 = vector.extract_strided_slice %23 {offsets = [0, 100], sizes = [16, 1], strides = [1, 1]} : vector<16x136xf32> to vector<16x1xf32>
    %284 = vector.extract_strided_slice %23 {offsets = [0, 101], sizes = [16, 1], strides = [1, 1]} : vector<16x136xf32> to vector<16x1xf32>
    %285 = vector.extract_strided_slice %28 {offsets = [0, 101], sizes = [16, 1], strides = [1, 1]} : vector<16x136xf32> to vector<16x1xf32>
    %286 = vector.extract_strided_slice %33 {offsets = [0, 101], sizes = [16, 1], strides = [1, 1]} : vector<16x136xf32> to vector<16x1xf32>
    %287 = arith.addf %283, %285 : vector<16x1xf32>
    %cst_103 = arith.constant 0.000000e+00 : f32
    %288 = vector.broadcast %cst_103 : f32 to vector<16x1xf32>
    %289 = arith.cmpf ogt, %287, %288 : vector<16x1xf32>
    %cst_104 = arith.constant 2.000000e-01 : f32
    %290 = vector.broadcast %cst_104 : f32 to vector<16x1xf32>
    %291 = arith.mulf %290, %287 : vector<16x1xf32>
    %292 = arith.select %289, %287, %291 : vector<16x1xi1>, vector<16x1xf32>
    %293 = arith.addf %283, %284 : vector<16x1xf32>
    %cst_105 = arith.constant 0.000000e+00 : f32
    %294 = vector.broadcast %cst_105 : f32 to vector<16x1xf32>
    %295 = arith.cmpf ogt, %293, %294 : vector<16x1xf32>
    %cst_106 = arith.constant 2.000000e-01 : f32
    %296 = vector.broadcast %cst_106 : f32 to vector<16x1xf32>
    %297 = arith.mulf %296, %293 : vector<16x1xf32>
    %298 = arith.select %295, %293, %297 : vector<16x1xi1>, vector<16x1xf32>
    %299 = arith.addf %283, %286 : vector<16x1xf32>
    %cst_107 = arith.constant 0.000000e+00 : f32
    %300 = vector.broadcast %cst_107 : f32 to vector<16x1xf32>
    %301 = arith.cmpf ogt, %299, %300 : vector<16x1xf32>
    %cst_108 = arith.constant 2.000000e-01 : f32
    %302 = vector.broadcast %cst_108 : f32 to vector<16x1xf32>
    %303 = arith.mulf %302, %299 : vector<16x1xf32>
    %304 = arith.select %301, %299, %303 : vector<16x1xi1>, vector<16x1xf32>
    %cst_109 = arith.constant -9.000000e+15 : f32
    %305 = vector.broadcast %cst_109 : f32 to vector<16x1xf32>
    %306 = arith.select %37, %305, %292 : vector<16x1xi1>, vector<16x1xf32>
    %cst_110 = arith.constant -9.000000e+15 : f32
    %307 = vector.broadcast %cst_110 : f32 to vector<16x1xf32>
    %308 = arith.select %40, %307, %298 : vector<16x1xi1>, vector<16x1xf32>
    %cst_111 = arith.constant -9.000000e+15 : f32
    %309 = vector.broadcast %cst_111 : f32 to vector<16x1xf32>
    %310 = arith.select %43, %309, %304 : vector<16x1xi1>, vector<16x1xf32>
    %311 = arith.maximumf %308, %310 : vector<16x1xf32>
    %312 = arith.maximumf %306, %311 : vector<16x1xf32>
    %313 = arith.subf %306, %312 : vector<16x1xf32>
    %314 = math.exp %313 : vector<16x1xf32>
    %315 = arith.subf %308, %312 : vector<16x1xf32>
    %316 = math.exp %315 : vector<16x1xf32>
    %317 = arith.subf %310, %312 : vector<16x1xf32>
    %318 = math.exp %317 : vector<16x1xf32>
    %319 = arith.addf %314, %316 : vector<16x1xf32>
    %320 = arith.addf %319, %318 : vector<16x1xf32>
    %321 = tpu.reciprocal %320 {approx = true} : vector<16x1xf32> -> vector<16x1xf32>
    %322 = vector.broadcast %314 : vector<16x1xf32> to vector<16x32xf32>
    %323 = arith.mulf %322, %281 : vector<16x32xf32>
    %324 = vector.broadcast %316 : vector<16x1xf32> to vector<16x32xf32>
    %325 = arith.mulf %324, %280 : vector<16x32xf32>
    %326 = arith.addf %323, %325 : vector<16x32xf32>
    %327 = vector.broadcast %318 : vector<16x1xf32> to vector<16x32xf32>
    %328 = arith.mulf %327, %282 : vector<16x32xf32>
    %329 = arith.addf %326, %328 : vector<16x32xf32>
    %330 = vector.broadcast %321 : vector<16x1xf32> to vector<16x32xf32>
    %331 = arith.mulf %329, %330 : vector<16x32xf32>
    %c2 = arith.constant 2 : index
    %c0_112 = arith.constant 0 : index
    %c0_113 = arith.constant 0 : index
    %332 = vector.load %arg4[%c2, %c0_112, %c0_113] : memref<4x96x32xbf16, #tpu.memory_space<vmem>>, vector<1x96x32xbf16>
    %333 = vector.shape_cast %332 : vector<1x96x32xbf16> to vector<96x32xbf16>
    %c2_114 = arith.constant 2 : index
    %c0_115 = arith.constant 0 : index
    %c0_116 = arith.constant 0 : index
    %334 = vector.load %arg5[%c2_114, %c0_115, %c0_116] : memref<4x1x32xf32, #tpu.memory_space<vmem>>, vector<1x1x32xf32>
    %335 = vector.shape_cast %334 : vector<1x1x32xf32> to vector<1x32xf32>
    %c1_i32_117 = arith.constant 1 : i32
    %336 = tpu.dynamic_rotate %331 by %c1_i32_117 dim 0 : vector<16x32xf32>, i32 -> vector<16x32xf32>
    %cst_118 = arith.constant 0.000000e+00 : f32
    %337 = vector.shape_cast %18 : vector<16x1xi1> to vector<16x1xi1>
    %338 = vector.broadcast %337 : vector<16x1xi1> to vector<16x32xi1>
    %339 = vector.broadcast %cst_118 : f32 to vector<16x32xf32>
    %340 = arith.select %338, %339, %336 : vector<16x32xi1>, vector<16x32xf32>
    %c15_i32_119 = arith.constant 15 : i32
    %341 = tpu.dynamic_rotate %331 by %c15_i32_119 dim 0 : vector<16x32xf32>, i32 -> vector<16x32xf32>
    %cst_120 = arith.constant 0.000000e+00 : f32
    %342 = vector.shape_cast %20 : vector<16x1xi1> to vector<16x1xi1>
    %343 = vector.broadcast %342 : vector<16x1xi1> to vector<16x32xi1>
    %344 = vector.broadcast %cst_120 : f32 to vector<16x32xf32>
    %345 = arith.select %343, %344, %341 : vector<16x32xi1>, vector<16x32xf32>
    %346 = tpu.concatenate %340, %331, %345 in 1 : vector<16x32xf32>, vector<16x32xf32>, vector<16x32xf32> -> vector<16x96xf32>
    %347 = arith.truncf %346 : vector<16x96xf32> to vector<16x96xbf16>
    %cst_121 = arith.constant dense<0.000000e+00> : vector<16x32xf32>
    %348 = tpu.matmul %347, %333, %cst_121 {dimension_numbers = #tpu.dot_dimension_numbers<[1], [0], [0], [1], [0, 0, 1, 1], [], []>} : vector<16x96xbf16>, vector<96x32xbf16>, vector<16x32xf32> -> vector<16x32xf32>
    %349 = vector.broadcast %335 : vector<1x32xf32> to vector<16x32xf32>
    %350 = arith.addf %348, %349 : vector<16x32xf32>
    %cst_122 = arith.constant 0.000000e+00 : f32
    %351 = vector.broadcast %cst_122 : f32 to vector<16x32xf32>
    %352 = arith.maximumf %350, %351 : vector<16x32xf32>
    %353 = vector.shape_cast %352 : vector<16x32xf32> to vector<2x8x32xf32>
    %cst_123 = arith.constant dense<0.000000e+00> : vector<2x32xf32>
    %354 = vector.multi_reduction <add>, %353, %cst_123 [1] : vector<2x8x32xf32> to vector<2x32xf32>
    %cst_124 = arith.constant 8.000000e+00 : f32
    %355 = vector.broadcast %cst_124 : f32 to vector<2x32xf32>
    %356 = arith.divf %354, %355 : vector<2x32xf32>
    %357 = arith.truncf %356 : vector<2x32xf32> to vector<2x32xbf16>
    %c2_125 = arith.constant 2 : index
    %c0_126 = arith.constant 0 : index
    %c0_127 = arith.constant 0 : index
    %358 = vector.load %arg6[%c2_125, %c0_126, %c0_127] : memref<4x32x2xbf16, #tpu.memory_space<vmem>>, vector<1x32x2xbf16>
    %359 = vector.shape_cast %358 : vector<1x32x2xbf16> to vector<32x2xbf16>
    %cst_128 = arith.constant dense<0.000000e+00> : vector<2x2xf32>
    %360 = tpu.matmul %357, %359, %cst_128 {dimension_numbers = #tpu.dot_dimension_numbers<[1], [0], [0], [1], [0, 0, 1, 1], [], []>} : vector<2x32xbf16>, vector<32x2xbf16>, vector<2x2xf32> -> vector<2x2xf32>
    %cst_129 = arith.constant 0.000000e+00 : f32
    %361 = vector.broadcast %cst_129 : f32 to vector<2x2xf32>
    %362 = arith.maximumf %360, %361 : vector<2x2xf32>
    %363 = arith.truncf %362 : vector<2x2xf32> to vector<2x2xbf16>
    %c2_130 = arith.constant 2 : index
    %c0_131 = arith.constant 0 : index
    %c0_132 = arith.constant 0 : index
    %364 = vector.load %arg7[%c2_130, %c0_131, %c0_132] : memref<4x2x32xbf16, #tpu.memory_space<vmem>>, vector<1x2x32xbf16>
    %365 = vector.shape_cast %364 : vector<1x2x32xbf16> to vector<2x32xbf16>
    %cst_133 = arith.constant dense<0.000000e+00> : vector<2x32xf32>
    %366 = tpu.matmul %363, %365, %cst_133 {dimension_numbers = #tpu.dot_dimension_numbers<[1], [0], [0], [1], [0, 0, 1, 1], [], []>} : vector<2x2xbf16>, vector<2x32xbf16>, vector<2x32xf32> -> vector<2x32xf32>
    %367 = arith.negf %366 : vector<2x32xf32>
    %368 = math.exp %367 : vector<2x32xf32>
    %cst_134 = arith.constant 1.000000e+00 : f32
    %369 = vector.broadcast %cst_134 : f32 to vector<2x32xf32>
    %370 = arith.addf %369, %368 : vector<2x32xf32>
    %371 = arith.divf %369, %370 : vector<2x32xf32>
    %372 = vector.shape_cast %371 : vector<2x32xf32> to vector<2x1x32xf32>
    %373 = vector.broadcast %372 : vector<2x1x32xf32> to vector<2x8x32xf32>
    %374 = arith.mulf %353, %373 : vector<2x8x32xf32>
    %375 = vector.shape_cast %374 : vector<2x8x32xf32> to vector<16x32xf32>
    %c2_135 = arith.constant 2 : index
    %c0_136 = arith.constant 0 : index
    %c0_137 = arith.constant 0 : index
    %376 = vector.load %arg8[%c2_135, %c0_136, %c0_137] : memref<4x96x32xbf16, #tpu.memory_space<vmem>>, vector<1x96x32xbf16>
    %377 = vector.shape_cast %376 : vector<1x96x32xbf16> to vector<96x32xbf16>
    %c2_138 = arith.constant 2 : index
    %c0_139 = arith.constant 0 : index
    %c0_140 = arith.constant 0 : index
    %378 = vector.load %arg9[%c2_138, %c0_139, %c0_140] : memref<4x1x32xf32, #tpu.memory_space<vmem>>, vector<1x1x32xf32>
    %379 = vector.shape_cast %378 : vector<1x1x32xf32> to vector<1x32xf32>
    %c1_i32_141 = arith.constant 1 : i32
    %380 = tpu.dynamic_rotate %375 by %c1_i32_141 dim 0 : vector<16x32xf32>, i32 -> vector<16x32xf32>
    %cst_142 = arith.constant 0.000000e+00 : f32
    %381 = vector.shape_cast %18 : vector<16x1xi1> to vector<16x1xi1>
    %382 = vector.broadcast %381 : vector<16x1xi1> to vector<16x32xi1>
    %383 = vector.broadcast %cst_142 : f32 to vector<16x32xf32>
    %384 = arith.select %382, %383, %380 : vector<16x32xi1>, vector<16x32xf32>
    %c15_i32_143 = arith.constant 15 : i32
    %385 = tpu.dynamic_rotate %375 by %c15_i32_143 dim 0 : vector<16x32xf32>, i32 -> vector<16x32xf32>
    %cst_144 = arith.constant 0.000000e+00 : f32
    %386 = vector.shape_cast %20 : vector<16x1xi1> to vector<16x1xi1>
    %387 = vector.broadcast %386 : vector<16x1xi1> to vector<16x32xi1>
    %388 = vector.broadcast %cst_144 : f32 to vector<16x32xf32>
    %389 = arith.select %387, %388, %385 : vector<16x32xi1>, vector<16x32xf32>
    %390 = tpu.concatenate %384, %375, %389 in 1 : vector<16x32xf32>, vector<16x32xf32>, vector<16x32xf32> -> vector<16x96xf32>
    %391 = arith.truncf %390 : vector<16x96xf32> to vector<16x96xbf16>
    %cst_145 = arith.constant dense<0.000000e+00> : vector<16x32xf32>
    %392 = tpu.matmul %391, %377, %cst_145 {dimension_numbers = #tpu.dot_dimension_numbers<[1], [0], [0], [1], [0, 0, 1, 1], [], []>} : vector<16x96xbf16>, vector<96x32xbf16>, vector<16x32xf32> -> vector<16x32xf32>
    %393 = vector.broadcast %379 : vector<1x32xf32> to vector<16x32xf32>
    %394 = arith.addf %392, %393 : vector<16x32xf32>
    %395 = arith.addf %394, %331 : vector<16x32xf32>
    %cst_146 = arith.constant 0.000000e+00 : f32
    %396 = vector.broadcast %cst_146 : f32 to vector<16x32xf32>
    %397 = arith.maximumf %395, %396 : vector<16x32xf32>
    %398 = vector.extract_strided_slice %23 {offsets = [0, 102], sizes = [16, 32], strides = [1, 1]} : vector<16x136xf32> to vector<16x32xf32>
    %399 = vector.extract_strided_slice %28 {offsets = [0, 102], sizes = [16, 32], strides = [1, 1]} : vector<16x136xf32> to vector<16x32xf32>
    %400 = vector.extract_strided_slice %33 {offsets = [0, 102], sizes = [16, 32], strides = [1, 1]} : vector<16x136xf32> to vector<16x32xf32>
    %401 = vector.extract_strided_slice %23 {offsets = [0, 134], sizes = [16, 1], strides = [1, 1]} : vector<16x136xf32> to vector<16x1xf32>
    %402 = vector.extract_strided_slice %23 {offsets = [0, 135], sizes = [16, 1], strides = [1, 1]} : vector<16x136xf32> to vector<16x1xf32>
    %403 = vector.extract_strided_slice %28 {offsets = [0, 135], sizes = [16, 1], strides = [1, 1]} : vector<16x136xf32> to vector<16x1xf32>
    %404 = vector.extract_strided_slice %33 {offsets = [0, 135], sizes = [16, 1], strides = [1, 1]} : vector<16x136xf32> to vector<16x1xf32>
    %405 = arith.addf %401, %403 : vector<16x1xf32>
    %cst_147 = arith.constant 0.000000e+00 : f32
    %406 = vector.broadcast %cst_147 : f32 to vector<16x1xf32>
    %407 = arith.cmpf ogt, %405, %406 : vector<16x1xf32>
    %cst_148 = arith.constant 2.000000e-01 : f32
    %408 = vector.broadcast %cst_148 : f32 to vector<16x1xf32>
    %409 = arith.mulf %408, %405 : vector<16x1xf32>
    %410 = arith.select %407, %405, %409 : vector<16x1xi1>, vector<16x1xf32>
    %411 = arith.addf %401, %402 : vector<16x1xf32>
    %cst_149 = arith.constant 0.000000e+00 : f32
    %412 = vector.broadcast %cst_149 : f32 to vector<16x1xf32>
    %413 = arith.cmpf ogt, %411, %412 : vector<16x1xf32>
    %cst_150 = arith.constant 2.000000e-01 : f32
    %414 = vector.broadcast %cst_150 : f32 to vector<16x1xf32>
    %415 = arith.mulf %414, %411 : vector<16x1xf32>
    %416 = arith.select %413, %411, %415 : vector<16x1xi1>, vector<16x1xf32>
    %417 = arith.addf %401, %404 : vector<16x1xf32>
    %cst_151 = arith.constant 0.000000e+00 : f32
    %418 = vector.broadcast %cst_151 : f32 to vector<16x1xf32>
    %419 = arith.cmpf ogt, %417, %418 : vector<16x1xf32>
    %cst_152 = arith.constant 2.000000e-01 : f32
    %420 = vector.broadcast %cst_152 : f32 to vector<16x1xf32>
    %421 = arith.mulf %420, %417 : vector<16x1xf32>
    %422 = arith.select %419, %417, %421 : vector<16x1xi1>, vector<16x1xf32>
    %cst_153 = arith.constant -9.000000e+15 : f32
    %423 = vector.broadcast %cst_153 : f32 to vector<16x1xf32>
    %424 = arith.select %37, %423, %410 : vector<16x1xi1>, vector<16x1xf32>
    %cst_154 = arith.constant -9.000000e+15 : f32
    %425 = vector.broadcast %cst_154 : f32 to vector<16x1xf32>
    %426 = arith.select %40, %425, %416 : vector<16x1xi1>, vector<16x1xf32>
    %cst_155 = arith.constant -9.000000e+15 : f32
    %427 = vector.broadcast %cst_155 : f32 to vector<16x1xf32>
    %428 = arith.select %43, %427, %422 : vector<16x1xi1>, vector<16x1xf32>
    %429 = arith.maximumf %426, %428 : vector<16x1xf32>
    %430 = arith.maximumf %424, %429 : vector<16x1xf32>
    %431 = arith.subf %424, %430 : vector<16x1xf32>
    %432 = math.exp %431 : vector<16x1xf32>
    %433 = arith.subf %426, %430 : vector<16x1xf32>
    %434 = math.exp %433 : vector<16x1xf32>
    %435 = arith.subf %428, %430 : vector<16x1xf32>
    %436 = math.exp %435 : vector<16x1xf32>
    %437 = arith.addf %432, %434 : vector<16x1xf32>
    %438 = arith.addf %437, %436 : vector<16x1xf32>
    %439 = tpu.reciprocal %438 {approx = true} : vector<16x1xf32> -> vector<16x1xf32>
    %440 = vector.broadcast %432 : vector<16x1xf32> to vector<16x32xf32>
    %441 = arith.mulf %440, %399 : vector<16x32xf32>
    %442 = vector.broadcast %434 : vector<16x1xf32> to vector<16x32xf32>
    %443 = arith.mulf %442, %398 : vector<16x32xf32>
    %444 = arith.addf %441, %443 : vector<16x32xf32>
    %445 = vector.broadcast %436 : vector<16x1xf32> to vector<16x32xf32>
    %446 = arith.mulf %445, %400 : vector<16x32xf32>
    %447 = arith.addf %444, %446 : vector<16x32xf32>
    %448 = vector.broadcast %439 : vector<16x1xf32> to vector<16x32xf32>
    %449 = arith.mulf %447, %448 : vector<16x32xf32>
    %c3 = arith.constant 3 : index
    %c0_156 = arith.constant 0 : index
    %c0_157 = arith.constant 0 : index
    %450 = vector.load %arg4[%c3, %c0_156, %c0_157] : memref<4x96x32xbf16, #tpu.memory_space<vmem>>, vector<1x96x32xbf16>
    %451 = vector.shape_cast %450 : vector<1x96x32xbf16> to vector<96x32xbf16>
    %c3_158 = arith.constant 3 : index
    %c0_159 = arith.constant 0 : index
    %c0_160 = arith.constant 0 : index
    %452 = vector.load %arg5[%c3_158, %c0_159, %c0_160] : memref<4x1x32xf32, #tpu.memory_space<vmem>>, vector<1x1x32xf32>
    %453 = vector.shape_cast %452 : vector<1x1x32xf32> to vector<1x32xf32>
    %c1_i32_161 = arith.constant 1 : i32
    %454 = tpu.dynamic_rotate %449 by %c1_i32_161 dim 0 : vector<16x32xf32>, i32 -> vector<16x32xf32>
    %cst_162 = arith.constant 0.000000e+00 : f32
    %455 = vector.shape_cast %18 : vector<16x1xi1> to vector<16x1xi1>
    %456 = vector.broadcast %455 : vector<16x1xi1> to vector<16x32xi1>
    %457 = vector.broadcast %cst_162 : f32 to vector<16x32xf32>
    %458 = arith.select %456, %457, %454 : vector<16x32xi1>, vector<16x32xf32>
    %c15_i32_163 = arith.constant 15 : i32
    %459 = tpu.dynamic_rotate %449 by %c15_i32_163 dim 0 : vector<16x32xf32>, i32 -> vector<16x32xf32>
    %cst_164 = arith.constant 0.000000e+00 : f32
    %460 = vector.shape_cast %20 : vector<16x1xi1> to vector<16x1xi1>
    %461 = vector.broadcast %460 : vector<16x1xi1> to vector<16x32xi1>
    %462 = vector.broadcast %cst_164 : f32 to vector<16x32xf32>
    %463 = arith.select %461, %462, %459 : vector<16x32xi1>, vector<16x32xf32>
    %464 = tpu.concatenate %458, %449, %463 in 1 : vector<16x32xf32>, vector<16x32xf32>, vector<16x32xf32> -> vector<16x96xf32>
    %465 = arith.truncf %464 : vector<16x96xf32> to vector<16x96xbf16>
    %cst_165 = arith.constant dense<0.000000e+00> : vector<16x32xf32>
    %466 = tpu.matmul %465, %451, %cst_165 {dimension_numbers = #tpu.dot_dimension_numbers<[1], [0], [0], [1], [0, 0, 1, 1], [], []>} : vector<16x96xbf16>, vector<96x32xbf16>, vector<16x32xf32> -> vector<16x32xf32>
    %467 = vector.broadcast %453 : vector<1x32xf32> to vector<16x32xf32>
    %468 = arith.addf %466, %467 : vector<16x32xf32>
    %cst_166 = arith.constant 0.000000e+00 : f32
    %469 = vector.broadcast %cst_166 : f32 to vector<16x32xf32>
    %470 = arith.maximumf %468, %469 : vector<16x32xf32>
    %471 = vector.shape_cast %470 : vector<16x32xf32> to vector<2x8x32xf32>
    %cst_167 = arith.constant dense<0.000000e+00> : vector<2x32xf32>
    %472 = vector.multi_reduction <add>, %471, %cst_167 [1] : vector<2x8x32xf32> to vector<2x32xf32>
    %cst_168 = arith.constant 8.000000e+00 : f32
    %473 = vector.broadcast %cst_168 : f32 to vector<2x32xf32>
    %474 = arith.divf %472, %473 : vector<2x32xf32>
    %475 = arith.truncf %474 : vector<2x32xf32> to vector<2x32xbf16>
    %c3_169 = arith.constant 3 : index
    %c0_170 = arith.constant 0 : index
    %c0_171 = arith.constant 0 : index
    %476 = vector.load %arg6[%c3_169, %c0_170, %c0_171] : memref<4x32x2xbf16, #tpu.memory_space<vmem>>, vector<1x32x2xbf16>
    %477 = vector.shape_cast %476 : vector<1x32x2xbf16> to vector<32x2xbf16>
    %cst_172 = arith.constant dense<0.000000e+00> : vector<2x2xf32>
    %478 = tpu.matmul %475, %477, %cst_172 {dimension_numbers = #tpu.dot_dimension_numbers<[1], [0], [0], [1], [0, 0, 1, 1], [], []>} : vector<2x32xbf16>, vector<32x2xbf16>, vector<2x2xf32> -> vector<2x2xf32>
    %cst_173 = arith.constant 0.000000e+00 : f32
    %479 = vector.broadcast %cst_173 : f32 to vector<2x2xf32>
    %480 = arith.maximumf %478, %479 : vector<2x2xf32>
    %481 = arith.truncf %480 : vector<2x2xf32> to vector<2x2xbf16>
    %c3_174 = arith.constant 3 : index
    %c0_175 = arith.constant 0 : index
    %c0_176 = arith.constant 0 : index
    %482 = vector.load %arg7[%c3_174, %c0_175, %c0_176] : memref<4x2x32xbf16, #tpu.memory_space<vmem>>, vector<1x2x32xbf16>
    %483 = vector.shape_cast %482 : vector<1x2x32xbf16> to vector<2x32xbf16>
    %cst_177 = arith.constant dense<0.000000e+00> : vector<2x32xf32>
    %484 = tpu.matmul %481, %483, %cst_177 {dimension_numbers = #tpu.dot_dimension_numbers<[1], [0], [0], [1], [0, 0, 1, 1], [], []>} : vector<2x2xbf16>, vector<2x32xbf16>, vector<2x32xf32> -> vector<2x32xf32>
    %485 = arith.negf %484 : vector<2x32xf32>
    %486 = math.exp %485 : vector<2x32xf32>
    %cst_178 = arith.constant 1.000000e+00 : f32
    %487 = vector.broadcast %cst_178 : f32 to vector<2x32xf32>
    %488 = arith.addf %487, %486 : vector<2x32xf32>
    %489 = arith.divf %487, %488 : vector<2x32xf32>
    %490 = vector.shape_cast %489 : vector<2x32xf32> to vector<2x1x32xf32>
    %491 = vector.broadcast %490 : vector<2x1x32xf32> to vector<2x8x32xf32>
    %492 = arith.mulf %471, %491 : vector<2x8x32xf32>
    %493 = vector.shape_cast %492 : vector<2x8x32xf32> to vector<16x32xf32>
    %c3_179 = arith.constant 3 : index
    %c0_180 = arith.constant 0 : index
    %c0_181 = arith.constant 0 : index
    %494 = vector.load %arg8[%c3_179, %c0_180, %c0_181] : memref<4x96x32xbf16, #tpu.memory_space<vmem>>, vector<1x96x32xbf16>
    %495 = vector.shape_cast %494 : vector<1x96x32xbf16> to vector<96x32xbf16>
    %c3_182 = arith.constant 3 : index
    %c0_183 = arith.constant 0 : index
    %c0_184 = arith.constant 0 : index
    %496 = vector.load %arg9[%c3_182, %c0_183, %c0_184] : memref<4x1x32xf32, #tpu.memory_space<vmem>>, vector<1x1x32xf32>
    %497 = vector.shape_cast %496 : vector<1x1x32xf32> to vector<1x32xf32>
    %c1_i32_185 = arith.constant 1 : i32
    %498 = tpu.dynamic_rotate %493 by %c1_i32_185 dim 0 : vector<16x32xf32>, i32 -> vector<16x32xf32>
    %cst_186 = arith.constant 0.000000e+00 : f32
    %499 = vector.shape_cast %18 : vector<16x1xi1> to vector<16x1xi1>
    %500 = vector.broadcast %499 : vector<16x1xi1> to vector<16x32xi1>
    %501 = vector.broadcast %cst_186 : f32 to vector<16x32xf32>
    %502 = arith.select %500, %501, %498 : vector<16x32xi1>, vector<16x32xf32>
    %c15_i32_187 = arith.constant 15 : i32
    %503 = tpu.dynamic_rotate %493 by %c15_i32_187 dim 0 : vector<16x32xf32>, i32 -> vector<16x32xf32>
    %cst_188 = arith.constant 0.000000e+00 : f32
    %504 = vector.shape_cast %20 : vector<16x1xi1> to vector<16x1xi1>
    %505 = vector.broadcast %504 : vector<16x1xi1> to vector<16x32xi1>
    %506 = vector.broadcast %cst_188 : f32 to vector<16x32xf32>
    %507 = arith.select %505, %506, %503 : vector<16x32xi1>, vector<16x32xf32>
    %508 = tpu.concatenate %502, %493, %507 in 1 : vector<16x32xf32>, vector<16x32xf32>, vector<16x32xf32> -> vector<16x96xf32>
    %509 = arith.truncf %508 : vector<16x96xf32> to vector<16x96xbf16>
    %cst_189 = arith.constant dense<0.000000e+00> : vector<16x32xf32>
    %510 = tpu.matmul %509, %495, %cst_189 {dimension_numbers = #tpu.dot_dimension_numbers<[1], [0], [0], [1], [0, 0, 1, 1], [], []>} : vector<16x96xbf16>, vector<96x32xbf16>, vector<16x32xf32> -> vector<16x32xf32>
    %511 = vector.broadcast %497 : vector<1x32xf32> to vector<16x32xf32>
    %512 = arith.addf %510, %511 : vector<16x32xf32>
    %513 = arith.addf %512, %449 : vector<16x32xf32>
    %cst_190 = arith.constant 0.000000e+00 : f32
    %514 = vector.broadcast %cst_190 : f32 to vector<16x32xf32>
    %515 = arith.maximumf %513, %514 : vector<16x32xf32>
    %516 = tpu.concatenate %161, %279, %397, %515 in 1 : vector<16x32xf32>, vector<16x32xf32>, vector<16x32xf32>, vector<16x32xf32> -> vector<16x128xf32>
    %c0_191 = arith.constant 0 : index
    %c0_192 = arith.constant 0 : index
    %517 = vector.load %arg10[%c0_191, %c0_192] : memref<16x128xf32, #tpu.memory_space<vmem>>, vector<16x128xf32>
    tpu.vector_store %arg10[%c0_191, %c0_192], %516 {strides = array<i32>} : memref<16x128xf32, #tpu.memory_space<vmem>>, vector<16x128xf32>,
    return
  }
  func.func @transform_0(%arg0: i32) -> (i32, i32) {
    %c0_i32 = arith.constant 0 : i32
    %c0_i32_0 = arith.constant 0 : i32
    return %arg0, %c0_i32 : i32, i32
  }
  func.func @transform_1(%arg0: i32) -> (i32, i32) {
    %c0_i32 = arith.constant 0 : i32
    %c0_i32_0 = arith.constant 0 : i32
    return %arg0, %c0_i32 : i32, i32
  }
  func.func @transform_2(%arg0: i32) -> (i32, i32) {
    %c0_i32 = arith.constant 0 : i32
    %c0_i32_0 = arith.constant 0 : i32
    %c0_i32_1 = arith.constant 0 : i32
    return %c0_i32, %c0_i32_0 : i32, i32
  }
  func.func @transform_3(%arg0: i32) -> (i32, i32, i32) {
    %c0_i32 = arith.constant 0 : i32
    %c0_i32_0 = arith.constant 0 : i32
    %c0_i32_1 = arith.constant 0 : i32
    %c0_i32_2 = arith.constant 0 : i32
    return %c0_i32, %c0_i32_0, %c0_i32_1 : i32, i32, i32
  }
  func.func @transform_4(%arg0: i32) -> (i32, i32, i32) {
    %c0_i32 = arith.constant 0 : i32
    %c0_i32_0 = arith.constant 0 : i32
    %c0_i32_1 = arith.constant 0 : i32
    %c0_i32_2 = arith.constant 0 : i32
    return %c0_i32, %c0_i32_0, %c0_i32_1 : i32, i32, i32
  }
  func.func @transform_5(%arg0: i32) -> (i32, i32, i32) {
    %c0_i32 = arith.constant 0 : i32
    %c0_i32_0 = arith.constant 0 : i32
    %c0_i32_1 = arith.constant 0 : i32
    %c0_i32_2 = arith.constant 0 : i32
    return %c0_i32, %c0_i32_0, %c0_i32_1 : i32, i32, i32
  }
  func.func @transform_6(%arg0: i32) -> (i32, i32, i32) {
    %c0_i32 = arith.constant 0 : i32
    %c0_i32_0 = arith.constant 0 : i32
    %c0_i32_1 = arith.constant 0 : i32
    %c0_i32_2 = arith.constant 0 : i32
    return %c0_i32, %c0_i32_0, %c0_i32_1 : i32, i32, i32
  }
  func.func @transform_7(%arg0: i32) -> (i32, i32, i32) {
    %c0_i32 = arith.constant 0 : i32
    %c0_i32_0 = arith.constant 0 : i32
    %c0_i32_1 = arith.constant 0 : i32
    %c0_i32_2 = arith.constant 0 : i32
    return %c0_i32, %c0_i32_0, %c0_i32_1 : i32, i32, i32
  }
  func.func @transform_8(%arg0: i32) -> (i32, i32, i32) {
    %c0_i32 = arith.constant 0 : i32
    %c0_i32_0 = arith.constant 0 : i32
    %c0_i32_1 = arith.constant 0 : i32
    %c0_i32_2 = arith.constant 0 : i32
    return %c0_i32, %c0_i32_0, %c0_i32_1 : i32, i32, i32
  }
  func.func @transform_9(%arg0: i32) -> (i32, i32) {
    %c0_i32 = arith.constant 0 : i32
    %c0_i32_0 = arith.constant 0 : i32
    return %arg0, %c0_i32 : i32, i32
  }
}

</mosaic_0001>

<bundles_post_ra>
// kernel: tpu_custom_call.1
= control target key start
LH: loop header
LB: loop body
LE: loop exit
PB: predicated region body
PF: predicated region fallthrough
CT: control target
= control target key end

     0   :  { %v3495_v2 = vmov 0   ;;  %vm84_vm0 = vcmask 130048   ;;  %s4670_s0 = inlined_call_operand.vmem [shape: bf16[16,16], index: 0, kind: input, shape index: {}]   ;;  %s4671_s1 = inlined_call_operand.vmem [shape: f32[16,3], index: 1, kind: input, shape index: {}]   ;;  %s4672_s2 = inlined_call_operand.vmem [shape: bf16[16,136], index: 2, kind: input, shape index: {}]   ;;  %s4673_s3 = inlined_call_operand.vmem [shape: bf16[4,96,32], index: 3, kind: input, shape index: {}]   ;;  %s4674_s4 = inlined_call_operand.vmem [shape: f32[4,1,32], index: 4, kind: input, shape index: {}]   ;;  %s4675_s5 = inlined_call_operand.vmem [shape: bf16[4,32,2], index: 5, kind: input, shape index: {}]   ;;  %s4676_s6 = inlined_call_operand.vmem [shape: bf16[4,2,32], index: 6, kind: input, shape index: {}]   ;;  %s4677_s7 = inlined_call_operand.vmem [shape: bf16[4,96,32], index: 7, kind: input, shape index: {}]   ;;  %s4678_s8 = inlined_call_operand.vmem [shape: f32[4,1,32], index: 8, kind: input, shape index: {}]   ;;  %s4679_s9 = inlined_call_operand.hbm [shape: f32[16,128], index: 9, kind: output, shape index: {}]  }
   0x1   :  { %v3331_v0 = vld [vmem:[%s4672_s2 + $0x4] ss:$8 sps:$4 sm:$0xff]   ;;  %v3333_v1 = vld [vmem:[%s4672_s2] ss:$8 sps:$4 sm:$0xff]   ;;  %120 = vmatprep.mubr.bf16.mxu0 %v3495_v2  ;;  %3224 = vset.pattern.permute.xlu0 %v3495_v2 }
   0x2   :  { %88 = vmatprep.subr.bf16.mxu0 %v3331_v0  ;;  %v3334_v3 = vld [vmem:[%s4670_s0] sm:$0xff]   ;;  %3225 = vset.pattern.permute.xlu1 %v3495_v2 }
   0x3   :  { %89 = vmatpush1.bf16.msra.mxu0 %v3333_v1 }
   0x6   :  { %2755 = vmatmul.mubr.msk.bf16.vlgmr.msra.gmra.mrb[0].mxu0 %vm84_vm0, %v3334_v3 }
   0x7   :  { %14 = vsyncpa [#allocation3], 0  ;;  %v34_v4 = vlaneseq  ;;  %s3496_s2 = smov 127   ;;  %s3497_s0 = smov 98   ;;  %v3705_v57 = vld [vmem:[%s4671_s1] sm:$0xff]  ;;  %v3711_v58 = vld [vmem:[%s4671_s1 + $0x8] sm:$0xff] }
   0x8   :  { %s3498_s15 = smov 97   ;;  %vm167_vm11 = vcmp.gt.f32.partialorder %v3705_v57, 0.0  ;;  %vm168_vm12 = vcmp.gt.f32.partialorder %v3711_v58, 0.0  ;;  %s3499_s1 = smov 96   ;;  %vm3506_vm15 = vmmov 0   ;;  %vm410_vm0 = vcmask 261120  }
   0x9   :  { %v3588_v5 = vshrl.u32 %v34_v4, 7  ;;  %s3500_s20 = smov 1   ;;  %s3501_s21 = smov 2   ;;  %v2842_v57 = vld [vmem:[%s4674_s4 + $0x2] ss:$0 sm:$0xff] }
   0xa   :  { %s3502_s22 = smov 126   ;;  %s3507_s14 = smov 32   ;;  %v2925_v14 = vld [vmem:[%s4678_s8 + $0x3] ss:$0 sm:$0xff] }
   0xb   :  { %v36_v6 = vadd.s32 8, %v3588_v5  ;;  %v41_v7 = vand.u32 7, %v3588_v5  ;;  %vm4681_vm1 = vcmp.lt.s32.totalorder %v3588_v5, 1  ;;  %vm4680_vm2 = vcmp.lt.s32.totalorder %v3588_v5, 7  ;;  %s3510_s16 = smov 62   ;;  %s3511_s28 = smov 94  }
   0xc   :  { %s3512_s12 = smov 30   ;;  %s3515_s26 = smov 28  }
   0xd   :  { %v48_v8 = vand.u32 7, %v36_v6  ;;  %vm3602_vm3 = vcmp.eq.s32.totalorder %v41_v7, 7  ;;  %vm3610_vm5 = vcmp.eq.s32.totalorder %v41_v7, 0  ;;  %s3516_s30 = smov 60   ;;  %s3517_s10 = smov 92  }
   0xe   :  { %s3518_s27 = smov 124   ;;  %s3520_s29 = smov 122  }
   0xf   :  { %vm3606_vm4 = vcmp.eq.s32.totalorder %v48_v8, 7  ;;  %vm3614_vm6 = vcmp.eq.s32.totalorder %v48_v8, 0 }
  0xd9   :  { %v3592_v9 = vpop.f32.mrb[0].mxu0 }
  0xda   :  { %187 = vrot.lane.b32.xlu1 %v3592_v9, %s3496_s2  ;;  %v3596_v10 = vpop.f32.mrb[1].mxu0  ;;  %v148_v17 = vrot.slane %v3592_v9, 1  ;;  %v131_v19 = vrot.slane %v3592_v9, 7 }
  0xdb   :  { %v3600_v11 = vpop.f32.mrb[2].mxu0  ;;  %v149_v21 = vrot.slane %v3596_v10, 1  ;;  %v132_v23 = vrot.slane %v3596_v10, 7 }
  0xdc   :  { %v3618_v16 = vpop.f32.mrb[3].mxu0  ;;  %v150_v18 = vrot.slane %v3600_v11, 1  ;;  %v133_v20 = vrot.slane %v3600_v11, 7 }
  0xdd   :  { %v151_v22 = vrot.slane %v3618_v16, 1  ;;  %v134_v24 = vrot.slane %v3618_v16, 7 }
  0xde   :  { %189 = vrot.lane.b32.xlu1 %v3600_v11, %s3496_s2  ;;  %v153_v25 = vsel %vm4680_vm2, %v148_v17, %v150_v18  ;;  %v155_v26 = vsel %vm4680_vm2, %v150_v18, %v148_v17  ;;  %v136_v27 = vsel %vm4681_vm1, %v131_v19, %v133_v20  ;;  %v138_v28 = vsel %vm4681_vm1, %v133_v20, %v131_v19 }
  0xdf   :  { %v3640_v29 = vsel %vm3602_vm3, %v155_v26, %v153_v25  ;;  %v3644_v30 = vsel %vm3606_vm4, %v153_v25, %v155_v26  ;;  %v3648_v31 = vsel %vm3610_vm5, %v136_v27, %v138_v28  ;;  %v3652_v32 = vsel %vm3614_vm6, %v138_v28, %v136_v27 }
  0xe0   :  { %203 = vrot.lane.b32.xlu0 %v3640_v29, %s3496_s2  ;;  %v154_v33 = vsel %vm4680_vm2, %v149_v21, %v151_v22  ;;  %v156_v34 = vsel %vm4680_vm2, %v151_v22, %v149_v21  ;;  %v137_v35 = vsel %vm4681_vm1, %v132_v23, %v134_v24  ;;  %v139_v36 = vsel %vm4681_vm1, %v134_v24, %v132_v23 }
  0xe1   :  { %v3666_v37 = vsel %vm3602_vm3, %v156_v34, %v154_v33  ;;  %v3670_v38 = vsel %vm3606_vm4, %v154_v33, %v156_v34  ;;  %v3674_v39 = vsel %vm3610_vm5, %v137_v35, %v139_v36  ;;  %v3678_v40 = vsel %vm3614_vm6, %v139_v36, %v137_v35 }
  0xe4   :  { %205 = vrot.lane.b32.xlu0 %v3644_v30, %s3496_s2 }
 0x14c   :  { %v188_v41 = vpop.permute.xlu1 %187 }
 0x14d   :  { %v193_v46 = vadd.f32 %v188_v41, %v3592_v9 }
 0x14f   :  { %v197_v53 = vmul.f32 0.2, %v193_v46  ;;  %vm195_vm9 = vcmp.gt.f32.partialorder %v193_v46, 0.0 }
 0x150   :  { %v190_v49 = vpop.permute.xlu1 %189 }
 0x151   :  { %v194_v51 = vadd.f32 %v190_v49, %v3600_v11  ;;  %v3694_v54 = vsel %vm195_vm9, %v193_v46, %v197_v53  ;;  %vm533_vm9 = vcmask 1041409  }
 0x152   :  { %v204_v42 = vpop.permute.xlu0 %203 }
 0x153   :  { %v209_v43 = vadd.f32 %v204_v42, %v3592_v9  ;;  %v198_v55 = vmul.f32 0.2, %v194_v51  ;;  %vm196_vm10 = vcmp.gt.f32.partialorder %v194_v51, 0.0 }
 0x155   :  { %vm211_vm7 = vcmp.gt.f32.partialorder %v209_v43, 0.0  ;;  %v213_v44 = vmul.f32 0.2, %v209_v43  ;;  %v3699_v56 = vsel %vm196_vm10, %v194_v51, %v198_v55  ;;  %vm598_vm10 = vcmask 1040384  }
 0x156   :  { %v206_v45 = vpop.permute.xlu0 %205 }
 0x157   :  { %v210_v47 = vadd.f32 %v206_v45, %v3600_v11  ;;  %v3685_v48 = vsel %vm211_vm7, %v209_v43, %v213_v44  ;;  %vm413_vm7 = vcmask 523264  }
 0x158   :  { %239 = vrot.lane.b32.xlu0 %v3685_v48, %s3497_s0 }
 0x159   :  { %vm212_vm8 = vcmp.gt.f32.partialorder %v210_v47, 0.0  ;;  %v214_v50 = vmul.f32 0.2, %v210_v47 }
 0x15b   :  { %v3689_v52 = vsel %vm212_vm8, %v210_v47, %v214_v50  ;;  %vm459_vm8 = vcmask 785408  }
 0x15c   :  { %171 = vrot.lane.b32.xlu0 %v3648_v31, %s3496_s2  ;;  %241 = vrot.lane.b32.xlu1 %v3689_v52, %s3497_s0  ;;  %s3508_s0 = smov 64  }
 0x160   :  { %229 = vrot.lane.b32.xlu0 %v3694_v54, %s3498_s15  ;;  %173 = vrot.lane.b32.xlu1 %v3652_v32, %s3496_s2 }
 0x164   :  { %231 = vrot.lane.b32.xlu1 %v3699_v56, %s3498_s15  ;;  %s3509_s15 = smov 63  }
 0x1ca   :  { %v240_v59 = vpop.permute.xlu0 %239 }
 0x1cb   :  { %v245_v60 = vsel %vm167_vm11, -9e+15, %v240_v59 }
 0x1cc   :  { %249 = vrot.lane.b32.xlu0 %v245_v60, %s3496_s2 }
 0x1ce   :  { %v242_v61 = vpop.permute.xlu1 %241  ;;  %v172_v62 = vpop.permute.xlu0 %171 }
 0x1cf   :  { %v177_v63 = vadd.f32 %v172_v62, %v3592_v9  ;;  %v246_v0 = vsel %vm168_vm12, -9e+15, %v242_v61 }
 0x1d0   :  { %251 = vrot.lane.b32.xlu1 %v246_v0, %s3496_s2 }
 0x1d1   :  { %vm179_vm13 = vcmp.gt.f32.partialorder %v177_v63, 0.0  ;;  %v181_v1 = vmul.f32 0.2, %v177_v63 }
 0x1d2   :  { %v174_v3 = vpop.permute.xlu1 %173  ;;  %v230_v17 = vpop.permute.xlu0 %229 }
 0x1d3   :  { %v178_v4 = vadd.f32 %v174_v3, %v3600_v11  ;;  %v3722_v6 = vsel %vm179_vm13, %v177_v63, %v181_v1  ;;  %v235_v18 = vsel %vm167_vm11, -9e+15, %v230_v17  ;;  %v3503_v17 = vmov 1  }
 0x1d4   :  { %219 = vrot.lane.b32.xlu0 %v3722_v6, %s3499_s1  ;;  %vm594_vm13 = vcmask 15360  }
 0x1d5   :  { %vm180_vm14 = vcmp.gt.f32.partialorder %v178_v4, 0.0  ;;  %v182_v7 = vmul.f32 0.2, %v178_v4 }
 0x1d6   :  { %v232_v19 = vpop.permute.xlu1 %231 }
 0x1d7   :  { %v3726_v8 = vsel %vm180_vm14, %v178_v4, %v182_v7  ;;  %v236_v22 = vsel %vm168_vm12, -9e+15, %v232_v19 }
 0x1d8   :  { %221 = vrot.lane.b32.xlu1 %v3726_v8, %s3499_s1 }
 0x23e   :  { %v250_v20 = vpop.permute.xlu0 %249 }
 0x23f   :  { %v255_v21 = vmax.f32 %v235_v18, %v250_v20 }
 0x241   :  { %259 = vrot.lane.b32.xlu0 %v255_v21, %s3496_s2 }
 0x242   :  { %v252_v23 = vpop.permute.xlu1 %251 }
 0x243   :  { %v256_v24 = vmax.f32 %v236_v22, %v252_v23 }
 0x245   :  { %261 = vrot.lane.b32.xlu1 %v256_v24, %s3496_s2 }
 0x246   :  { %v220_v25 = vpop.permute.xlu0 %219 }
 0x247   :  { %v225_v26 = vsel %vm167_vm11, -9e+15, %v220_v25 }
 0x24a   :  { %v222_v27 = vpop.permute.xlu1 %221 }
 0x24b   :  { %v226_v35 = vsel %vm168_vm12, -9e+15, %v222_v27 }
 0x2b3   :  { %v260_v28 = vpop.permute.xlu0 %259 }
 0x2b4   :  { %v265_v33 = vmax.f32 %v225_v26, %v260_v28 }
 0x2b6   :  { %v267_v34 = vsub.f32 %v225_v26, %v265_v33  ;;  %275 = vrot.lane.b32.xlu0 %v265_v33, %s3500_s20 }
 0x2b7   :  { %v262_v36 = vpop.permute.xlu1 %261 }
 0x2b8   :  { %v266_v41 = vmax.f32 %v226_v35, %v262_v36  ;;  %v269_v55 = vmul.f32 1.442695, %v267_v34  ;;  %v3505_v34 = vmov 0.0   ;;  %v3337_v36 = vld [vmem:[%s4673_s3 + $0x10] sm:$0xff]  }
 0x2b9   :  { %3009 = vmatprep.subr.bf16.mxu1 %v3505_v34  ;;  %3033 = vmatprep.subr.bf16.mxu0 %v3505_v34 }
 0x2ba   :  { %v268_v42 = vsub.f32 %v226_v35, %v266_v41  ;;  %287 = vrot.lane.b32.xlu0 %v265_v33, %s3501_s21  ;;  %277 = vrot.lane.b32.xlu1 %v266_v41, %s3500_s20  ;;  %v3335_v33 = vld [vmem:[%s4673_s3] sm:$0xff]   ;;  %v3336_v35 = vld [vmem:[%s4673_s3 + $0x8] sm:$0xff]  }
 0x2bb   :  { %3010 = vmatpush3.bf16.msra.mxu1 %v3335_v33  ;;  %3021 = vmatprep.mubr.msk.bf16.mxu1 %vm3506_vm15, %v3505_v34 }
 0x2bc   :  { %v271_v63 = vmul.f32 1.442695, %v268_v42  ;;  %3011 = vmatprep.subr.bf16.mxu1 %v3505_v34  ;;  %3035 = vmatprep.mubr.msk.bf16.mxu0 %vm3506_vm15, %v3505_v34 }
 0x2be   :  { %289 = vrot.lane.b32.xlu1 %v266_v41, %s3501_s21  ;;  %v3338_v41 = vld [vmem:[%s4673_s3 + $0x18] sm:$0xff]  }
 0x2bf   :  { %3012 = vmatpush3.bf16.msra.mxu1 %v3336_v35 }
 0x2c0   :  { %3013 = vmatprep.subr.bf16.mxu1 %v3505_v34 }
 0x2c3   :  { %3014 = vmatpush3.bf16.msra.mxu1 %v3337_v36 }
 0x2c4   :  { %3015 = vmatprep.subr.bf16.mxu1 %v3505_v34 }
 0x2c7   :  { %3016 = vmatpush3.bf16.msra.mxu1 %v3338_v41 }
 0x2c8   :  { %3017 = vmatprep.subr.bf16.mxu1 %v3505_v34 }
 0x328   :  { %v276_v43 = vpop.permute.xlu0 %275 }
 0x329   :  { %v281_v44 = vsub.f32 %v235_v18, %v276_v43  ;;  %v3504_v18 = vmov 2  }
 0x32b   :  { %v283_v45 = vmul.f32 1.442695, %v281_v44 }
 0x32c   :  { %v288_v46 = vpop.permute.xlu0 %287  ;;  %v278_v47 = vpop.permute.xlu1 %277 }
 0x32d   :  { %3391 = vpow2.f32 %v283_v45  ;;  %v293_v49 = vsub.f32 %v245_v60, %v288_v46  ;;  %v282_v50 = vsub.f32 %v236_v22, %v278_v47 }
 0x32f   :  { %v295_v51 = vmul.f32 1.442695, %v293_v49  ;;  %v285_v53 = vmul.f32 1.442695, %v282_v50  ;;  %v3339_v50 = vld [vmem:[%s4673_s3 + $0x20] sm:$0xff]  }
 0x330   :  { %v290_v59 = vpop.permute.xlu1 %289  ;;  %3018 = vmatpush3.bf16.msra.mxu1 %v3339_v50 }
 0x331   :  { %3393 = vpow2.f32 %v295_v51  ;;  %v294_v61 = vsub.f32 %v246_v0, %v290_v59  ;;  %3019 = vmatprep.subr.bf16.mxu1 %v3505_v34 }
 0x332   :  { %3395 = vpow2.f32 %v285_v53 }
 0x333   :  { %v297_v62 = vmul.f32 1.442695, %v294_v61  ;;  %3397 = vpow2.f32 %v269_v55 }
 0x335   :  { %3399 = vpow2.f32 %v297_v62 }
 0x336   :  { %3401 = vpow2.f32 %v271_v63 }
 0x337   :  { %v3392_v1 = vpop.eup %3391 }
 0x338   :  { %301 = vrot.lane.b32.xlu0 %v3392_v1, %s3496_s2 }
 0x33b   :  { %v3394_v3 = vpop.eup %3393 }
 0x33c   :  { %v3396_v4 = vpop.eup %3395  ;;  %311 = vrot.lane.b32.xlu0 %v3394_v3, %s3502_s22 }
 0x33d   :  { %303 = vrot.lane.b32.xlu1 %v3396_v4, %s3496_s2  ;;  %v3398_v60 = vpop.eup %3397 }
 0x33f   :  { %v3400_v7 = vpop.eup %3399 }
 0x340   :  { %323 = vperm.xlu0 %3224, %v3398_v60   ;;  %v3402_v0 = vpop.eup %3401 }
 0x341   :  { %313 = vrot.lane.b32.xlu1 %v3400_v7, %s3502_s22 }
 0x344   :  { %3227 = vset.pattern.permute.xlu0 %v3503_v17 }
 0x345   :  { %328 = vperm.xlu1 %3225, %v3402_v0   ;;  %338 = vperm.xlu0 %3227, %v3396_v4  }
 0x349   :  { %3226 = vset.pattern.permute.xlu1 %v3503_v17  ;;  %3229 = vset.pattern.permute.xlu0 %v3495_v2 }
 0x34a   :  { %334 = vperm.xlu1 %3226, %v3392_v1   ;;  %v3340_v1 = vld [vmem:[%s4673_s3 + $0x28] sm:$0xff]  }
 0x34b   :  { %3020 = vmatpush3.bf16.msra.mxu1 %v3340_v1 }
 0x34c   :  { %3025 = vmatprep.subr.bf16.mxu1 %v3505_v34 }
 0x34e   :  { %3228 = vset.pattern.permute.xlu1 %v3504_v18 }
 0x34f   :  { %346 = vperm.xlu1 %3228, %v3394_v3  }
 0x353   :  { %350 = vperm.xlu1 %3228, %v3400_v7  }
 0x357   :  { %3230 = vset.pattern.permute.xlu1 %v3495_v2 }
 0x3aa   :  { %v302_v19 = vpop.permute.xlu0 %301 }
 0x3ab   :  { %v307_v20 = vadd.f32 %v3398_v60, %v302_v19 }
 0x3ae   :  { %v312_v21 = vpop.permute.xlu0 %311 }
 0x3af   :  { %v317_v22 = vadd.f32 %v312_v21, %v307_v20  ;;  %v304_v23 = vpop.permute.xlu1 %303 }
 0x3b0   :  { %v308_v24 = vadd.f32 %v3402_v0, %v304_v23 }
 0x3b1   :  { %3403 = vrcp.f32 %v317_v22 }
 0x3b3   :  { %v314_v25 = vpop.permute.xlu1 %313 }
 0x3b4   :  { %v318_v26 = vadd.f32 %v314_v25, %v308_v24 }
 0x3b6   :  { %3405 = vrcp.f32 %v318_v26 }
 0x3bb   :  { %v3404_v27 = vpop.eup %3403 }
 0x3bc   :  { %359 = vperm.xlu0 %3229, %v3404_v27  }
 0x3bf   :  { %v324_v44 = vpop.permute.xlu0 %323 }
 0x3c0   :  { %v3406_v28 = vpop.eup %3405  ;;  %v331_v51 = vmul.f32 %v324_v44, %v3648_v31 }
 0x3c1   :  { %364 = vperm.xlu1 %3230, %v3406_v28  }
 0x3c4   :  { %v329_v42 = vpop.permute.xlu1 %328  ;;  %v339_v46 = vpop.permute.xlu0 %338 }
 0x3c5   :  { %v332_v53 = vmul.f32 %v329_v42, %v3652_v32  ;;  %v342_v55 = vmul.f32 %v339_v46, %v3600_v11 }
 0x3c7   :  { %v344_v3 = vadd.f32 %v342_v55, %v332_v53 }
 0x3c9   :  { %v335_v43 = vpop.permute.xlu1 %334 }
 0x3ca   :  { %v341_v47 = vmul.f32 %v335_v43, %v3592_v9 }
 0x3cc   :  { %v343_v61 = vadd.f32 %v341_v47, %v331_v51 }
 0x3ce   :  { %v347_v45 = vpop.permute.xlu1 %346 }
 0x3cf   :  { %v353_v59 = vmul.f32 %v347_v45, %v3640_v29 }
 0x3d1   :  { %v355_v4 = vadd.f32 %v353_v59, %v343_v61 }
 0x3d2   :  { %v351_v49 = vpop.permute.xlu1 %350 }
 0x3d3   :  { %v354_v62 = vmul.f32 %v351_v49, %v3644_v30 }
 0x3d5   :  { %v356_v7 = vadd.f32 %v354_v62, %v344_v3  ;;  %v3341_v3 = vld [vmem:[%s4675_s5] sm:$0xff]  }
 0x43b   :  { %v360_v63 = vpop.permute.xlu0 %359 }
 0x43c   :  { %v3784_v60 = vmul.f32 %v360_v63, %v355_v4 }
 0x43e   :  { %v388_v20 = vrot.slane %v3784_v60, 1  ;;  %v382_v33 = vrot.slane %v3784_v60, 7 }
 0x440   :  { %v365_v0 = vpop.permute.xlu1 %364 }
 0x441   :  { %v3791_v19 = vmul.f32 %v365_v0, %v356_v7  ;;  %v3342_v7 = vld [vmem:[%s4675_s5 + $0x8] sm:$0xff]  }
 0x443   :  { %v389_v21 = vrot.slane %v3791_v19, 1  ;;  %v3231_v22 = vpack.i.bf16 %v3791_v19, %v3784_v60  ;;  %v383_v28 = vrot.slane %v3791_v19, 7 }
 0x445   :  { %3232 = vrot.lane.b32.xlu1 %v3231_v22, %s3507_s14  ;;  %v390_v23 = vsel %vm4680_vm2, %v388_v20, %v389_v21  ;;  %v391_v24 = vsel %vm4680_vm2, %v389_v21, %v388_v20  ;;  %v385_v36 = vsel %vm4681_vm1, %v383_v28, %v382_v33  ;;  %v384_v43 = vsel %vm4681_vm1, %v382_v33, %v383_v28 }
 0x446   :  { %v392_v25 = vsel %vm3602_vm3, 0.0, %v390_v23  ;;  %v393_v26 = vsel %vm3606_vm4, 0.0, %v391_v24  ;;  %v386_v44 = vsel %vm3610_vm5, 0.0, %v385_v36  ;;  %v387_v47 = vsel %vm3614_vm6, 0.0, %v384_v43 }
 0x447   :  { %v3236_v27 = vpack.i.bf16 %v393_v26, %v392_v25  ;;  %v2756_v26 = vld [vmem:[%s4674_s4] ss:$0 sm:$0xff] }
 0x449   :  { %835 = vrot.lane.b32.xlu1 %v3685_v48, %s3508_s0  ;;  %3237 = vrot.lane.b32.xlu0 %v3236_v27, %s3508_s0 }
 0x44d   :  { %827 = vrot.lane.b32.xlu1 %v3694_v54, %s3509_s15  ;;  %837 = vrot.lane.b32.xlu0 %v3689_v52, %s3508_s0 }
 0x451   :  { %829 = vrot.lane.b32.xlu0 %v3699_v56, %s3509_s15 }
 0x4b7   :  { %v3233_v35 = vpop.permute.xlu1 %3232 }
 0x4b8   :  { %v3235_v41 = vunpack.i.h.bf16 %v3233_v35  ;;  %v3234_v42 = vunpack.i.l.bf16 %v3233_v35 }
 0x4ba   :  { %v411_v53 = vsel %vm410_vm0, %v386_v44, %v3234_v42  ;;  %v412_v55 = vsel %vm410_vm0, %v387_v47, %v3235_v41 }
 0x4bb   :  { %v836_v45 = vpop.permute.xlu1 %835  ;;  %v3238_v46 = vpop.permute.xlu0 %3237 }
 0x4bc   :  { %v3240_v49 = vunpack.i.h.bf16 %v3238_v46  ;;  %v3239_v50 = vunpack.i.l.bf16 %v3238_v46  ;;  %v3825_v51 = vsel %vm167_vm11, -9e+15, %v836_v45 }
 0x4bd   :  { %845 = vrot.lane.b32.xlu1 %v3825_v51, %s3496_s2 }
 0x4be   :  { %v414_v59 = vsel %vm413_vm7, %v411_v53, %v3239_v50  ;;  %v415_v61 = vsel %vm413_vm7, %v412_v55, %v3240_v49 }
 0x4bf   :  { %v838_v62 = vpop.permute.xlu0 %837  ;;  %v416_v63 = vpack.c.bf16 %v415_v61, %v414_v59  ;;  %v828_v4 = vpop.permute.xlu1 %827 }
 0x4c0   :  { %v3835_v1 = vsel %vm168_vm12, -9e+15, %v838_v62  ;;  %v3853_v0 = vsel %vm167_vm11, -9e+15, %v828_v4 }
 0x4c1   :  { %819 = vrot.lane.b32.xlu1 %v3722_v6, %s3510_s16  ;;  %847 = vrot.lane.b32.xlu0 %v3835_v1, %s3496_s2 }
 0x4c2   :  { %3022 = vmatmul.mubr.msk.bf16.vlgmr.msra.gmra.mrb[0].mxu1 %vm459_vm8, %v416_v63 }
 0x4c3   :  { %3029 = vmatprep.mubr.msk.bf16.mxu1 %vm3506_vm15, %v3505_v34  ;;  %3026 = vmatpush3.bf16.msra.mxu1 %v3341_v3  ;;  %v830_v20 = vpop.permute.xlu0 %829 }
 0x4c4   :  { %3027 = vmatprep.subr.bf16.mxu1 %v3505_v34  ;;  %v3860_v23 = vsel %vm168_vm12, -9e+15, %v830_v20 }
 0x4c5   :  { %821 = vrot.lane.b32.xlu0 %v3726_v8, %s3510_s16  ;;  %s3513_s16 = smov 29  }
 0x4c7   :  { %3028 = vmatpush3.bf16.msra.mxu1 %v3342_v7 }
 0x4c8   :  { %3055 = vmatprep.subr.bf16.mxu1 %v3505_v34 }
 0x52f   :  { %v846_v21 = vpop.permute.xlu1 %845 }
 0x530   :  { %v851_v22 = vmax.f32 %v3853_v0, %v846_v21 }
 0x532   :  { %855 = vrot.lane.b32.xlu1 %v851_v22, %s3496_s2 }
 0x533   :  { %v848_v24 = vpop.permute.xlu0 %847  ;;  %v820_v55 = vpop.permute.xlu1 %819 }
 0x534   :  { %v852_v25 = vmax.f32 %v3860_v23, %v848_v24  ;;  %v825_v3 = vsel %vm167_vm11, -9e+15, %v820_v55  ;;  %v593_v55 = vld [vmem:[%s4676_s6] sm:$0x1] }
 0x536   :  { %857 = vrot.lane.b32.xlu0 %v852_v25, %s3496_s2 }
 0x537   :  { %v822_v4 = vpop.permute.xlu0 %821 }
 0x595   :  { %v497_v27 = vpop.f32.mrb[0].mxu1 }
 0x596   :  { %v3867_v28 = vadd.f32 %v2756_v26, %v497_v27  ;;  %v3023_v33 = vpop.f32.mrb[1].mxu1  ;;  %v826_v27 = vsel %vm168_vm12, -9e+15, %v822_v4 }
 0x597   :  { %v500_v35 = vpop.f32.mrb[2].mxu1 }
 0x598   :  { %v504_v36 = vmax.f32 %v3867_v28, 0.0  ;;  %v3870_v41 = vadd.f32 %v2756_v26, %v500_v35  ;;  %v3024_v42 = vpop.f32.mrb[3].mxu1 }
 0x59a   :  { %v506_v43 = vsel %vm410_vm0, %v504_v36, 0.0  ;;  %v505_v44 = vmax.f32 %v3870_v41, 0.0 }
 0x59b   :  { %v507_v45 = vrot.slane %v506_v43, 4 }
 0x59c   :  { %v513_v46 = vsel %vm410_vm0, %v505_v44, 0.0 }
 0x59d   :  { %v508_v47 = vadd.f32 %v507_v45, %v506_v43  ;;  %v514_v49 = vrot.slane %v513_v46, 4 }
 0x59f   :  { %v509_v50 = vrot.slane %v508_v47, 2  ;;  %v515_v53 = vadd.f32 %v514_v49, %v513_v46 }
 0x5a1   :  { %v510_v59 = vadd.f32 %v509_v50, %v508_v47  ;;  %v516_v61 = vrot.slane %v515_v53, 2 }
 0x5a3   :  { %v511_v62 = vrot.slane %v510_v59, 1  ;;  %v517_v63 = vadd.f32 %v516_v61, %v515_v53 }
 0x5a4   :  { %v856_v7 = vpop.permute.xlu1 %855 }
 0x5a5   :  { %v512_v20 = vadd.f32 %v511_v62, %v510_v59  ;;  %v518_v21 = vrot.slane %v517_v63, 1  ;;  %v861_v22 = vmax.f32 %v825_v3, %v856_v7  ;;  %v600_v59 = vsel %vm598_vm10, %v593_v55, 0 }
 0x5a6   :  { %3034 = vmatpush3.bf16.msra.mxu0 %v600_v59 }
 0x5a7   :  { %v521_v24 = vmul.f32 0.125, %v512_v20  ;;  %v519_v25 = vadd.f32 %v518_v21, %v517_v63  ;;  %v863_v26 = vsub.f32 %v825_v3, %v861_v22  ;;  %871 = vrot.lane.b32.xlu1 %v861_v22, %s3500_s20  ;;  %3039 = vmatprep.subr.bf16.mxu0 %v3505_v34 }
 0x5a8   :  { %v858_v33 = vpop.permute.xlu0 %857 }
 0x5a9   :  { %v523_v35 = vpack.c.bf16 %v521_v24, %v521_v24  ;;  %v522_v42 = vmul.f32 0.125, %v519_v25  ;;  %v862_v43 = vmax.f32 %v826_v27, %v858_v33  ;;  %v865_v24 = vmul.f32 1.442695, %v863_v26 }
 0x5ab   :  { %v524_v45 = vpack.c.bf16 %v522_v42, %v522_v42  ;;  %v864_v46 = vsub.f32 %v826_v27, %v862_v43  ;;  %883 = vrot.lane.b32.xlu1 %v861_v22, %s3501_s21  ;;  %873 = vrot.lane.b32.xlu0 %v862_v43, %s3500_s20  ;;  %v531_v47 = vunpack.c.l.b16 %v523_v35 }
 0x5ad   :  { %v532_v49 = vunpack.c.l.b16 %v524_v45 }
 0x5af   :  { %885 = vrot.lane.b32.xlu0 %v862_v43, %s3501_s21  ;;  %v534_v50 = vsel %vm533_vm9, %v532_v49, %v531_v47 }
 0x5b0   :  { %v535_v53 = vpack.c.b16 %v534_v50, %v534_v50 }
 0x5b2   :  { %3030 = vmatmul.mubr.msk.bf16.vlgmr.msra.gmra.mrb[4].mxu1 %vm410_vm0, %v535_v53 }
 0x5b3   :  { %3067 = vmatprep.mubr.msk.bf16.mxu1 %vm3506_vm15, %v3505_v34 }
 0x619   :  { %v872_v61 = vpop.permute.xlu1 %871 }
 0x61a   :  { %v877_v62 = vsub.f32 %v3853_v0, %v872_v61  ;;  %v867_v0 = vmul.f32 1.442695, %v864_v46 }
 0x61c   :  { %v879_v63 = vmul.f32 1.442695, %v877_v62 }
 0x61d   :  { %v884_v3 = vpop.permute.xlu1 %883  ;;  %v874_v4 = vpop.permute.xlu0 %873 }
 0x61e   :  { %3407 = vpow2.f32 %v879_v63  ;;  %v889_v7 = vsub.f32 %v3825_v51, %v884_v3  ;;  %v878_v20 = vsub.f32 %v3860_v23, %v874_v4 }
 0x620   :  { %v891_v21 = vmul.f32 1.442695, %v889_v7  ;;  %v881_v22 = vmul.f32 1.442695, %v878_v20 }
 0x621   :  { %v886_v25 = vpop.permute.xlu0 %885 }
 0x622   :  { %3409 = vpow2.f32 %v891_v21  ;;  %v890_v27 = vsub.f32 %v3835_v1, %v886_v25 }
 0x623   :  { %3411 = vpow2.f32 %v881_v22 }
 0x624   :  { %v893_v33 = vmul.f32 1.442695, %v890_v27  ;;  %3413 = vpow2.f32 %v865_v24 }
 0x626   :  { %3415 = vpow2.f32 %v893_v33 }
 0x627   :  { %3417 = vpow2.f32 %v867_v0 }
 0x628   :  { %v3408_v35 = vpop.eup %3407 }
 0x629   :  { %897 = vrot.lane.b32.xlu1 %v3408_v35, %s3496_s2 }
 0x62c   :  { %v3410_v42 = vpop.eup %3409 }
 0x62d   :  { %v3412_v51 = vpop.eup %3411  ;;  %907 = vrot.lane.b32.xlu1 %v3410_v42, %s3502_s22 }
 0x62e   :  { %899 = vrot.lane.b32.xlu0 %v3412_v51, %s3496_s2  ;;  %v3414_v23 = vpop.eup %3413 }
 0x630   :  { %v3416_v26 = vpop.eup %3415 }
 0x631   :  { %919 = vperm.xlu1 %3230, %v3414_v23   ;;  %v3418_v1 = vpop.eup %3417 }
 0x632   :  { %909 = vrot.lane.b32.xlu0 %v3416_v26, %s3502_s22 }
 0x635   :  { %3241 = vset.pattern.permute.xlu1 %v3503_v17 }
 0x636   :  { %924 = vperm.xlu0 %3229, %v3418_v1   ;;  %930 = vperm.xlu1 %3241, %v3408_v35  }
 0x63a   :  { %3242 = vset.pattern.permute.xlu0 %v3503_v17  ;;  %3243 = vset.pattern.permute.xlu1 %v3504_v18 }
 0x63b   :  { %934 = vperm.xlu0 %3242, %v3412_v51   ;;  %942 = vperm.xlu1 %3243, %v3410_v42  }
 0x63f   :  { %946 = vperm.xlu1 %3243, %v3416_v26   ;;  %3244 = vset.pattern.permute.xlu0 %v3495_v2 }
 0x643   :  { %3245 = vset.pattern.permute.xlu1 %v3495_v2 }
 0x685   :  { %v585_v43 = vpop.f32.mrb[4].mxu1 }
 0x686   :  { %v591_v45 = vmax.f32 %v585_v43, 0.0  ;;  %v3031_v46 = vpop.f32.mrb[5].mxu1 }
 0x687   :  { %v588_v47 = vpop.f32.mrb[6].mxu1 }
 0x688   :  { %v592_v49 = vpack.c.bf16 %v591_v45, %v591_v45  ;;  %v3032_v50 = vpop.f32.mrb[7].mxu1 }
 0x68a   :  { %3036 = vmatmul.mubr.msk.bf16.vlgmr.msra.gmra.mrb[4].mxu0 %vm594_vm13, %v592_v49 }
 0x68b   :  { %3051 = vmatprep.mubr.msk.bf16.mxu0 %vm3506_vm15, %v3505_v34 }
 0x69b   :  { %v898_v53 = vpop.permute.xlu1 %897 }
 0x69c   :  { %v903_v55 = vadd.f32 %v3414_v23, %v898_v53 }
 0x69f   :  { %v908_v59 = vpop.permute.xlu1 %907 }
 0x6a0   :  { %v913_v61 = vadd.f32 %v908_v59, %v903_v55  ;;  %v900_v62 = vpop.permute.xlu0 %899  ;;  %v3343_v59 = vld [vmem:[%s4673_s3 + $0x30] sm:$0xff]  }
 0x6a1   :  { %v904_v63 = vadd.f32 %v3418_v1, %v900_v62  ;;  %3056 = vmatpush3.bf16.msra.mxu1 %v3343_v59  ;;  %v3345_v62 = vld [vmem:[%s4673_s3 + $0x40] sm:$0xff]  }
 0x6a2   :  { %3419 = vrcp.f32 %v913_v61  ;;  %v3344_v61 = vld [vmem:[%s4673_s3 + $0x38] sm:$0xff]   ;;  %3057 = vmatprep.subr.bf16.mxu1 %v3505_v34 }
 0x6a4   :  { %v910_v3 = vpop.permute.xlu0 %909 }
 0x6a5   :  { %v914_v4 = vadd.f32 %v910_v3, %v904_v63  ;;  %3058 = vmatpush3.bf16.msra.mxu1 %v3344_v61  ;;  %v3346_v63 = vld [vmem:[%s4673_s3 + $0x48] sm:$0xff]  }
 0x6a6   :  { %3059 = vmatprep.subr.bf16.mxu1 %v3505_v34 }
 0x6a7   :  { %3421 = vrcp.f32 %v914_v4 }
 0x6a9   :  { %3060 = vmatpush3.bf16.msra.mxu1 %v3345_v62  ;;  %v3348_v62 = vld [vmem:[%s4673_s3 + $0x58] sm:$0xff]  }
 0x6aa   :  { %3061 = vmatprep.subr.bf16.mxu1 %v3505_v34 }
 0x6ac   :  { %v3420_v7 = vpop.eup %3419 }
 0x6ad   :  { %955 = vperm.xlu0 %3244, %v3420_v7   ;;  %3062 = vmatpush3.bf16.msra.mxu1 %v3346_v63 }
 0x6ae   :  { %3063 = vmatprep.subr.bf16.mxu1 %v3505_v34 }
 0x6b0   :  { %v920_v21 = vpop.permute.xlu1 %919 }
 0x6b1   :  { %v3422_v20 = vpop.eup %3421  ;;  %v927_v33 = vmul.f32 %v920_v21, %v3648_v31 }
 0x6b2   :  { %960 = vperm.xlu1 %3245, %v3422_v20  }
 0x6b5   :  { %v931_v22 = vpop.permute.xlu1 %930  ;;  %v925_v24 = vpop.permute.xlu0 %924 }
 0x6b6   :  { %v937_v27 = vmul.f32 %v931_v22, %v3592_v9  ;;  %v928_v1 = vmul.f32 %v925_v24, %v3652_v32  ;;  %v3514_v24 = vmov 1966171168  }
 0x6b8   :  { %v939_v42 = vadd.f32 %v937_v27, %v927_v33 }
 0x6ba   :  { %v943_v25 = vpop.permute.xlu1 %942  ;;  %v935_v0 = vpop.permute.xlu0 %934 }
 0x6bb   :  { %v949_v35 = vmul.f32 %v943_v25, %v3640_v29  ;;  %v938_v23 = vmul.f32 %v935_v0, %v3600_v11  ;;  %v650_v25 = vunpack.c.l.s4 %v3514_v24 }
 0x6bd   :  { %v951_v26 = vadd.f32 %v949_v35, %v939_v42  ;;  %v940_v47 = vadd.f32 %v938_v23, %v928_v1  ;;  %v651_v27 = vunpack.c.0.s8 %v650_v25  ;;  %v3948_v42 = vsub.s32 0, %v3588_v5 }
 0x6be   :  { %v947_v51 = vpop.permute.xlu1 %946 }
 0x6bf   :  { %v950_v43 = vmul.f32 %v947_v51, %v3644_v30  ;;  %v3944_v33 = vsub.s32 %v651_v27, %v3588_v5 }
 0x6c1   :  { %v952_v49 = vadd.f32 %v950_v43, %v940_v47 }
 0x72c   :  { %v956_v45 = vpop.permute.xlu0 %955 }
 0x72d   :  { %v963_v46 = vmul.f32 %v956_v45, %v951_v26 }
 0x72f   :  { %982 = vrot.lane.b32.xlu1 %v963_v46, %s3511_s28 }
 0x731   :  { %v961_v50 = vpop.permute.xlu1 %960 }
 0x732   :  { %v964_v53 = vmul.f32 %v961_v50, %v952_v49 }
 0x734   :  { %v3246_v55 = vpack.i.bf16 %v964_v53, %v963_v46  ;;  %984 = vrot.lane.b32.xlu0 %v964_v53, %s3511_s28  ;;  %s3519_s28 = smov 123  }
 0x736   :  { %3247 = vrot.lane.b32.xlu1 %v3246_v55, %s3502_s22 }
 0x73a   :  { %1436 = vrot.lane.b32.xlu1 %v3685_v48, %s3512_s12  ;;  %v3347_v48 = vld [vmem:[%s4673_s3 + $0x50] sm:$0xff]  }
 0x73b   :  { %3064 = vmatpush3.bf16.msra.mxu1 %v3347_v48 }
 0x73c   :  { %3065 = vmatprep.subr.bf16.mxu1 %v3505_v34 }
 0x73e   :  { %1428 = vrot.lane.b32.xlu1 %v3694_v54, %s3513_s16 }
 0x73f   :  { %3066 = vmatpush3.bf16.msra.mxu1 %v3348_v62 }
 0x740   :  { %3079 = vmatprep.subr.bf16.mxu1 %v3505_v34 }
 0x75d   :  { %v636_v3 = vpop.f32.mrb[4].mxu0 }
 0x75e   :  { %v2768_v4 = vmul.f32 -1.442695, %v636_v3  ;;  %v3037_v54 = vpop.f32.mrb[5].mxu0 }
 0x75f   :  { %v639_v7 = vpop.f32.mrb[6].mxu0 }
 0x760   :  { %3423 = vpow2.f32 %v2768_v4  ;;  %v3038_v20 = vpop.f32.mrb[7].mxu0 }
 0x76a   :  { %v3424_v21 = vpop.eup %3423 }
 0x76b   :  { %v645_v22 = vadd.f32 1.0, %v3424_v21 }
 0x76d   :  { %3425 = vrcp.f32 %v645_v22 }
 0x777   :  { %v3426_v0 = vpop.eup %3425 }
 0x778   :  { %v655_v35 = vrot.slane %v3426_v0, %v3944_v33 }
 0x77a   :  { %v656_v51 = vcombine.high %v655_v35, %v655_v35  ;;  %v663_v23 = vrot.slane %v655_v35, %v3944_v33 }
 0x77c   :  { %v670_v26 = vrot.slane %v656_v51, %v3944_v33  ;;  %v674_v1 = vrot.slane %v663_v23, %v3948_v42 }
 0x77e   :  { %v678_v43 = vrot.slane %v670_v26, %v3948_v42  ;;  %v681_v45 = vmul.f32 %v674_v1, %v504_v36 }
 0x780   :  { %v682_v46 = vmul.f32 %v678_v43, %v505_v44  ;;  %v696_v47 = vrot.slane %v681_v45, 7  ;;  %v702_v50 = vrot.slane %v681_v45, 1 }
 0x782   :  { %v697_v49 = vrot.slane %v682_v46, 7  ;;  %v703_v53 = vrot.slane %v682_v46, 1 }
 0x784   :  { %v3960_v55 = vsel %vm4681_vm1, %v696_v47, %v697_v49  ;;  %v3964_v59 = vsel %vm4681_vm1, %v697_v49, %v696_v47  ;;  %v704_v61 = vsel %vm4680_vm2, %v702_v50, %v703_v53  ;;  %v705_v28 = vsel %vm4680_vm2, %v703_v53, %v702_v50 }
 0x785   :  { %v706_v36 = vsel %vm3602_vm3, 0.0, %v704_v61  ;;  %v707_v41 = vsel %vm3606_vm4, 0.0, %v705_v28 }
 0x786   :  { %v3974_v44 = vpack.i.bf16 %v707_v41, %v706_v36 }
 0x7a1   :  { %v3979_v63 = vpop.permute.xlu1 %982 }
 0x7a2   :  { %v994_v4 = vrot.slane %v3979_v63, 1  ;;  %v988_v35 = vrot.slane %v3979_v63, 7 }
 0x7a6   :  { %v3982_v48 = vpop.permute.xlu0 %984 }
 0x7a7   :  { %v995_v3 = vrot.slane %v3982_v48, 1  ;;  %v989_v0 = vrot.slane %v3982_v48, 7 }
 0x7a8   :  { %v3248_v54 = vpop.permute.xlu1 %3247 }
 0x7a9   :  { %v996_v7 = vsel %vm4680_vm2, %v994_v4, %v995_v3  ;;  %v997_v20 = vsel %vm4680_vm2, %v995_v3, %v994_v4  ;;  %v990_v51 = vsel %vm4681_vm1, %v988_v35, %v989_v0  ;;  %v991_v23 = vsel %vm4681_vm1, %v989_v0, %v988_v35 }
 0x7aa   :  { %v998_v21 = vsel %vm3602_vm3, 0.0, %v996_v7  ;;  %v999_v22 = vsel %vm3606_vm4, 0.0, %v997_v20  ;;  %v3250_v1 = vunpack.i.h.bf16 %v3248_v54  ;;  %v992_v43 = vsel %vm3610_vm5, 0.0, %v991_v23  ;;  %v3349_v20 = vld [vmem:[%s4677_s7] sm:$0xff]  }
 0x7ab   :  { %v3251_v25 = vpack.i.bf16 %v999_v22, %v998_v21  ;;  %v3256_v7 = vpack.i.bf16 %v682_v46, %v681_v45  ;;  %3040 = vmatpush3.bf16.msra.mxu0 %v3349_v20  ;;  %v3350_v45 = vld [vmem:[%s4677_s7 + $0x8] sm:$0xff]   ;;  %v3351_v46 = vld [vmem:[%s4677_s7 + $0x10] sm:$0xff]   ;;  %v3353_v21 = vld [vmem:[%s4677_s7 + $0x20] sm:$0xff]  }
 0x7ac   :  { %v1437_v24 = vpop.permute.xlu1 %1436  ;;  %3041 = vmatprep.subr.bf16.mxu0 %v3505_v34 }
 0x7ad   :  { %v3996_v27 = vsel %vm167_vm11, -9e+15, %v1437_v24  ;;  %3252 = vrot.lane.b32.xlu0 %v3251_v25, %s3508_s0  ;;  %v3354_v24 = vld [vmem:[%s4677_s7 + $0x28] sm:$0xff]  }
 0x7ae   :  { %1446 = vrot.lane.b32.xlu1 %v3996_v27, %s3496_s2 }
 0x7af   :  { %3042 = vmatpush3.bf16.msra.mxu0 %v3350_v45 }
 0x7b0   :  { %v1429_v26 = vpop.permute.xlu1 %1428  ;;  %3043 = vmatprep.subr.bf16.mxu0 %v3505_v34 }
 0x7b1   :  { %1438 = vrot.lane.b32.xlu0 %v3689_v52, %s3512_s12  ;;  %v3249_v52 = vunpack.i.l.bf16 %v3248_v54 }
 0x7b2   :  { %1420 = vrot.lane.b32.xlu1 %v3722_v6, %s3515_s26  ;;  %v993_v6 = vsel %vm3614_vm6, 0.0, %v990_v51 }
 0x7b3   :  { %v1015_v28 = vsel %vm410_vm0, %v993_v6, %v3250_v1  ;;  %v1014_v36 = vsel %vm410_vm0, %v992_v43, %v3249_v52  ;;  %3044 = vmatpush3.bf16.msra.mxu0 %v3351_v46  ;;  %v2790_v43 = vld [vmem:[%s4674_s4 + $0x1] ss:$0 sm:$0xff] }
 0x7b4   :  { %3045 = vmatprep.subr.bf16.mxu0 %v3505_v34 }
 0x7b5   :  { %1430 = vrot.lane.b32.xlu0 %v3699_v56, %s3513_s16  ;;  %v4019_v56 = vsel %vm167_vm11, -9e+15, %v1429_v26 }
 0x81f   :  { %v3253_v47 = vpop.permute.xlu0 %3252 }
 0x820   :  { %v1447_v49 = vpop.permute.xlu1 %1446  ;;  %v3255_v50 = vunpack.i.h.bf16 %v3253_v47  ;;  %v3254_v53 = vunpack.i.l.bf16 %v3253_v47 }
 0x821   :  { %v1452_v61 = vmax.f32 %v4019_v56, %v1447_v49 }
 0x822   :  { %v1016_v41 = vsel %vm413_vm7, %v1014_v36, %v3254_v53  ;;  %v1017_v62 = vsel %vm413_vm7, %v1015_v28, %v3255_v50 }
 0x823   :  { %1456 = vrot.lane.b32.xlu1 %v1452_v61, %s3496_s2  ;;  %v1018_v3 = vpack.c.bf16 %v1017_v62, %v1016_v41  ;;  %v1439_v4 = vpop.permute.xlu0 %1438 }
 0x824   :  { %v4029_v54 = vsel %vm168_vm12, -9e+15, %v1439_v4  ;;  %v1421_v22 = vpop.permute.xlu1 %1420 }
 0x825   :  { %1448 = vrot.lane.b32.xlu0 %v4029_v54, %s3496_s2  ;;  %3068 = vmatmul.mubr.msk.bf16.vlgmr.msra.gmra.mrb[8].mxu1 %vm459_vm8, %v1018_v3  ;;  %v1426_v0 = vsel %vm167_vm11, -9e+15, %v1421_v22 }
 0x826   :  { %3081 = vmatprep.mubr.msk.bf16.mxu1 %vm3506_vm15, %v3505_v34 }
 0x827   :  { %3257 = vrot.lane.b32.xlu1 %v3256_v7, %s3507_s14  ;;  %v1431_v25 = vpop.permute.xlu0 %1430 }
 0x828   :  { %v4067_v23 = vsel %vm168_vm12, -9e+15, %v1431_v25 }
 0x829   :  { %1422 = vrot.lane.b32.xlu0 %v3726_v8, %s3515_s26  ;;  %v3352_v8 = vld [vmem:[%s4677_s7 + $0x18] sm:$0xff]  }
 0x82a   :  { %3046 = vmatpush3.bf16.msra.mxu0 %v3352_v8 }
 0x82b   :  { %3047 = vmatprep.subr.bf16.mxu0 %v3505_v34 }
 0x82e   :  { %3048 = vmatpush3.bf16.msra.mxu0 %v3353_v21 }
 0x82f   :  { %3049 = vmatprep.subr.bf16.mxu0 %v3505_v34 }
 0x832   :  { %3050 = vmatpush3.bf16.msra.mxu0 %v3354_v24 }
 0x833   :  { %3071 = vmatprep.subr.bf16.mxu0 %v3505_v34 }
 0x895   :  { %v1457_v35 = vpop.permute.xlu1 %1456 }
 0x896   :  { %v1462_v51 = vmax.f32 %v1426_v0, %v1457_v35 }
 0x897   :  { %v1449_v1 = vpop.permute.xlu0 %1448 }
 0x898   :  { %v1464_v26 = vsub.f32 %v1426_v0, %v1462_v51  ;;  %1472 = vrot.lane.b32.xlu1 %v1462_v51, %s3500_s20  ;;  %v1453_v52 = vmax.f32 %v4067_v23, %v1449_v1 }
 0x899   :  { %v3258_v8 = vpop.permute.xlu1 %3257 }
 0x89a   :  { %1458 = vrot.lane.b32.xlu0 %v1453_v52, %s3496_s2 }
 0x89b   :  { %v1423_v24 = vpop.permute.xlu0 %1422 }
 0x89c   :  { %1484 = vrot.lane.b32.xlu1 %v1462_v51, %s3501_s21  ;;  %v4093_v52 = vsel %vm168_vm12, -9e+15, %v1423_v24 }
 0x89e   :  { %3262 = vrot.lane.b32.xlu0 %v3974_v44, %s3508_s0 }
 0x8f8   :  { %v1098_v6 = vpop.f32.mrb[8].mxu1 }
 0x8f9   :  { %v4078_v47 = vadd.f32 %v2790_v43, %v1098_v6  ;;  %v3069_v49 = vpop.f32.mrb[9].mxu1 }
 0x8fa   :  { %v1101_v50 = vpop.f32.mrb[10].mxu1 }
 0x8fb   :  { %v1105_v53 = vmax.f32 %v4078_v47, 0.0  ;;  %v4081_v61 = vadd.f32 %v2790_v43, %v1101_v50  ;;  %v3070_v28 = vpop.f32.mrb[11].mxu1 }
 0x8fd   :  { %v1107_v36 = vsel %vm410_vm0, %v1105_v53, 0.0  ;;  %v1106_v44 = vmax.f32 %v4081_v61, 0.0 }
 0x8fe   :  { %v1108_v41 = vrot.slane %v1107_v36, 4 }
 0x8ff   :  { %v1114_v62 = vsel %vm410_vm0, %v1106_v44, 0.0 }
 0x900   :  { %v1109_v3 = vadd.f32 %v1108_v41, %v1107_v36  ;;  %v1115_v4 = vrot.slane %v1114_v62, 4  ;;  %v3260_v36 = vunpack.i.h.bf16 %v3258_v8  ;;  %v3259_v41 = vunpack.i.l.bf16 %v3258_v8 }
 0x902   :  { %v1110_v7 = vrot.slane %v1109_v3, 2  ;;  %v1116_v20 = vadd.f32 %v1115_v4, %v1114_v62 }
 0x904   :  { %v1111_v45 = vadd.f32 %v1110_v7, %v1109_v3  ;;  %v1117_v46 = vrot.slane %v1116_v20, 2 }
 0x906   :  { %v1118_v21 = vadd.f32 %v1117_v46, %v1116_v20  ;;  %v1112_v22 = vrot.slane %v1111_v45, 1 }
 0x908   :  { %v1119_v25 = vrot.slane %v1118_v21, 1  ;;  %v1113_v1 = vadd.f32 %v1112_v22, %v1111_v45  ;;  %v701_v45 = vsel %vm3614_vm6, 0.0, %v3960_v55  ;;  %v1466_v22 = vmul.f32 1.442695, %v1464_v26  ;;  %v3355_v55 = vld [vmem:[%s4675_s5 + $0x10] sm:$0xff]  }
 0x909   :  { %v725_v24 = vsel %vm410_vm0, %v701_v45, %v3260_v36 }
 0x90a   :  { %v1473_v0 = vpop.permute.xlu1 %1472  ;;  %v1120_v35 = vadd.f32 %v1119_v25, %v1118_v21  ;;  %v1121_v3 = vmul.f32 0.125, %v1113_v1  ;;  %v3356_v1 = vld [vmem:[%s4675_s5 + $0x18] sm:$0xff]  }
 0x90b   :  { %v1478_v51 = vsub.f32 %v4019_v56, %v1473_v0  ;;  %v700_v56 = vsel %vm3610_vm5, 0.0, %v3964_v59 }
 0x90c   :  { %v1459_v6 = vpop.permute.xlu0 %1458  ;;  %v1122_v49 = vmul.f32 0.125, %v1120_v35  ;;  %v1123_v25 = vpack.c.bf16 %v1121_v3, %v1121_v3 }
 0x90d   :  { %v1480_v43 = vmul.f32 1.442695, %v1478_v51  ;;  %v1463_v50 = vmax.f32 %v4093_v52, %v1459_v6 }
 0x90e   :  { %v1485_v28 = vpop.permute.xlu1 %1484  ;;  %v1124_v46 = vpack.c.bf16 %v1122_v49, %v1122_v49  ;;  %v1132_v26 = vunpack.c.l.b16 %v1123_v25 }
 0x90f   :  { %3427 = vpow2.f32 %v1480_v43  ;;  %v1490_v62 = vsub.f32 %v3996_v27, %v1485_v28  ;;  %v1465_v4 = vsub.f32 %v4093_v52, %v1463_v50  ;;  %1474 = vrot.lane.b32.xlu0 %v1463_v50, %s3500_s20  ;;  %v724_v27 = vsel %vm410_vm0, %v700_v56, %v3259_v41  ;;  %v2805_v28 = vld [vmem:[%s4676_s6 + $0x1] sm:$0x1] }
 0x910   :  { %v3263_v20 = vpop.permute.xlu0 %3262  ;;  %v1133_v51 = vunpack.c.l.b16 %v1124_v46  ;;  %v1199_v36 = vsel %vm598_vm10, %v2805_v28, 0 }
 0x911   :  { %v1492_v7 = vmul.f32 1.442695, %v1490_v62  ;;  %v3265_v8 = vunpack.i.h.bf16 %v3263_v20  ;;  %v3264_v21 = vunpack.i.l.bf16 %v3263_v20  ;;  %3080 = vmatpush3.bf16.msra.mxu1 %v1199_v36  ;;  %v1468_v45 = vmul.f32 1.442695, %v1465_v4 }
 0x912   :  { %v1134_v43 = vsel %vm533_vm9, %v1133_v51, %v1132_v26  ;;  %3101 = vmatprep.subr.bf16.mxu1 %v3505_v34 }
 0x913   :  { %3429 = vpow2.f32 %v1492_v7  ;;  %v726_v0 = vsel %vm413_vm7, %v724_v27, %v3264_v21  ;;  %v727_v59 = vsel %vm413_vm7, %v725_v24, %v3265_v8  ;;  %1486 = vrot.lane.b32.xlu0 %v1463_v50, %s3501_s21  ;;  %v1135_v49 = vpack.c.b16 %v1134_v43, %v1134_v43 }
 0x914   :  { %v728_v35 = vpack.c.bf16 %v727_v59, %v726_v0  ;;  %3431 = vpow2.f32 %v1466_v22 }
 0x916   :  { %3052 = vmatmul.mubr.msk.bf16.vlgmr.msra.gmra.mrb[8].mxu0 %vm459_vm8, %v728_v35 }
 0x917   :  { %3072 = vmatpush3.bf16.msra.mxu0 %v3355_v55  ;;  %3075 = vmatprep.mubr.msk.bf16.mxu0 %vm3506_vm15, %v3505_v34 }
 0x918   :  { %3073 = vmatprep.subr.bf16.mxu0 %v3505_v34 }
 0x919   :  { %v3428_v52 = vpop.eup %3427 }
 0x91a   :  { %1498 = vrot.lane.b32.xlu1 %v3428_v52, %s3496_s2 }
 0x91b   :  { %3074 = vmatpush3.bf16.msra.mxu0 %v3356_v1 }
 0x91c   :  { %3085 = vmatprep.subr.bf16.mxu0 %v3505_v34 }
 0x91d   :  { %v3430_v6 = vpop.eup %3429 }
 0x91e   :  { %1508 = vrot.lane.b32.xlu1 %v3430_v6, %s3502_s22  ;;  %3076 = vmatmul.mubr.msk.bf16.vlgmr.msra.gmra.mrb[12].mxu0 %vm410_vm0, %v1135_v49  ;;  %v3432_v50 = vpop.eup %3431 }
 0x91f   :  { %3097 = vmatprep.mubr.msk.bf16.mxu0 %vm3506_vm15, %v3505_v34 }
 0x922   :  { %1520 = vperm.xlu1 %3245, %v3432_v50  }
 0x926   :  { %3266 = vset.pattern.permute.xlu1 %v3503_v17 }
 0x927   :  { %1531 = vperm.xlu1 %3266, %v3428_v52  }
 0x92b   :  { %3268 = vset.pattern.permute.xlu1 %v3504_v18 }
 0x92c   :  { %1543 = vperm.xlu1 %3268, %v3430_v6  }
 0x981   :  { %v1475_v41 = vpop.permute.xlu0 %1474 }
 0x982   :  { %v1479_v62 = vsub.f32 %v4067_v23, %v1475_v41 }
 0x984   :  { %v1482_v3 = vmul.f32 1.442695, %v1479_v62 }
 0x985   :  { %v1487_v56 = vpop.permute.xlu0 %1486 }
 0x986   :  { %3433 = vpow2.f32 %v1482_v3  ;;  %v1491_v7 = vsub.f32 %v4029_v54, %v1487_v56 }
 0x988   :  { %v1494_v20 = vmul.f32 1.442695, %v1491_v7 }
 0x98a   :  { %3435 = vpow2.f32 %v1494_v20 }
 0x98b   :  { %3437 = vpow2.f32 %v1468_v45 }
 0x98c   :  { %v1499_v46 = vpop.permute.xlu1 %1498 }
 0x98d   :  { %v1504_v22 = vadd.f32 %v3432_v50, %v1499_v46 }
 0x990   :  { %v3434_v8 = vpop.eup %3433  ;;  %v1509_v21 = vpop.permute.xlu1 %1508 }
 0x991   :  { %1500 = vrot.lane.b32.xlu0 %v3434_v8, %s3496_s2  ;;  %v1514_v24 = vadd.f32 %v1509_v21, %v1504_v22 }
 0x993   :  { %3439 = vrcp.f32 %v1514_v24 }
 0x994   :  { %v3436_v27 = vpop.eup %3435 }
 0x995   :  { %1547 = vperm.xlu1 %3268, %v3436_v27   ;;  %1510 = vrot.lane.b32.xlu0 %v3436_v27, %s3502_s22  ;;  %v3438_v23 = vpop.eup %3437 }
 0x999   :  { %1525 = vperm.xlu0 %3244, %v3438_v23   ;;  %3270 = vset.pattern.permute.xlu1 %v3495_v2 }
 0x99d   :  { %3267 = vset.pattern.permute.xlu0 %v3503_v17  ;;  %v3440_v54 = vpop.eup %3439 }
 0x99e   :  { %1535 = vperm.xlu0 %3267, %v3434_v8  }
 0x9a1   :  { %v1521_v28 = vpop.permute.xlu1 %1520 }
 0x9a2   :  { %3269 = vset.pattern.permute.xlu0 %v3495_v2  ;;  %v1528_v7 = vmul.f32 %v1521_v28, %v3648_v31 }
 0x9a3   :  { %1556 = vperm.xlu0 %3269, %v3440_v54  }
 0x9a6   :  { %v1532_v41 = vpop.permute.xlu1 %1531 }
 0x9a7   :  { %v1538_v56 = vmul.f32 %v1532_v41, %v3592_v9 }
 0x9a9   :  { %v1540_v21 = vadd.f32 %v1538_v56, %v1528_v7 }
 0x9ab   :  { %v1544_v3 = vpop.permute.xlu1 %1543 }
 0x9ac   :  { %v1550_v20 = vmul.f32 %v1544_v3, %v3640_v29 }
 0x9ae   :  { %v1552_v27 = vadd.f32 %v1550_v20, %v1540_v21 }
 0x9e9   :  { %v4141_v4 = vpop.f32.mrb[8].mxu0 }
 0x9ea   :  { %v3053_v25 = vpop.f32.mrb[9].mxu0 }
 0x9eb   :  { %v4143_v0 = vpop.f32.mrb[10].mxu0 }
 0x9ec   :  { %v3054_v59 = vpop.f32.mrb[11].mxu0 }
 0x9f1   :  { %v1185_v55 = vpop.f32.mrb[12].mxu0 }
 0x9f2   :  { %v1191_v35 = vmax.f32 %v1185_v55, 0.0  ;;  %v3077_v51 = vpop.f32.mrb[13].mxu0 }
 0x9f3   :  { %v1188_v26 = vpop.f32.mrb[14].mxu0 }
 0x9f4   :  { %v1192_v1 = vpack.c.bf16 %v1191_v35, %v1191_v35  ;;  %v3078_v52 = vpop.f32.mrb[15].mxu0  ;;  %v3357_v26 = vld [vmem:[%s4673_s3 + $0x60] sm:$0xff]  }
 0x9f5   :  { %v3359_v52 = vld [vmem:[%s4673_s3 + $0x70] sm:$0xff]  }
 0x9f6   :  { %3082 = vmatmul.mubr.msk.bf16.vlgmr.msra.gmra.mrb[12].mxu1 %vm594_vm13, %v1192_v1  ;;  %v3358_v1 = vld [vmem:[%s4673_s3 + $0x68] sm:$0xff]  }
 0x9f7   :  { %3113 = vmatprep.mubr.msk.bf16.mxu1 %vm3506_vm15, %v3505_v34  ;;  %3102 = vmatpush3.bf16.msra.mxu1 %v3357_v26 }
 0x9f8   :  { %3103 = vmatprep.subr.bf16.mxu1 %v3505_v34 }
 0x9fb   :  { %3104 = vmatpush3.bf16.msra.mxu1 %v3358_v1 }
 0x9fc   :  { %3105 = vmatprep.subr.bf16.mxu1 %v3505_v34 }
 0x9ff   :  { %3106 = vmatpush3.bf16.msra.mxu1 %v3359_v52 }
 0xa00   :  { %3107 = vmatprep.subr.bf16.mxu1 %v3505_v34 }
 0xa03   :  { %v1501_v43 = vpop.permute.xlu0 %1500 }
 0xa04   :  { %v1505_v6 = vadd.f32 %v3438_v23, %v1501_v43  ;;  %v3360_v43 = vld [vmem:[%s4673_s3 + $0x78] sm:$0xff]  }
 0xa05   :  { %3108 = vmatpush3.bf16.msra.mxu1 %v3360_v43 }
 0xa06   :  { %3109 = vmatprep.subr.bf16.mxu1 %v3505_v34 }
 0xa07   :  { %v1511_v49 = vpop.permute.xlu0 %1510 }
 0xa08   :  { %v1515_v50 = vadd.f32 %v1511_v49, %v1505_v6  ;;  %v3361_v6 = vld [vmem:[%s4673_s3 + $0x80] sm:$0xff]  }
 0xa09   :  { %3110 = vmatpush3.bf16.msra.mxu1 %v3361_v6 }
 0xa0a   :  { %3441 = vrcp.f32 %v1515_v50  ;;  %3111 = vmatprep.subr.bf16.mxu1 %v3505_v34 }
 0xa14   :  { %v3442_v36 = vpop.eup %3441  ;;  %v1548_v54 = vpop.permute.xlu1 %1547 }
 0xa15   :  { %1561 = vperm.xlu1 %3270, %v3442_v36   ;;  %v1551_v25 = vmul.f32 %v1548_v54, %v3644_v30 }
 0xa18   :  { %v1526_v62 = vpop.permute.xlu0 %1525 }
 0xa19   :  { %v1529_v46 = vmul.f32 %v1526_v62, %v3652_v32 }
 0xa1d   :  { %v1536_v45 = vpop.permute.xlu0 %1535 }
 0xa1e   :  { %v1539_v8 = vmul.f32 %v1536_v45, %v3600_v11 }
 0xa20   :  { %v1541_v22 = vadd.f32 %v1539_v8, %v1529_v46 }
 0xa22   :  { %v1557_v24 = vpop.permute.xlu0 %1556  ;;  %v1553_v59 = vadd.f32 %v1551_v25, %v1541_v22 }
 0xa23   :  { %v1564_v23 = vmul.f32 %v1557_v24, %v1552_v27 }
 0xa25   :  { %1583 = vrot.lane.b32.xlu1 %v1564_v23, %s3516_s30 }
 0xa94   :  { %v1562_v55 = vpop.permute.xlu1 %1561 }
 0xa95   :  { %v1565_v35 = vmul.f32 %v1562_v55, %v1553_v59 }
 0xa97   :  { %v3271_v51 = vpack.i.bf16 %v1565_v35, %v1564_v23  ;;  %1585 = vrot.lane.b32.xlu0 %v1565_v35, %s3516_s30 }
 0xa98   :  { %v4216_v26 = vpop.permute.xlu1 %1583 }
 0xa99   :  { %3272 = vrot.lane.b32.xlu1 %v3271_v51, %s3517_s10  ;;  %v3362_v51 = vld [vmem:[%s4673_s3 + $0x88] sm:$0xff]   ;;  %v1595_v43 = vrot.slane %v4216_v26, 1 }
 0xa9a   :  { %3112 = vmatpush3.bf16.msra.mxu1 %v3362_v51 }
 0xa9b   :  { %3125 = vmatprep.subr.bf16.mxu1 %v3505_v34 }
 0xa9d   :  { %2055 = vrot.lane.b32.xlu1 %v3666_v37, %s3496_s2 }
 0xaa1   :  { %2039 = vrot.lane.b32.xlu1 %v3596_v10, %s3496_s2 }
 0xac9   :  { %v1235_v49 = vpop.f32.mrb[12].mxu1 }
 0xaca   :  { %v2807_v50 = vmul.f32 -1.442695, %v1235_v49  ;;  %v3083_v28 = vpop.f32.mrb[13].mxu1 }
 0xacb   :  { %v1238_v36 = vpop.f32.mrb[14].mxu1 }
 0xacc   :  { %3443 = vpow2.f32 %v2807_v50  ;;  %v3084_v41 = vpop.f32.mrb[15].mxu1 }
 0xad6   :  { %v3444_v62 = vpop.eup %3443 }
 0xad7   :  { %v1244_v3 = vadd.f32 1.0, %v3444_v62 }
 0xad9   :  { %3445 = vrcp.f32 %v1244_v3 }
 0xae3   :  { %v3446_v56 = vpop.eup %3445 }
 0xae4   :  { %v1254_v7 = vrot.slane %v3446_v56, %v3944_v33 }
 0xae6   :  { %v1255_v20 = vcombine.high %v1254_v7, %v1254_v7  ;;  %v1262_v45 = vrot.slane %v1254_v7, %v3944_v33 }
 0xae8   :  { %v1269_v46 = vrot.slane %v1255_v20, %v3944_v33  ;;  %v1273_v8 = vrot.slane %v1262_v45, %v3948_v42 }
 0xaea   :  { %v1277_v21 = vrot.slane %v1269_v46, %v3948_v42  ;;  %v4185_v22 = vmul.f32 %v1273_v8, %v1105_v53 }
 0xaec   :  { %v4189_v27 = vmul.f32 %v1277_v21, %v1106_v44  ;;  %v1297_v24 = vrot.slane %v4185_v22, 7  ;;  %v1303_v54 = vrot.slane %v4185_v22, 1 }
 0xaee   :  { %v1298_v23 = vrot.slane %v4189_v27, 7  ;;  %v1304_v25 = vrot.slane %v4189_v27, 1 }
 0xaf0   :  { %v4197_v59 = vsel %vm4681_vm1, %v1297_v24, %v1298_v23  ;;  %v4201_v47 = vsel %vm4681_vm1, %v1298_v23, %v1297_v24  ;;  %v1305_v53 = vsel %vm4680_vm2, %v1303_v54, %v1304_v25  ;;  %v1306_v61 = vsel %vm4680_vm2, %v1304_v25, %v1303_v54 }
 0xaf1   :  { %v1307_v44 = vsel %vm3602_vm3, 0.0, %v1305_v53  ;;  %v1308_v55 = vsel %vm3606_vm4, 0.0, %v1306_v61  ;;  %v1589_v24 = vrot.slane %v4216_v26, 7  ;;  %v1301_v58 = vsel %vm3610_vm5, 0.0, %v4201_v47 }
 0xaf2   :  { %v4211_v35 = vpack.i.bf16 %v1308_v55, %v1307_v44 }
 0xb09   :  { %v4219_v1 = vpop.permute.xlu0 %1585 }
 0xb0a   :  { %v1596_v52 = vrot.slane %v4219_v1, 1  ;;  %v1590_v21 = vrot.slane %v4219_v1, 7 }
 0xb0b   :  { %v3273_v6 = vpop.permute.xlu1 %3272 }
 0xb0c   :  { %v1597_v49 = vsel %vm4680_vm2, %v1595_v43, %v1596_v52  ;;  %v1598_v50 = vsel %vm4680_vm2, %v1596_v52, %v1595_v43  ;;  %v1591_v23 = vsel %vm4681_vm1, %v1589_v24, %v1590_v21  ;;  %v1592_v54 = vsel %vm4681_vm1, %v1590_v21, %v1589_v24 }
 0xb0d   :  { %v1599_v28 = vsel %vm3602_vm3, 0.0, %v1597_v49  ;;  %v1600_v36 = vsel %vm3606_vm4, 0.0, %v1598_v50  ;;  %v3275_v25 = vunpack.i.h.bf16 %v3273_v6  ;;  %v3274_v53 = vunpack.i.l.bf16 %v3273_v6 }
 0xb0e   :  { %v3276_v62 = vpack.i.bf16 %v1600_v36, %v1599_v28  ;;  %v1593_v61 = vsel %vm3610_vm5, 0.0, %v1592_v54  ;;  %v1594_v44 = vsel %vm3614_vm6, 0.0, %v1591_v23 }
 0xb0f   :  { %v2056_v41 = vpop.permute.xlu1 %2055  ;;  %v1615_v43 = vsel %vm410_vm0, %v1593_v61, %v3274_v53  ;;  %v1616_v49 = vsel %vm410_vm0, %v1594_v44, %v3275_v25 }
 0xb10   :  { %v2061_v3 = vadd.f32 %v2056_v41, %v3596_v10  ;;  %3277 = vrot.lane.b32.xlu0 %v3276_v62, %s3508_s0 }
 0xb12   :  { %vm2063_vm14 = vcmp.gt.f32.partialorder %v2061_v3, 0.0  ;;  %v2065_v56 = vmul.f32 0.2, %v2061_v3 }
 0xb13   :  { %v2040_v7 = vpop.permute.xlu1 %2039 }
 0xb14   :  { %v2045_v20 = vadd.f32 %v2040_v7, %v3596_v10  ;;  %v2067_v45 = vsel %vm2063_vm14, %v2061_v3, %v2065_v56  ;;  %2057 = vrot.lane.b32.xlu0 %v3670_v38, %s3496_s2 }
 0xb15   :  { %2091 = vrot.lane.b32.xlu1 %v2067_v45, %s3518_s27 }
 0xb16   :  { %v2049_v46 = vmul.f32 0.2, %v2045_v20  ;;  %vm2047_vm2 = vcmp.gt.f32.partialorder %v2045_v20, 0.0 }
 0xb18   :  { %2041 = vrot.lane.b32.xlu0 %v3618_v16, %s3496_s2  ;;  %v2051_v8 = vsel %vm2047_vm2, %v2045_v20, %v2049_v46 }
 0xb19   :  { %2023 = vrot.lane.b32.xlu1 %v3674_v39, %s3496_s2 }
 0xb1d   :  { %2081 = vrot.lane.b32.xlu1 %v2051_v8, %s3519_s28 }
 0xb82   :  { %v3278_v55 = vpop.permute.xlu0 %3277 }
 0xb83   :  { %v3280_v51 = vunpack.i.h.bf16 %v3278_v55  ;;  %v3279_v52 = vunpack.i.l.bf16 %v3278_v55  ;;  %v3363_v55 = vld [vmem:[%s4677_s7 + $0x30] sm:$0xff]  }
 0xb84   :  { %3086 = vmatpush3.bf16.msra.mxu0 %v3363_v55 }
 0xb85   :  { %v1617_v50 = vsel %vm413_vm7, %v1615_v43, %v3279_v52  ;;  %v1618_v28 = vsel %vm413_vm7, %v1616_v49, %v3280_v51  ;;  %v3364_v51 = vld [vmem:[%s4677_s7 + $0x38] sm:$0xff]   ;;  %3087 = vmatprep.subr.bf16.mxu0 %v3505_v34  ;;  %v3281_v49 = vpack.i.bf16 %v4189_v27, %v4185_v22 }
 0xb86   :  { %v1619_v36 = vpack.c.bf16 %v1618_v28, %v1617_v50  ;;  %v2058_v41 = vpop.permute.xlu0 %2057  ;;  %v3365_v50 = vld [vmem:[%s4677_s7 + $0x40] sm:$0xff]  }
 0xb87   :  { %v2092_v6 = vpop.permute.xlu1 %2091  ;;  %v2062_v62 = vadd.f32 %v2058_v41, %v3618_v16 }
 0xb88   :  { %v4259_v3 = vsel %vm167_vm11, -9e+15, %v2092_v6  ;;  %3114 = vmatmul.mubr.msk.bf16.vlgmr.msra.gmra.mrb[16].mxu1 %vm459_vm8, %v1619_v36  ;;  %3088 = vmatpush3.bf16.msra.mxu0 %v3364_v51 }
 0xb89   :  { %2101 = vrot.lane.b32.xlu1 %v4259_v3, %s3496_s2  ;;  %v2066_v56 = vmul.f32 0.2, %v2062_v62  ;;  %vm2064_vm2 = vcmp.gt.f32.partialorder %v2062_v62, 0.0  ;;  %3127 = vmatprep.mubr.msk.bf16.mxu1 %vm3506_vm15, %v3505_v34 }
 0xb8a   :  { %v2042_v7 = vpop.permute.xlu0 %2041  ;;  %3089 = vmatprep.subr.bf16.mxu0 %v3505_v34 }
 0xb8b   :  { %v2024_v20 = vpop.permute.xlu1 %2023  ;;  %v2046_v45 = vadd.f32 %v2042_v7, %v3618_v16  ;;  %v2068_v8 = vsel %vm2064_vm2, %v2062_v62, %v2066_v56  ;;  %v3366_v7 = vld [vmem:[%s4677_s7 + $0x48] sm:$0xff]   ;;  %vm2260_vm2 = vcmask 211968  }
 0xb8c   :  { %v2029_v46 = vadd.f32 %v2024_v20, %v3596_v10  ;;  %2093 = vrot.lane.b32.xlu0 %v2068_v8, %s3518_s27  ;;  %3090 = vmatpush3.bf16.msra.mxu0 %v3365_v50  ;;  %v3367_v20 = vld [vmem:[%s4677_s7 + $0x50] sm:$0xff]  }
 0xb8d   :  { %v2050_v24 = vmul.f32 0.2, %v2046_v45  ;;  %vm2048_vm1 = vcmp.gt.f32.partialorder %v2046_v45, 0.0  ;;  %3091 = vmatprep.subr.bf16.mxu0 %v3505_v34 }
 0xb8e   :  { %vm2031_vm14 = vcmp.gt.f32.partialorder %v2029_v46, 0.0  ;;  %v2033_v21 = vmul.f32 0.2, %v2029_v46 }
 0xb8f   :  { %v2052_v54 = vsel %vm2048_vm1, %v2046_v45, %v2050_v24  ;;  %v2082_v25 = vpop.permute.xlu1 %2081 }
 0xb90   :  { %v2035_v23 = vsel %vm2031_vm14, %v2029_v46, %v2033_v21  ;;  %2025 = vrot.lane.b32.xlu0 %v3678_v40, %s3496_s2  ;;  %v4274_v53 = vsel %vm167_vm11, -9e+15, %v2082_v25  ;;  %3092 = vmatpush3.bf16.msra.mxu0 %v3366_v7  ;;  %v3368_v46 = vld [vmem:[%s4677_s7 + $0x58] sm:$0xff]   ;;  %vm4692_vm14 = vcmp.lt.s32.totalorder %v3588_v5, 7 }
 0xb91   :  { %2071 = vrot.lane.b32.xlu1 %v2035_v23, %s3520_s29  ;;  %3093 = vmatprep.subr.bf16.mxu0 %v3505_v34 }
 0xb94   :  { %2083 = vrot.lane.b32.xlu0 %v2052_v54, %s3519_s28  ;;  %3094 = vmatpush3.bf16.msra.mxu0 %v3367_v20 }
 0xb95   :  { %3095 = vmatprep.subr.bf16.mxu0 %v3505_v34 }
 0xb98   :  { %3096 = vmatpush3.bf16.msra.mxu0 %v3368_v46 }
 0xb99   :  { %3117 = vmatprep.subr.bf16.mxu0 %v3505_v34 }
 0xbfb   :  { %v2102_v61 = vpop.permute.xlu1 %2101 }
 0xbfc   :  { %v2107_v44 = vmax.f32 %v4274_v53, %v2102_v61 }
 0xbfe   :  { %2111 = vrot.lane.b32.xlu1 %v2107_v44, %s3496_s2  ;;  %v2094_v52 = vpop.permute.xlu0 %2093 }
 0xbff   :  { %v4287_v43 = vsel %vm168_vm12, -9e+15, %v2094_v52 }
 0xc00   :  { %2103 = vrot.lane.b32.xlu0 %v4287_v43, %s3496_s2 }
 0xc02   :  { %3282 = vrot.lane.b32.xlu1 %v3281_v49, %s3507_s14  ;;  %v2026_v28 = vpop.permute.xlu0 %2025 }
 0xc03   :  { %v2030_v36 = vadd.f32 %v2026_v28, %v3618_v16  ;;  %v2072_v45 = vpop.permute.xlu1 %2071 }
 0xc04   :  { %v2077_v21 = vsel %vm167_vm11, -9e+15, %v2072_v45  ;;  %vm4690_vm11 = vcmp.lt.s32.totalorder %v3588_v5, 1 }
 0xc05   :  { %vm2032_vm1 = vcmp.gt.f32.partialorder %v2030_v36, 0.0  ;;  %v2034_v41 = vmul.f32 0.2, %v2030_v36 }
 0xc06   :  { %v2084_v8 = vpop.permute.xlu0 %2083 }
 0xc07   :  { %v2036_v22 = vsel %vm2032_vm1, %v2030_v36, %v2034_v41  ;;  %v4316_v54 = vsel %vm168_vm12, -9e+15, %v2084_v8  ;;  %vm4693_vm1 = vmmov %vm4692_vm14 }
 0xc08   :  { %2073 = vrot.lane.b32.xlu0 %v2036_v22, %s3520_s29 }
 0xc5b   :  { %v1699_v27 = vpop.f32.mrb[16].mxu1 }
 0xc5c   :  { %v3115_v6 = vpop.f32.mrb[17].mxu1  ;;  %v4329_v51 = vadd.f32 %v2842_v57, %v1699_v27 }
 0xc5d   :  { %v1702_v62 = vpop.f32.mrb[18].mxu1 }
 0xc5e   :  { %v3116_v56 = vpop.f32.mrb[19].mxu1  ;;  %v4327_v55 = vadd.f32 %v2842_v57, %v1702_v62  ;;  %v1706_v49 = vmax.f32 %v4329_v51, 0.0 }
 0xc60   :  { %v1707_v52 = vmax.f32 %v4327_v55, 0.0 }
 0xc62   :  { %v1715_v50 = vsel %vm410_vm0, %v1707_v52, 0.0 }
 0xc63   :  { %v1716_v28 = vrot.slane %v1715_v50, 4 }
 0xc65   :  { %v1717_v41 = vadd.f32 %v1716_v28, %v1715_v50 }
 0xc67   :  { %v1718_v6 = vrot.slane %v1717_v41, 2 }
 0xc69   :  { %v1719_v27 = vadd.f32 %v1718_v6, %v1717_v41 }
 0xc6b   :  { %v1720_v7 = vrot.slane %v1719_v27, 1 }
 0xc6d   :  { %v1721_v8 = vadd.f32 %v1720_v7, %v1719_v27  ;;  %v1302_v7 = vsel %vm3614_vm6, 0.0, %v4197_v59 }
 0xc6f   :  { %v1723_v50 = vmul.f32 0.125, %v1721_v8 }
 0xc70   :  { %v2112_v24 = vpop.permute.xlu1 %2111 }
 0xc71   :  { %v2117_v23 = vmax.f32 %v2077_v21, %v2112_v24 }
 0xc72   :  { %v2104_v61 = vpop.permute.xlu0 %2103 }
 0xc73   :  { %v2119_v25 = vsub.f32 %v2077_v21, %v2117_v23  ;;  %2127 = vrot.lane.b32.xlu1 %v2117_v23, %s3500_s20  ;;  %v2108_v44 = vmax.f32 %v4316_v54, %v2104_v61 }
 0xc74   :  { %v3283_v20 = vpop.permute.xlu1 %3282 }
 0xc75   :  { %2113 = vrot.lane.b32.xlu0 %v2108_v44, %s3496_s2  ;;  %v3284_v41 = vunpack.i.l.bf16 %v3283_v20 }
 0xc77   :  { %2139 = vrot.lane.b32.xlu1 %v2117_v23, %s3501_s21 }
 0xc79   :  { %3287 = vrot.lane.b32.xlu0 %v4211_v35, %s3508_s0  ;;  %v1708_v35 = vsel %vm410_vm0, %v1706_v49, 0.0 }
 0xc7a   :  { %v1709_v36 = vrot.slane %v1708_v35, 4  ;;  %v2074_v46 = vpop.permute.xlu0 %2073 }
 0xc7b   :  { %v4342_v61 = vsel %vm168_vm12, -9e+15, %v2074_v46  ;;  %v2121_v46 = vmul.f32 1.442695, %v2119_v25  ;;  %vm4691_vm12 = vmmov %vm4690_vm11 }
 0xc7c   :  { %v1710_v22 = vadd.f32 %v1709_v36, %v1708_v35  ;;  %v3285_v36 = vunpack.i.h.bf16 %v3283_v20 }
 0xc7e   :  { %v1711_v62 = vrot.slane %v1710_v22, 2  ;;  %v1326_v8 = vsel %vm410_vm0, %v1302_v7, %v3285_v36 }
 0xc80   :  { %v1712_v56 = vadd.f32 %v1711_v62, %v1710_v22 }
 0xc82   :  { %v1713_v45 = vrot.slane %v1712_v56, 1 }
 0xc84   :  { %v1714_v23 = vadd.f32 %v1713_v45, %v1712_v56  ;;  %v1725_v56 = vpack.c.bf16 %v1723_v50, %v1723_v50 }
 0xc86   :  { %v1722_v6 = vmul.f32 0.125, %v1714_v23  ;;  %v3369_v23 = vld [vmem:[%s4675_s5 + $0x20] sm:$0xff]  }
 0xce5   :  { %v2128_v21 = vpop.permute.xlu1 %2127 }
 0xce6   :  { %v2133_v24 = vsub.f32 %v4274_v53, %v2128_v21  ;;  %v1724_v21 = vpack.c.bf16 %v1722_v6, %v1722_v6 }
 0xce7   :  { %v2114_v57 = vpop.permute.xlu0 %2113 }
 0xce8   :  { %v2135_v44 = vmul.f32 1.442695, %v2133_v24  ;;  %v2118_v35 = vmax.f32 %v4342_v61, %v2114_v57  ;;  %v1733_v25 = vunpack.c.l.b16 %v1724_v21 }
 0xce9   :  { %v2140_v28 = vpop.permute.xlu1 %2139 }
 0xcea   :  { %3447 = vpow2.f32 %v2135_v44  ;;  %v2145_v22 = vsub.f32 %v4259_v3, %v2140_v28  ;;  %v2120_v62 = vsub.f32 %v4342_v61, %v2118_v35  ;;  %2129 = vrot.lane.b32.xlu0 %v2118_v35, %s3500_s20  ;;  %v1325_v3 = vsel %vm410_vm0, %v1301_v58, %v3284_v41  ;;  %v3370_v44 = vld [vmem:[%s4675_s5 + $0x28] sm:$0xff]   ;;  %v2857_v41 = vld [vmem:[%s4676_s6 + $0x2] sm:$0x1] }
 0xceb   :  { %v3288_v27 = vpop.permute.xlu0 %3287  ;;  %v1734_v61 = vunpack.c.l.b16 %v1725_v56 }
 0xcec   :  { %v2147_v53 = vmul.f32 1.442695, %v2145_v22  ;;  %v3290_v20 = vunpack.i.h.bf16 %v3288_v27  ;;  %v3289_v45 = vunpack.i.l.bf16 %v3288_v27  ;;  %v1800_v22 = vsel %vm598_vm10, %v2857_v41, 0 }
 0xced   :  { %v1735_v50 = vsel %vm533_vm9, %v1734_v61, %v1733_v25  ;;  %3126 = vmatpush3.bf16.msra.mxu1 %v1800_v22 }
 0xcee   :  { %3449 = vpow2.f32 %v2147_v53  ;;  %v1327_v24 = vsel %vm413_vm7, %v1325_v3, %v3289_v45  ;;  %v1328_v47 = vsel %vm413_vm7, %v1326_v8, %v3290_v20  ;;  %2141 = vrot.lane.b32.xlu0 %v2118_v35, %s3501_s21  ;;  %v1736_v28 = vpack.c.b16 %v1735_v50, %v1735_v50  ;;  %3147 = vmatprep.subr.bf16.mxu1 %v3505_v34 }
 0xcef   :  { %v1329_v59 = vpack.c.bf16 %v1328_v47, %v1327_v24  ;;  %3451 = vpow2.f32 %v2121_v46 }
 0xcf1   :  { %3098 = vmatmul.mubr.msk.bf16.vlgmr.msra.gmra.mrb[16].mxu0 %vm459_vm8, %v1329_v59 }
 0xcf2   :  { %3118 = vmatpush3.bf16.msra.mxu0 %v3369_v23  ;;  %3121 = vmatprep.mubr.msk.bf16.mxu0 %vm3506_vm15, %v3505_v34 }
 0xcf3   :  { %3119 = vmatprep.subr.bf16.mxu0 %v3505_v34 }
 0xcf4   :  { %v3448_v57 = vpop.eup %3447 }
 0xcf5   :  { %2153 = vrot.lane.b32.xlu1 %v3448_v57, %s3496_s2 }
 0xcf6   :  { %3120 = vmatpush3.bf16.msra.mxu0 %v3370_v44 }
 0xcf7   :  { %3131 = vmatprep.subr.bf16.mxu0 %v3505_v34 }
 0xcf8   :  { %v3450_v35 = vpop.eup %3449 }
 0xcf9   :  { %2163 = vrot.lane.b32.xlu1 %v3450_v35, %s3502_s22  ;;  %3122 = vmatmul.mubr.msk.bf16.vlgmr.msra.gmra.mrb[20].mxu0 %vm410_vm0, %v1736_v28  ;;  %v3452_v36 = vpop.eup %3451 }
 0xcfa   :  { %3143 = vmatprep.mubr.msk.bf16.mxu0 %vm3506_vm15, %v3505_v34 }
 0xcfd   :  { %2175 = vperm.xlu1 %3270, %v3452_v36  }
 0xd01   :  { %3291 = vset.pattern.permute.xlu1 %v3503_v17 }
 0xd02   :  { %2188 = vperm.xlu1 %3291, %v3448_v57  }
 0xd06   :  { %3293 = vset.pattern.permute.xlu1 %v3504_v18  ;;  %v2123_v18 = vmul.f32 1.442695, %v2120_v62 }
 0xd07   :  { %2204 = vperm.xlu1 %3293, %v3450_v35  }
 0xd5c   :  { %v2130_v6 = vpop.permute.xlu0 %2129 }
 0xd5d   :  { %v2134_v58 = vsub.f32 %v4316_v54, %v2130_v6 }
 0xd5f   :  { %v2137_v53 = vmul.f32 1.442695, %v2134_v58 }
 0xd60   :  { %v2142_v27 = vpop.permute.xlu0 %2141 }
 0xd61   :  { %3453 = vpow2.f32 %v2137_v53  ;;  %v2146_v56 = vsub.f32 %v4287_v43, %v2142_v27 }
 0xd63   :  { %v2149_v7 = vmul.f32 1.442695, %v2146_v56 }
 0xd65   :  { %3455 = vpow2.f32 %v2149_v7 }
 0xd66   :  { %3457 = vpow2.f32 %v2123_v18 }
 0xd67   :  { %v2154_v20 = vpop.permute.xlu1 %2153 }
 0xd68   :  { %v2159_v3 = vadd.f32 %v3452_v36, %v2154_v20 }
 0xd6b   :  { %v3454_v45 = vpop.eup %3453  ;;  %v2164_v46 = vpop.permute.xlu1 %2163 }
 0xd6c   :  { %2155 = vrot.lane.b32.xlu0 %v3454_v45, %s3496_s2  ;;  %v2169_v21 = vadd.f32 %v2164_v46, %v2159_v3  ;;  %s3521_s2 = smov 26  }
 0xd6e   :  { %3459 = vrcp.f32 %v2169_v21 }
 0xd6f   :  { %v3456_v8 = vpop.eup %3455 }
 0xd70   :  { %2208 = vperm.xlu1 %3293, %v3456_v8   ;;  %2165 = vrot.lane.b32.xlu0 %v3456_v8, %s3502_s22  ;;  %v3458_v54 = vpop.eup %3457  ;;  %s3522_s22 = smov 58  }
 0xd74   :  { %2180 = vperm.xlu0 %3269, %v3458_v54   ;;  %3295 = vset.pattern.permute.xlu1 %v3495_v2 }
 0xd78   :  { %3292 = vset.pattern.permute.xlu0 %v3503_v17  ;;  %v3460_v43 = vpop.eup %3459 }
 0xd79   :  { %2192 = vperm.xlu0 %3292, %v3454_v45  }
 0xd7c   :  { %v2176_v36 = vpop.permute.xlu1 %2175 }
 0xd7d   :  { %3294 = vset.pattern.permute.xlu0 %v3495_v2  ;;  %v2183_v56 = vmul.f32 %v2176_v36, %v3648_v31  ;;  %v2184_v7 = vmul.f32 %v2176_v36, %v3674_v39 }
 0xd7e   :  { %2221 = vperm.xlu0 %3294, %v3460_v43  }
 0xd81   :  { %v2189_v22 = vpop.permute.xlu1 %2188 }
 0xd82   :  { %v2195_v53 = vmul.f32 %v2189_v22, %v3592_v9  ;;  %v2196_v27 = vmul.f32 %v2189_v22, %v3596_v10  ;;  %v3371_v22 = vld [vmem:[%s4673_s3 + $0x90] sm:$0xff]  }
 0xd84   :  { %v2199_v9 = vadd.f32 %v2195_v53, %v2183_v56  ;;  %v3374_v56 = vld [vmem:[%s4677_s7 + $0x68] sm:$0xff]  }
 0xd86   :  { %v2205_v58 = vpop.permute.xlu1 %2204 }
 0xd87   :  { %v2211_v18 = vmul.f32 %v2205_v58, %v3640_v29  ;;  %v2212_v20 = vmul.f32 %v2205_v58, %v3666_v37 }
 0xd89   :  { %v2215_v31 = vadd.f32 %v2211_v18, %v2199_v9  ;;  %v3377_v9 = vld [vmem:[%s4673_s3 + $0xa8] sm:$0xff]  }
 0xdc4   :  { %v4390_v62 = vpop.f32.mrb[16].mxu0 }
 0xdc5   :  { %v3099_v24 = vpop.f32.mrb[17].mxu0 }
 0xdc6   :  { %v4392_v47 = vpop.f32.mrb[18].mxu0 }
 0xdc7   :  { %v3100_v23 = vpop.f32.mrb[19].mxu0 }
 0xdcc   :  { %v1786_v59 = vpop.f32.mrb[20].mxu0 }
 0xdcd   :  { %v1792_v61 = vmax.f32 %v1786_v59, 0.0  ;;  %v3123_v25 = vpop.f32.mrb[21].mxu0 }
 0xdce   :  { %v1789_v44 = vpop.f32.mrb[22].mxu0 }
 0xdcf   :  { %v1793_v57 = vpack.c.bf16 %v1792_v61, %v1792_v61  ;;  %v3124_v50 = vpop.f32.mrb[23].mxu0 }
 0xdd1   :  { %3128 = vmatmul.mubr.msk.bf16.vlgmr.msra.gmra.mrb[20].mxu1 %vm594_vm13, %v1793_v57 }
 0xdd2   :  { %3159 = vmatprep.mubr.msk.bf16.mxu1 %vm3506_vm15, %v3505_v34  ;;  %3148 = vmatpush3.bf16.msra.mxu1 %v3371_v22 }
 0xdd3   :  { %3149 = vmatprep.subr.bf16.mxu1 %v3505_v34 }
 0xdde   :  { %v2156_v17 = vpop.permute.xlu0 %2155 }
 0xddf   :  { %v2160_v2 = vadd.f32 %v3458_v54, %v2156_v17  ;;  %v2200_v54 = vadd.f32 %v2196_v27, %v2184_v7  ;;  %v3373_v27 = vld [vmem:[%s4673_s3 + $0x98] sm:$0xff]  }
 0xde0   :  { %3150 = vmatpush3.bf16.msra.mxu1 %v3373_v27 }
 0xde1   :  { %v2216_v24 = vadd.f32 %v2212_v20, %v2200_v54  ;;  %3151 = vmatprep.subr.bf16.mxu1 %v3505_v34  ;;  %v3378_v54 = vld [vmem:[%s4677_s7 + $0x78] sm:$0xff]  }
 0xde2   :  { %v2166_v35 = vpop.permute.xlu0 %2165 }
 0xde3   :  { %v2170_v28 = vadd.f32 %v2166_v35, %v2160_v2 }
 0xde5   :  { %3461 = vrcp.f32 %v2170_v28 }
 0xdef   :  { %v3462_v41 = vpop.eup %3461 }
 0xdf0   :  { %2226 = vperm.xlu1 %3295, %v3462_v41  }
 0xdf3   :  { %v2181_v6 = vpop.permute.xlu0 %2180 }
 0xdf4   :  { %v2185_v46 = vmul.f32 %v2181_v6, %v3652_v32  ;;  %v2186_v3 = vmul.f32 %v2181_v6, %v3678_v40  ;;  %v2209_v32 = vpop.permute.xlu1 %2208  ;;  %v3372_v6 = vld [vmem:[%s4677_s7 + $0x60] sm:$0xff]  }
 0xdf5   :  { %v2213_v37 = vmul.f32 %v2209_v32, %v3644_v30  ;;  %3132 = vmatpush3.bf16.msra.mxu0 %v3372_v6 }
 0xdf6   :  { %3133 = vmatprep.subr.bf16.mxu0 %v3505_v34 }
 0xdf8   :  { %v2193_v45 = vpop.permute.xlu0 %2192 }
 0xdf9   :  { %v2197_v8 = vmul.f32 %v2193_v45, %v3600_v11  ;;  %v2198_v21 = vmul.f32 %v2193_v45, %v3618_v16  ;;  %v2214_v11 = vmul.f32 %v2209_v32, %v3670_v38  ;;  %3134 = vmatpush3.bf16.msra.mxu0 %v3374_v56  ;;  %v3382_v32 = vld [vmem:[%s4677_s7 + $0x88] sm:$0xff]  }
 0xdfa   :  { %3135 = vmatprep.subr.bf16.mxu0 %v3505_v34 }
 0xdfb   :  { %v2201_v10 = vadd.f32 %v2197_v8, %v2185_v46  ;;  %v2202_v43 = vadd.f32 %v2198_v21, %v2186_v3  ;;  %v3375_v46 = vld [vmem:[%s4673_s3 + $0xa0] sm:$0xff]   ;;  %v3376_v3 = vld [vmem:[%s4677_s7 + $0x70] sm:$0xff]  }
 0xdfc   :  { %3152 = vmatpush3.bf16.msra.mxu1 %v3375_v46 }
 0xdfd   :  { %v2222_v39 = vpop.permute.xlu0 %2221  ;;  %v2217_v40 = vadd.f32 %v2213_v37, %v2201_v10  ;;  %v2218_v16 = vadd.f32 %v2214_v11, %v2202_v43  ;;  %3136 = vmatpush3.bf16.msra.mxu0 %v3376_v3  ;;  %3153 = vmatprep.subr.bf16.mxu1 %v3505_v34  ;;  %v3379_v10 = vld [vmem:[%s4673_s3 + $0xb0] sm:$0xff]  }
 0xdfe   :  { %v2229_v23 = vmul.f32 %v2222_v39, %v2215_v31  ;;  %v2230_v29 = vmul.f32 %v2222_v39, %v2216_v24  ;;  %3137 = vmatprep.subr.bf16.mxu0 %v3505_v34  ;;  %v3380_v24 = vld [vmem:[%s4677_s7 + $0x80] sm:$0xff]   ;;  %v3381_v39 = vld [vmem:[%s4673_s3 + $0xb8] sm:$0xff]   ;;  %s3523_s3 = smov [#allocation2]  }
 0xdff   :  { %s2741_s13 = sshll.u32 %s3523_s3, 4  ;;  %s2742_s13 = int_to_ptr.vmem [resolvable:$true] %s2741_s13 }
 0xe00   :  { %v3296_v59 = vpack.i.bf16 %v2230_v29, %v2229_v23  ;;  %2254 = vrot.lane.b32.xlu0 %v2230_v29, %s3521_s2  ;;  %2252 = vrot.lane.b32.xlu1 %v2229_v23, %s3521_s2  ;;  %p3476_p1 = scmp.lt.s32.totalorder %s2742_s13, %s2742_s13 }
 0xe01   :  { %3154 = vmatpush3.bf16.msra.mxu1 %v3377_v9  ;;  %3138 = vmatpush3.bf16.msra.mxu0 %v3378_v54 }
 0xe02   :  { %3155 = vmatprep.subr.bf16.mxu1 %v3505_v34  ;;  %3139 = vmatprep.subr.bf16.mxu0 %v3505_v34 }
 0xe05   :  { %3156 = vmatpush3.bf16.msra.mxu1 %v3379_v10  ;;  %3140 = vmatpush3.bf16.msra.mxu0 %v3380_v24 }
 0xe06   :  { %3157 = vmatprep.subr.bf16.mxu1 %v3505_v34  ;;  %3141 = vmatprep.subr.bf16.mxu0 %v3505_v34 }
 0xe09   :  { %3158 = vmatpush3.bf16.msra.mxu1 %v3381_v39  ;;  %3142 = vmatpush3.bf16.msra.mxu0 %v3382_v32 }
 0xe0a   :  { %3171 = vmatprep.subr.bf16.mxu1 %v3505_v34  ;;  %3163 = vmatprep.subr.bf16.mxu0 %v3505_v34 }
 0xe6f   :  { %v2227_v61 = vpop.permute.xlu1 %2226 }
 0xe70   :  { %v2231_v25 = vmul.f32 %v2227_v61, %v2217_v40  ;;  %v2232_v44 = vmul.f32 %v2227_v61, %v2218_v16 }
 0xe72   :  { %v3301_v57 = vpack.i.bf16 %v2232_v44, %v2231_v25  ;;  %2258 = vrot.lane.b32.xlu0 %v2232_v44, %s3521_s2  ;;  %2256 = vrot.lane.b32.xlu1 %v2231_v25, %s3521_s2  ;;  %v2255_v43 = vpop.permute.xlu0 %2254 }
 0xe73   :  { %v2253_v31 = vpop.permute.xlu1 %2252 }
 0xe74   :  { %v4469_v23 = vsel %vm2260_vm2, %v2253_v31, %v2255_v43 }
 0xe75   :  { %v2271_v40 = vrot.slane %v4469_v23, 1  ;;  %v2265_v56 = vrot.slane %v4469_v23, 7 }
 0xe76   :  { %3302 = vrot.lane.b32.xlu0 %v3301_v57, %s3522_s22  ;;  %3297 = vrot.lane.b32.xlu1 %v3296_v59, %s3522_s22 }
 0xea4   :  { %v1836_v50 = vpop.f32.mrb[20].mxu1 }
 0xea5   :  { %v2859_v17 = vmul.f32 -1.442695, %v1836_v50  ;;  %v3129_v2 = vpop.f32.mrb[21].mxu1 }
 0xea6   :  { %v1839_v35 = vpop.f32.mrb[22].mxu1 }
 0xea7   :  { %3463 = vpow2.f32 %v2859_v17  ;;  %v3130_v28 = vpop.f32.mrb[23].mxu1 }
 0xeb1   :  { %v3464_v30 = vpop.eup %3463 }
 0xeb2   :  { %v1845_v36 = vadd.f32 1.0, %v3464_v30 }
 0xeb4   :  { %3465 = vrcp.f32 %v1845_v36 }
 0xebe   :  { %v3466_v38 = vpop.eup %3465 }
 0xebf   :  { %v1855_v41 = vrot.slane %v3466_v38, %v3944_v33 }
 0xec1   :  { %v1856_v58 = vcombine.high %v1855_v41, %v1855_v41  ;;  %v1863_v53 = vrot.slane %v1855_v41, %v3944_v33 }
 0xec3   :  { %v1870_v7 = vrot.slane %v1856_v58, %v3944_v33  ;;  %v1874_v18 = vrot.slane %v1863_v53, %v3948_v42 }
 0xec5   :  { %v1878_v20 = vrot.slane %v1870_v7, %v3948_v42  ;;  %v1881_v45 = vmul.f32 %v1874_v18, %v1706_v49 }
 0xec7   :  { %v1882_v8 = vmul.f32 %v1878_v20, %v1707_v52  ;;  %v1898_v51 = vrot.slane %v1881_v45, 7  ;;  %v1904_v61 = vrot.slane %v1881_v45, 1 }
 0xec9   :  { %v3311_v21 = vpack.i.bf16 %v1882_v8, %v1881_v45  ;;  %v1899_v49 = vrot.slane %v1882_v8, 7  ;;  %v1905_v11 = vrot.slane %v1882_v8, 1 }
 0xecb   :  { %3312 = vrot.lane.b32.xlu0 %v3311_v21, %s3507_s14  ;;  %v4449_v55 = vsel %vm4690_vm11, %v1898_v51, %v1899_v49  ;;  %v4453_v52 = vsel %vm4691_vm12, %v1899_v49, %v1898_v51  ;;  %vm4694_vm11 = vmmov %vm4693_vm1 }
 0xecc   :  { %v1906_v57 = vsel %vm4694_vm11, %v1904_v61, %v1905_v11  ;;  %vm4695_vm12 = vmmov %vm4693_vm1  ;;  %v1903_v32 = vsel %vm3614_vm6, 0.0, %v4449_v55  ;;  %v3383_v55 = vld [vmem:[%s4675_s5 + $0x30] sm:$0xff]  }
 0xecd   :  { %v1907_v50 = vsel %vm4695_vm12, %v1905_v11, %v1904_v61  ;;  %v1908_v28 = vsel %vm3602_vm3, 0.0, %v1906_v57  ;;  %v3384_v57 = vld [vmem:[%s4675_s5 + $0x38] sm:$0xff]  }
 0xece   :  { %v1909_v30 = vsel %vm3606_vm4, 0.0, %v1907_v50  ;;  %v2909_v50 = vld [vmem:[%s4676_s6 + $0x3] sm:$0x1] }
 0xecf   :  { %v3316_v36 = vpack.i.bf16 %v1909_v30, %v1908_v28 }
 0xee4   :  { %v2259_v29 = vpop.permute.xlu0 %2258  ;;  %v2257_v59 = vpop.permute.xlu1 %2256 }
 0xee5   :  { %v4476_v37 = vsel %vm2260_vm2, %v2257_v59, %v2259_v29  ;;  %vm2285_vm2 = vcmask 474112   ;;  %v1902_v59 = vsel %vm3610_vm5, 0.0, %v4453_v52 }
 0xee6   :  { %v2272_v16 = vrot.slane %v4476_v37, 1  ;;  %v2266_v22 = vrot.slane %v4476_v37, 7 }
 0xee8   :  { %v2273_v25 = vsel %vm4692_vm14, %v2271_v40, %v2272_v16  ;;  %v2274_v44 = vsel %vm4693_vm1, %v2272_v16, %v2271_v40  ;;  %v3303_v38 = vpop.permute.xlu0 %3302  ;;  %v3298_v41 = vpop.permute.xlu1 %3297  ;;  %vm4696_vm14 = vcmp.lt.s32.totalorder %v3588_v5, 1 }
 0xee9   :  { %v2275_v17 = vsel %vm3602_vm3, 0.0, %v2273_v25  ;;  %v2276_v2 = vsel %vm3606_vm4, 0.0, %v2274_v44  ;;  %v3305_v6 = vunpack.i.h.bf16 %v3303_v38  ;;  %v3304_v58 = vunpack.i.l.bf16 %v3303_v38  ;;  %vm4697_vm1 = vmmov %vm4696_vm14 }
 0xeea   :  { %v3306_v35 = vpack.i.bf16 %v2276_v2, %v2275_v17  ;;  %v3300_v53 = vunpack.i.h.bf16 %v3298_v41  ;;  %v3299_v27 = vunpack.i.l.bf16 %v3298_v41  ;;  %v2267_v7 = vsel %vm4696_vm14, %v2265_v56, %v2266_v22  ;;  %v2894_v2 = vld [vmem:[%s4674_s4 + $0x3] ss:$0 sm:$0xff] }
 0xeeb   :  { %v2268_v18 = vsel %vm4697_vm1, %v2266_v22, %v2265_v56  ;;  %v2287_v20 = vsel %vm2285_vm2, %v3304_v58, %v3305_v6  ;;  %v2270_v21 = vsel %vm3614_vm6, 0.0, %v2267_v7  ;;  %v2483_v17 = vsel %vm598_vm10, %v2909_v50, 0  ;;  %v3386_v50 = vld [vmem:[%s4677_s7 + $0x98] sm:$0xff]   ;;  %vm4700_vm10 = vmmov %vm4697_vm1 }
 0xeec   :  { %3307 = vrot.lane.b32.xlu1 %v3306_v35, %s3508_s0  ;;  %v2286_v45 = vsel %vm2285_vm2, %v3299_v27, %v3300_v53  ;;  %v2269_v8 = vsel %vm3610_vm5, 0.0, %v2268_v18  ;;  %v2299_v10 = vsel %vm410_vm0, %v2270_v21, %v2287_v20 }
 0xeed   :  { %v2298_v43 = vsel %vm410_vm0, %v2269_v8, %v2286_v45 }
 0xef0   :  { %3317 = vrot.lane.b32.xlu1 %v3316_v36, %s3508_s0 }
 0xf3d   :  { %v3313_v46 = vpop.permute.xlu0 %3312 }
 0xf3e   :  { %v3315_v9 = vunpack.i.h.bf16 %v3313_v46  ;;  %v3314_v54 = vunpack.i.l.bf16 %v3313_v46 }
 0xf40   :  { %v1926_v16 = vsel %vm410_vm0, %v1902_v59, %v3314_v54  ;;  %v1927_v61 = vsel %vm410_vm0, %v1903_v32, %v3315_v9 }
 0xf5e   :  { %v3308_v3 = vpop.permute.xlu1 %3307 }
 0xf5f   :  { %v3310_v51 = vunpack.i.h.bf16 %v3308_v3  ;;  %v3309_v49 = vunpack.i.l.bf16 %v3308_v3 }
 0xf61   :  { %v2301_v31 = vsel %vm413_vm7, %v2299_v10, %v3310_v51  ;;  %v2300_v24 = vsel %vm413_vm7, %v2298_v43, %v3309_v49 }
 0xf62   :  { %v2302_v39 = vpack.c.bf16 %v2301_v31, %v2300_v24  ;;  %v3318_v29 = vpop.permute.xlu1 %3317 }
 0xf63   :  { %v3320_v11 = vunpack.i.h.bf16 %v3318_v29  ;;  %v3319_v40 = vunpack.i.l.bf16 %v3318_v29 }
 0xf64   :  { %3160 = vmatmul.mubr.msk.bf16.vlgmr.msra.gmra.mrb[24].mxu1 %vm459_vm8, %v2302_v39 }
 0xf65   :  { %v1928_v25 = vsel %vm413_vm7, %v1926_v16, %v3319_v40  ;;  %v1929_v44 = vsel %vm413_vm7, %v1927_v61, %v3320_v11  ;;  %3173 = vmatprep.mubr.msk.bf16.mxu1 %vm3506_vm15, %v3505_v34  ;;  %3172 = vmatpush3.bf16.msra.mxu1 %v2483_v17  ;;  %v3387_v17 = vld [vmem:[%s4677_s7 + $0xa0] sm:$0xff]  }
 0xf66   :  { %v1930_v52 = vpack.c.bf16 %v1929_v44, %v1928_v25 }
 0xf68   :  { %3144 = vmatmul.mubr.msk.bf16.vlgmr.msra.gmra.mrb[24].mxu0 %vm459_vm8, %v1930_v52 }
 0xf69   :  { %3167 = vmatprep.mubr.msk.bf16.mxu0 %vm3506_vm15, %v3505_v34  ;;  %3164 = vmatpush3.bf16.msra.mxu0 %v3383_v55 }
 0xf6a   :  { %3165 = vmatprep.subr.bf16.mxu0 %v3505_v34 }
 0xf6d   :  { %3166 = vmatpush3.bf16.msra.mxu0 %v3384_v57  ;;  %v3385_v57 = vld [vmem:[%s4677_s7 + $0x90] sm:$0xff]  }
 0xf6e   :  { %3177 = vmatprep.subr.bf16.mxu0 %v3505_v34 }
0x1037   :  { %v2382_v35 = vpop.f32.mrb[24].mxu1 }
0x1038   :  { %v4544_v28 = vadd.f32 %v2894_v2, %v2382_v35  ;;  %v3161_v30 = vpop.f32.mrb[25].mxu1 }
0x1039   :  { %v2385_v36 = vpop.f32.mrb[26].mxu1 }
0x103a   :  { %v2389_v38 = vmax.f32 %v4544_v28, 0.0  ;;  %v4547_v41 = vadd.f32 %v2894_v2, %v2385_v36  ;;  %v3162_v22 = vpop.f32.mrb[27].mxu1  ;;  %v3388_v2 = vld [vmem:[%s4677_s7 + $0xa8] sm:$0xff]  }
0x103b   :  { %v4549_v6 = vpop.f32.mrb[24].mxu0 }
0x103c   :  { %v2391_v58 = vsel %vm410_vm0, %v2389_v38, 0.0  ;;  %v2390_v53 = vmax.f32 %v4547_v41, 0.0  ;;  %v3145_v27 = vpop.f32.mrb[25].mxu0 }
0x103d   :  { %v2392_v56 = vrot.slane %v2391_v58, 4  ;;  %v4555_v7 = vpop.f32.mrb[26].mxu0 }
0x103e   :  { %v2398_v18 = vsel %vm410_vm0, %v2390_v53, 0.0  ;;  %v3146_v20 = vpop.f32.mrb[27].mxu0 }
0x103f   :  { %v2393_v45 = vadd.f32 %v2392_v56, %v2391_v58  ;;  %v2399_v46 = vrot.slane %v2398_v18, 4  ;;  %v3389_v20 = vld [vmem:[%s4677_s7 + $0xb0] sm:$0xff]  }
0x1041   :  { %v2394_v3 = vrot.slane %v2393_v45, 2  ;;  %v2400_v8 = vadd.f32 %v2399_v46, %v2398_v18  ;;  %v2821_v46 = vld [vmem:[%s4678_s8 + $0x1] ss:$0 sm:$0xff] }
0x1043   :  { %v2395_v21 = vadd.f32 %v2394_v3, %v2393_v45  ;;  %v2401_v51 = vrot.slane %v2400_v8, 2 }
0x1045   :  { %v2396_v49 = vrot.slane %v2395_v21, 1  ;;  %v2402_v9 = vadd.f32 %v2401_v51, %v2400_v8 }
0x1047   :  { %v2397_v54 = vadd.f32 %v2396_v49, %v2395_v21  ;;  %v2403_v10 = vrot.slane %v2402_v9, 1  ;;  %v3390_v21 = vld [vmem:[%s4677_s7 + $0xb8] sm:$0xff]  }
0x1049   :  { %v2405_v43 = vmul.f32 0.125, %v2397_v54  ;;  %v2404_v31 = vadd.f32 %v2403_v10, %v2402_v9  ;;  %v1410_v9 = vadd.f32 %v2821_v46, %v4390_v62  ;;  %v2873_v54 = vld [vmem:[%s4678_s8 + $0x2] ss:$0 sm:$0xff] }
0x104b   :  { %v2407_v24 = vpack.c.bf16 %v2405_v43, %v2405_v43  ;;  %v2406_v39 = vmul.f32 0.125, %v2404_v31  ;;  %v1416_v31 = vadd.f32 %v1410_v9, %v3979_v63 }
0x104d   :  { %v2408_v29 = vpack.c.bf16 %v2406_v39, %v2406_v39  ;;  %v2416_v59 = vunpack.c.l.b16 %v2407_v24  ;;  %v2011_v24 = vadd.f32 %v2873_v54, %v4549_v6 }
0x104f   :  { %v2417_v32 = vunpack.c.l.b16 %v2408_v29 }
0x1051   :  { %v2418_v11 = vsel %vm533_vm9, %v2417_v32, %v2416_v59  ;;  %vm4699_vm9 = vmmov %vm4694_vm11 }
0x1052   :  { %v2419_v40 = vpack.c.b16 %v2418_v11, %v2418_v11  ;;  %v2017_v11 = vadd.f32 %v2011_v24, %v4216_v26 }
0x1054   :  { %3168 = vmatmul.mubr.msk.bf16.vlgmr.msra.gmra.mrb[28].mxu0 %vm410_vm0, %v2419_v40  ;;  %v2014_v40 = vadd.f32 %v2873_v54, %v4555_v7 }
0x1055   :  { %3189 = vmatprep.mubr.msk.bf16.mxu0 %vm3506_vm15, %v3505_v34  ;;  %3178 = vmatpush3.bf16.msra.mxu0 %v3385_v57  ;;  %vm4698_vm15 = vmmov %vm4694_vm11 }
0x1056   :  { %3179 = vmatprep.subr.bf16.mxu0 %v3505_v34 }
0x1059   :  { %3180 = vmatpush3.bf16.msra.mxu0 %v3386_v50 }
0x105a   :  { %3181 = vmatprep.subr.bf16.mxu0 %v3505_v34 }
0x105d   :  { %3182 = vmatpush3.bf16.msra.mxu0 %v3387_v17 }
0x105e   :  { %3183 = vmatprep.subr.bf16.mxu0 %v3505_v34 }
0x1061   :  { %3184 = vmatpush3.bf16.msra.mxu0 %v3388_v2 }
0x1062   :  { %3185 = vmatprep.subr.bf16.mxu0 %v3505_v34 }
0x1065   :  { %3186 = vmatpush3.bf16.msra.mxu0 %v3389_v20 }
0x1066   :  { %3187 = vmatprep.subr.bf16.mxu0 %v3505_v34 }
0x1069   :  { %3188 = vmatpush3.bf16.msra.mxu0 %v3390_v21 }
0x1127   :  { %v2469_v16 = vpop.f32.mrb[28].mxu0 }
0x1128   :  { %v2475_v61 = vmax.f32 %v2469_v16, 0.0  ;;  %v3169_v25 = vpop.f32.mrb[29].mxu0 }
0x1129   :  { %v2472_v44 = vpop.f32.mrb[30].mxu0  ;;  %v2018_v25 = vadd.f32 %v2014_v40, %v4219_v1 }
0x112a   :  { %v2476_v52 = vpack.c.bf16 %v2475_v61, %v2475_v61  ;;  %v3170_v55 = vpop.f32.mrb[31].mxu0  ;;  %v2019_v61 = vmax.f32 %v2017_v11, 0.0 }
0x112b   :  { %v2020_v12 = vmax.f32 %v2018_v25, 0.0 }
0x112c   :  { %3174 = vmatmul.mubr.msk.bf16.vlgmr.msra.gmra.mrb[28].mxu1 %vm594_vm13, %v2476_v52  ;;  %vm4701_vm13 = vmmov %vm4697_vm1 }
0x11ff   :  { %v2519_v35 = vpop.f32.mrb[28].mxu1 }
0x1200   :  { %v2911_v30 = vmul.f32 -1.442695, %v2519_v35  ;;  %v3175_v36 = vpop.f32.mrb[29].mxu1 }
0x1201   :  { %v2522_v22 = vpop.f32.mrb[30].mxu1 }
0x1202   :  { %3467 = vpow2.f32 %v2911_v30  ;;  %v3176_v58 = vpop.f32.mrb[31].mxu1 }
0x120c   :  { %v3468_v27 = vpop.eup %3467 }
0x120d   :  { %v2528_v56 = vadd.f32 1.0, %v3468_v27 }
0x120f   :  { %3469 = vrcp.f32 %v2528_v56 }
0x1219   :  { %v3470_v18 = vpop.eup %3469 }
0x121a   :  { %v2538_v45 = vrot.slane %v3470_v18, %v3944_v33 }
0x121c   :  { %v2539_v3 = vcombine.high %v2538_v45, %v2538_v45  ;;  %v2546_v8 = vrot.slane %v2538_v45, %v3944_v33 }
0x121e   :  { %v2553_v51 = vrot.slane %v2539_v3, %v3944_v33  ;;  %v2557_v49 = vrot.slane %v2546_v8, %v3948_v42  ;;  %v1413_v33 = vadd.f32 %v2821_v46, %v4392_v47  ;;  %v2769_v46 = vld [vmem:[%s4678_s8] ss:$0 sm:$0xff]  ;;  %s3471_s8 = scalar_lea.vmem %s2742_s13, 256 }
0x121f   :  { %v809_v3 = vadd.f32 %v2769_v46, %v4141_v4  ;;  %v812_v21 = vadd.f32 %v2769_v46, %v4143_v0  ;;  %p3472_p0 = scmp.ne.s32.totalorder %s2742_s13, %s3471_s8  ;;  %p3477_p2 = scmp.lt.s32.totalorder %s3471_s8, %s3471_s8 }
0x1220   :  { %v2561_v10 = vrot.slane %v2553_v51, %v3948_v42  ;;  %v2564_v34 = vmul.f32 %v2557_v49, %v2389_v38  ;;  %v1418_v38 = vmax.f32 %v1416_v31, 0.0 }
0x1221   :  { %v815_v51 = vadd.f32 %v809_v3, %v3784_v60  ;;  %v816_v49 = vadd.f32 %v812_v21, %v3791_v19  ;;  %p3478_p3 = por %p3477_p2, %p3476_p1 }
0x1222   :  { %v2565_v43 = vmul.f32 %v2561_v10, %v2390_v53  ;;  %v2587_v62 = vrot.slane %v2564_v34, 1  ;;  %v2581_v59 = vrot.slane %v2564_v34, 7  ;;  %v1417_v53 = vadd.f32 %v1413_v33, %v3982_v48 }
0x1223   :  { %v817_v9 = vmax.f32 %v815_v51, 0.0  ;;  %v818_v10 = vmax.f32 %v816_v49, 0.0  ;;  %p3479_p4 = pnand %p3478_p3, %p3472_p0 }
0x1224   :  { %v3321_v39 = vpack.i.bf16 %v2565_v43, %v2564_v34  ;;  %v2588_v29 = vrot.slane %v2565_v43, 1  ;;  %v2582_v32 = vrot.slane %v2565_v43, 7  ;;  %v1419_v5 = vmax.f32 %v1417_v53, 0.0 }
0x1226   :  { %3322 = vrot.lane.b32.xlu0 %v3321_v39, %s3507_s14  ;;  %v2589_v42 = vsel %vm4698_vm15, %v2587_v62, %v2588_v29  ;;  %v2590_v28 = vsel %vm4699_vm9, %v2588_v29, %v2587_v62  ;;  %v2583_v63 = vsel %vm4700_vm10, %v2581_v59, %v2582_v32  ;;  %v2584_v47 = vsel %vm4701_vm13, %v2582_v32, %v2581_v59 }
0x1227   :  { %v2591_v41 = vsel %vm3602_vm3, 0.0, %v2589_v42  ;;  %v2592_v6 = vsel %vm3606_vm4, 0.0, %v2590_v28  ;;  %v2585_v44 = vsel %vm3610_vm5, 0.0, %v2584_v47  ;;  %v2586_v52 = vsel %vm3614_vm6, 0.0, %v2583_v63 }
0x1228   :  { %v3326_v16 = vpack.i.bf16 %v2592_v6, %v2591_v41 }
0x122a   :  { %2706 = vrot.lane.b32.xlu0 %v1418_v38, %s3507_s14  ;;  %3327 = vrot.lane.b32.xlu1 %v3326_v16, %s3508_s0 }
0x122e   :  { %2714 = vrot.lane.b32.xlu0 %v2019_v61, %s3508_s0  ;;  %2708 = vrot.lane.b32.xlu1 %v1419_v5, %s3507_s14 }
0x1232   :  { %2716 = vrot.lane.b32.xlu1 %v2020_v12, %s3508_s0 }
0x1298   :  { %v3323_v13 = vpop.permute.xlu0 %3322 }
0x1299   :  { %v3325_v48 = vunpack.i.h.bf16 %v3323_v13  ;;  %v3324_v26 = vunpack.i.l.bf16 %v3323_v13 }
0x129b   :  { %v2609_v1 = vsel %vm410_vm0, %v2585_v44, %v3324_v26  ;;  %v2610_v50 = vsel %vm410_vm0, %v2586_v52, %v3325_v48 }
0x129c   :  { %v3328_v7 = vpop.permute.xlu1 %3327  ;;  %v2707_v8 = vpop.permute.xlu0 %2706 }
0x129d   :  { %v3330_v55 = vunpack.i.h.bf16 %v3328_v7  ;;  %v3329_v57 = vunpack.i.l.bf16 %v3328_v7  ;;  %v2728_v34 = vsel %vm410_vm0, %v817_v9, %v2707_v8 }
0x129f   :  { %v2611_v17 = vsel %vm413_vm7, %v2609_v1, %v3329_v57  ;;  %v2612_v2 = vsel %vm413_vm7, %v2610_v50, %v3330_v55 }
0x12a0   :  { %v2613_v35 = vpack.c.bf16 %v2612_v2, %v2611_v17 }
0x12a2   :  { %3190 = vmatmul.mubr.msk.bf16.vlgmr.msra.gmra.mrb[32].mxu0 %vm459_vm8, %v2613_v35 }
0x1375   :  { %v2693_v30 = vpop.f32.mrb[32].mxu0 }
0x1376   :  { %v2694_v15 = vadd.f32 %v2925_v14, %v2693_v30  ;;  %v3191_v36 = vpop.f32.mrb[33].mxu0 }
0x1377   :  { %v2696_v22 = vpop.f32.mrb[34].mxu0 }
0x1378   :  { %v2700_v58 = vadd.f32 %v2694_v15, %v4469_v23  ;;  %v2697_v27 = vadd.f32 %v2925_v14, %v2696_v22  ;;  %v3192_v56 = vpop.f32.mrb[35].mxu0  ;;  %v2709_v23 = vpop.permute.xlu1 %2708 }
0x1379   :  { %v2729_v4 = vsel %vm410_vm0, %v818_v10, %v2709_v23 }
0x137a   :  { %v2702_v18 = vmax.f32 %v2700_v58, 0.0  ;;  %v2701_v20 = vadd.f32 %v2697_v27, %v4476_v37  ;;  %v2715_v37 = vpop.permute.xlu0 %2714 }
0x137b   :  { %v2730_v43 = vsel %vm413_vm7, %v2728_v34, %v2715_v37 }
0x137c   :  { %v2703_v45 = vmax.f32 %v2701_v20, 0.0  ;;  %2722 = vrot.lane.b32.xlu0 %v2702_v18, %s3499_s1  ;;  %v2717_v54 = vpop.permute.xlu1 %2716 }
0x137d   :  { %v2731_v60 = vsel %vm413_vm7, %v2729_v4, %v2717_v54 }
0x137e   :  { %2724 = vrot.lane.b32.xlu1 %v2703_v45, %s3499_s1 }
0x13ee   :  { %v2723_v31 = vpop.permute.xlu0 %2722 }
0x13ef   :  { %v2732_v0 = vsel %vm459_vm8, %v2730_v43, %v2723_v31 }
0x13f0   :  { %2734 = vst [vmem:[#allocation2] sm:$0xff] %v2732_v0  ;;  %v2725_v19 = vpop.permute.xlu1 %2724 }
0x13f1   :  { %v2733_v33 = vsel %vm459_vm8, %v2731_v60, %v2725_v19 }
0x13f2   :  { %2735 = vst [vmem:[#allocation2 + $0x8] sm:$0xff] %v2733_v33 }
0x13f3   :  { %3482 = shalt.err (!%p3479_p4)
}
0x13f4   :  { %s3483_s16 = scalar_lea.hbm %s4679_s9, 256 }
0x13f5   :  { %p3484_p5 = scmp.ne.s32.totalorder %s4679_s9, %s3483_s16  ;;  %p3487_p6 = scmp.lt.u32.totalorder %s3483_s16, %s4679_s9 }
0x13f7   :  { %p3489_p7 = pnand %p3487_p6, %p3484_p5 }
0x13f9   :  { %3492 = shalt.err (!%p3489_p7)
}
0x13fa   :  { %s3524_s4 = smov 128   ;;  %s3525_s5 = smov 8  }
0x13fb   :  { %2747 = dma.vmem_to_hbm [thread:$0]  %s2742_s13, 256, %s4679_s9, [#allocation3], %s3524_s4, %s3524_s4, %s3525_s5  }
0x13fc   :  { %3493 = dma.done.wait [#allocation3], 256  }
0x13fd   :  { %3494 = vsyncadd [#allocation3], 4294967040 }
0x13fe   :  { %2751 = vsyncpa [#allocation3], 1 }

</bundles_post_ra>
